<compile_context>
chip_gen: v7x
topology: tpu7x:2x2x1
jax: 0.10.0
libtpu: 0.0.40
codegen_flags: <defaults>
</compile_context>

<pallas_src>
import functools

import jax
import jax.numpy as jnp
from jax.experimental import pallas as pl
from jax.experimental.pallas import tpu as pltpu

EPS = 1e-5
ACT_DTYPE = jnp.bfloat16            # activations / matmul weights in HBM
VMEM_LIMIT = 48 * 1024 * 1024       # <= ~48 MiB keeps headroom on v7x (64 MiB)


def _pick_tile(dim, target, align):
    """Largest tile <= target that divides `dim` and respects `align`, else the
    full dim (full extents are always legal block shapes).
    TODO(synk): for awkward dims use pl.cdiv grid + masked tail instead of one
    huge fallback block."""
    if dim <= target:
        return dim
    t = (target // align) * align
    while t >= align:
        if dim % t == 0:
            return t
        t -= align
    return dim


def _pick_group_pack(C, gw):
    """Smallest multiple of gw that divides C and is a multiple of 128 (lane
    dense); fall back to the full channel extent (always legal)."""
    G = C // gw
    for k in range(1, G + 1):
        cp = k * gw
        if C % cp == 0 and cp % 128 == 0:
            return cp
    return C


def _pick_row_tile(Ho, Wo, target_rows=1024):
    """Divisor tHo of Ho s.t. tHo*Wo <= target_rows and (tHo*Wo) % 8 == 0,
    else the full Ho (full HW block is always legal)."""
    if Ho * Wo <= target_rows:
        return Ho
    cands = [t for t in range(1, Ho + 1)
             if Ho % t == 0 and (t * Wo) % 8 == 0 and t * Wo <= target_rows]
    return max(cands) if cands else Ho


# --------------------------------------------------------------------------
# Kernel 1: 1x1 conv as tiled matmul + folded-BN bias + optional ReLU.
# --------------------------------------------------------------------------
def _mm_bias_act_kernel(x_ref, w_ref, b_ref, o_ref, acc_ref, *, act):
    @pl.when(pl.program_id(2) == 0)
    def _init():
        acc_ref[...] = jnp.zeros_like(acc_ref)

    acc_ref[...] += jnp.dot(x_ref[...], w_ref[...],
                            preferred_element_type=jnp.float32)

    @pl.when(pl.program_id(2) == pl.num_programs(2) - 1)
    def _finalize():
        y = acc_ref[...] + b_ref[...]          # f32 epilogue (v5e-safe)
        if act:
            y = jnp.maximum(y, 0.0)
        o_ref[...] = y.astype(o_ref.dtype)


def conv1x1_bn_act(x2d, w, b, act=True):
    R, K = x2d.shape
    C = w.shape[1]
    tm = _pick_tile(R, 512, 8)
    tn = _pick_tile(C, 512, 128)
    tk = _pick_tile(K, 512, 128)
    cost = pl.CostEstimate(
        flops=2 * R * K * C,
        transcendentals=0,
        bytes_accessed=R * K * x2d.dtype.itemsize + K * C * w.dtype.itemsize
        + 4 * C + R * C * x2d.dtype.itemsize)
    return pl.pallas_call(
        functools.partial(_mm_bias_act_kernel, act=act),
        out_shape=jax.ShapeDtypeStruct((R, C), x2d.dtype),
        grid=(R // tm, C // tn, K // tk),
        in_specs=[pl.BlockSpec((tm, tk), lambda i, j, k: (i, k)),
                  pl.BlockSpec((tk, tn), lambda i, j, k: (k, j)),
                  pl.BlockSpec((1, tn), lambda i, j, k: (0, j))],
        out_specs=pl.BlockSpec((tm, tn), lambda i, j, k: (i, j)),
        scratch_shapes=[pltpu.VMEM((tm, tn), jnp.float32)],
        compiler_params=pltpu.CompilerParams(
            dimension_semantics=("parallel", "parallel", "arbitrary"),
            vmem_limit_bytes=VMEM_LIMIT),
        cost_estimate=cost,
    )(x2d, w, b)


# --------------------------------------------------------------------------
# Kernel 2: grouped 3x3 conv (stride 1 or 2) + folded-BN bias + ReLU.
# Grid is (group_pack, image, row_tile):
#   * weights resident across the image loop (index_map ignores n, r),
#   * padded input resident across the row loop (index_map ignores r),
#   * bf16 im2col slab built in VMEM, ONE MXU matmul per row tile,
#   * output written directly as (N, HW, C) channel slices,
#   * per-image pooled sums for SE accumulated across row tiles.
# --------------------------------------------------------------------------
def _grouped_conv3x3_kernel(x_ref, w_ref, b_ref, o_ref, p_ref, *, Wo, tHo, stride):
    cp = x_ref.shape[-1]
    r = pl.program_id(2)
    row0 = pl.multiple_of(r * tHo, tHo)
    tHW = tHo * Wo
    taps = []
    for dy in range(3):
        for dx in range(3):
            if stride == 1:
                xt = x_ref[0, 0, pl.ds(row0 + dy, tHo), dx:dx + Wo, :]
            else:
                ph = (dy % 2) * 2 + (dx % 2)          # phase index (stride 2)
                oy, ox = dy // 2, dx // 2             # offset inside phase
                xt = x_ref[0, ph, pl.ds(row0 + oy, tHo), ox:ox + Wo, :]
            taps.append(xt.reshape(tHW, cp))          # bf16, no f32 cast
    slab = jnp.concatenate(taps, axis=-1)             # (tHW, 9*cp) bf16
    y = jnp.dot(slab, w_ref[0], preferred_element_type=jnp.float32)
    y = jnp.maximum(y + b_ref[...], 0.0)              # f32 epilogue
    o_ref[0] = y.astype(o_ref.dtype)

    ps = jnp.sum(y, axis=0, keepdims=True)            # (1, cp) partial pool
    @pl.when(r == 0)
    def _init():
        p_ref[...] = jnp.zeros_like(p_ref)
    p_ref[0] = p_ref[0] + ps


def grouped_conv3x3_bn_relu(h, w2p, b2, stride):
    """h: (N, H, W, C) bf16 -> (N, Ho*Wo, C) activations + (N, 1, C) pooled."""
    N, H, W, C = h.shape
    NP, _, cpack = w2p.shape
    Ho = (H - 1) // stride + 1
    Wo = (W - 1) // stride + 1
    HW = Ho * Wo

    # TODO(synk): fold padding / phase gather into the kernel via masked taps
    # so the activation is never touched by XLA before the kernel reads it.
    hp = jnp.pad(h, ((0, 0), (1, 1), (1, 1), (0, 0)))  # spatial pad=1
    if stride == 1:
        xph = hp[:, None]                              # (N, 1, H+2, W+2, C)
    else:
        ph_pad = hp.shape[1] % 2
        pw_pad = hp.shape[2] % 2
        if ph_pad or pw_pad:
            hp = jnp.pad(hp, ((0, 0), (0, ph_pad), (0, pw_pad), (0, 0)))
        xph = jnp.stack([hp[:, py::2, px::2, :]
                         for py in range(2) for px in range(2)], axis=1)
    S2, Hq, Wq = xph.shape[1], xph.shape[2], xph.shape[3]

    tHo = _pick_row_tile(Ho, Wo)
    R = Ho // tHo
    tHW = tHo * Wo

    kern = functools.partial(_grouped_conv3x3_kernel, Wo=Wo, tHo=tHo, stride=stride)
    h2, pooled = pl.pallas_call(
        kern,
        out_shape=(jax.ShapeDtypeStruct((N, HW, C), h.dtype),
                   jax.ShapeDtypeStruct((N, 1, C), jnp.float32)),
        grid=(NP, N, R),
        in_specs=[pl.BlockSpec((1, S2, Hq, Wq, cpack),
                               lambda g, n, r: (n, 0, 0, 0, g)),
                  pl.BlockSpec((1, 9 * cpack, cpack), lambda g, n, r: (g, 0, 0)),
                  pl.BlockSpec((1, cpack), lambda g, n, r: (0, g))],
        out_specs=[pl.BlockSpec((1, tHW, cpack), lambda g, n, r: (n, r, g)),
                   pl.BlockSpec((1, 1, cpack), lambda g, n, r: (n, 0, g))],
        compiler_params=pltpu.CompilerParams(
            dimension_semantics=("parallel", "parallel", "arbitrary"),
            vmem_limit_bytes=VMEM_LIMIT),
    )(xph, w2p, b2)
    return h2, pooled, Ho, Wo


# --------------------------------------------------------------------------
# Kernel 3: conv3 (1x1) fused with the SE gate (computed once per image under
# pl.when into a VMEM scratch), SE scaling (bf16), shortcut (identity OR fused
# down-sample 1x1 conv+BN) and the final ReLU.
# --------------------------------------------------------------------------
def _conv3_se_shortcut_kernel(p_ref, w1_ref, b1_ref, w2_ref, b2_ref,
                              h_ref, w3_ref, b3_ref, sc_ref, *rest,
                              inv_hw, downsample):
    if downsample:
        wd_ref, bd_ref, o_ref, g_sc = rest
    else:
        o_ref, g_sc = rest

    @pl.when(pl.program_id(1) == 0)
    def _gate():
        m = p_ref[0] * inv_hw                                  # (1, C) mean
        s = jnp.dot(m, w1_ref[...], preferred_element_type=jnp.float32) + b1_ref[...]
        s = jnp.maximum(s, 0.0)
        s = jnp.dot(s, w2_ref[...], preferred_element_type=jnp.float32) + b2_ref[...]
        g_sc[...] = jax.nn.sigmoid(s)                          # (1, C) f32

    xg = h_ref[0] * g_sc[...].astype(h_ref.dtype)              # bf16 SE scale
    y = jnp.dot(xg, w3_ref[...], preferred_element_type=jnp.float32) + b3_ref[...]
    if downsample:
        sc = jnp.dot(sc_ref[0], wd_ref[...],
                     preferred_element_type=jnp.float32) + bd_ref[...]
    else:
        sc = sc_ref[0].astype(jnp.float32)
    o_ref[0] = jnp.maximum(y + sc, 0.0).astype(o_ref.dtype)


def conv3_se_shortcut(h2, pooled, p, shortcut, hw, downsample):
    N, HW, C = h2.shape
    Csq = p['se_w1'].shape[1]
    tr = _pick_tile(HW, 512, 8)

    in_specs = [
        pl.BlockSpec((1, 1, C), lambda n, j: (n, 0, 0)),        # pooled
        pl.BlockSpec((C, Csq), lambda n, j: (0, 0)),            # se_w1
        pl.BlockSpec((1, Csq), lambda n, j: (0, 0)),            # se_b1
        pl.BlockSpec((Csq, C), lambda n, j: (0, 0)),            # se_w2
        pl.BlockSpec((1, C), lambda n, j: (0, 0)),              # se_b2
        pl.BlockSpec((1, tr, C), lambda n, j: (n, j, 0)),       # h2
        pl.BlockSpec((C, C), lambda n, j: (0, 0)),              # w3
        pl.BlockSpec((1, C), lambda n, j: (0, 0)),              # b3
    ]
    args = [pooled, p['se_w1'], p['se_b1'], p['se_w2'], p['se_b2'],
            h2, p['w3'], p['b3'], shortcut]
    if downsample:
        Cin = shortcut.shape[-1]
        in_specs += [pl.BlockSpec((1, tr, Cin), lambda n, j: (n, j, 0)),
                     pl.BlockSpec((Cin, C), lambda n, j: (0, 0)),
                     pl.BlockSpec((1, C), lambda n, j: (0, 0))]
        args += [p['wd'], p['bd']]
        flops = 2 * N * HW * C * (C + Cin)
    else:
        in_specs += [pl.BlockSpec((1, tr, C), lambda n, j: (n, j, 0))]
        flops = 2 * N * HW * C * C
    cost = pl.CostEstimate(
        flops=flops, transcendentals=N * C,
        bytes_accessed=sum(int(a.size) * a.dtype.itemsize for a in args)
        + N * HW * C * h2.dtype.itemsize)

    kern = functools.partial(_conv3_se_shortcut_kernel,
                             inv_hw=1.0 / float(hw), downsample=downsample)
    return pl.pallas_call(
        kern,
        out_shape=jax.ShapeDtypeStruct((N, HW, C), h2.dtype),
        grid=(N, HW // tr),
        in_specs=in_specs,
        out_specs=pl.BlockSpec((1, tr, C), lambda n, j: (n, j, 0)),
        scratch_shapes=[pltpu.VMEM((1, C), jnp.float32)],
        compiler_params=pltpu.CompilerParams(
            dimension_semantics=("parallel", "arbitrary"),
            vmem_limit_bytes=VMEM_LIMIT),
        cost_estimate=cost,
    )(*args)


# --------------------------------------------------------------------------
# Parameter init (BatchNorm folded; BN scale folded into weight columns).
# --------------------------------------------------------------------------
def fold_bn(gamma, beta, mean, var):
    s = gamma / jnp.sqrt(var + EPS)
    return s, beta - mean * s


def init_bn(key, c):
    k1, k2, k3, k4 = jax.random.split(key, 4)
    gamma = 1.0 + 0.1 * jax.random.normal(k1, (c,), jnp.float32)
    beta = 0.1 * jax.random.normal(k2, (c,), jnp.float32)
    mean = 0.1 * jax.random.normal(k3, (c,), jnp.float32)
    var = jax.random.uniform(k4, (c,), jnp.float32, 0.5, 1.5)
    return fold_bn(gamma, beta, mean, var)


def _pack_grouped_weight(w, bn_scale, gw, cpack):
    """torch-style (out_c, gw, 3, 3) grouped weight -> (NP, 9*cpack, cpack)
    block-diagonal packed weight with BN scale folded into output channels.
    TODO(synk): for very large group counts with a non-lane-dense pack this
    block-diagonal form wastes cpack/gw FLOPs; switch to per-group lane-slice
    dots there."""
    out_c = w.shape[0]
    NP = out_c // cpack
    gpack = cpack // gw
    w = w * bn_scale[:, None, None, None]                      # fold BN scale
    wg = w.reshape(NP, gpack, gw, gw, 3, 3)                    # (NP,g,out,in,ky,kx)
    packed = jnp.zeros((NP, 3, 3, cpack, cpack), jnp.float32)
    for g in range(gpack):
        blk = jnp.transpose(wg[:, g], (0, 3, 4, 2, 1))         # (NP,3,3,in,out)
        packed = packed.at[:, :, :, g * gw:(g + 1) * gw,
                           g * gw:(g + 1) * gw].set(blk)
    return packed.reshape(NP, 9 * cpack, cpack).astype(ACT_DTYPE)


def init_block(key, in_c, out_c, group_width, se_ratio, stride):
    keys = jax.random.split(key, 12)
    p = {}
    # conv1: 1x1 -> (in_c, out_c) matmul weight with BN scale folded in.
    w1 = 0.1 * jax.random.normal(keys[0], (out_c, in_c), jnp.float32)
    s1, b1 = init_bn(keys[1], out_c)
    p['w1'] = (w1.T * s1[None, :]).astype(ACT_DTYPE)
    p['b1'] = b1.reshape(1, out_c)
    # conv2: grouped 3x3, torch weight (out_c, gw, 3, 3) -> lane-packed blocks.
    gw = group_width
    cpack = _pick_group_pack(out_c, gw)
    wg = 0.1 * jax.random.normal(keys[2], (out_c, gw, 3, 3), jnp.float32)
    s2, b2 = init_bn(keys[3], out_c)
    p['w2'] = _pack_grouped_weight(wg, s2, gw, cpack)
    p['b2'] = b2.reshape(1, out_c)
    # SqueezeExcitation: squeeze_c from the block *input* channels (spec: int()).
    squeeze_c = int(in_c * se_ratio)
    p['se_w1'] = (0.1 * jax.random.normal(keys[4], (squeeze_c, out_c), jnp.float32)).T
    p['se_b1'] = (0.1 * jax.random.normal(keys[5], (squeeze_c,), jnp.float32)).reshape(1, squeeze_c)
    p['se_w2'] = (0.1 * jax.random.normal(keys[6], (out_c, squeeze_c), jnp.float32)).T
    p['se_b2'] = (0.1 * jax.random.normal(keys[7], (out_c,), jnp.float32)).reshape(1, out_c)
    # conv3: 1x1, no activation (ReLU happens after the residual add).
    w3 = 0.1 * jax.random.normal(keys[8], (out_c, out_c), jnp.float32)
    s3, b3 = init_bn(keys[9], out_c)
    p['w3'] = (w3.T * s3[None, :]).astype(ACT_DTYPE)
    p['b3'] = b3.reshape(1, out_c)
    # downsample (1x1, stride) only when needed.
    if in_c != out_c or stride != 1:
        wdt = 0.1 * jax.random.normal(keys[10], (out_c, in_c), jnp.float32)
        sd, bd = init_bn(keys[11], out_c)
        p['wd'] = (wdt.T * sd[None, :]).astype(ACT_DTYPE)
        p['bd'] = bd.reshape(1, out_c)
    return p


def init_reg_stage(key, in_c, out_c, depth, group_width, se_ratio):
    params = []
    keys = jax.random.split(key, depth)
    for i in range(depth):
        stride = 2 if i == 0 else 1
        block_in_c = in_c if i == 0 else out_c
        params.append(init_block(keys[i], block_in_c, out_c, group_width,
                                 se_ratio, stride))
    return params


# --------------------------------------------------------------------------
# Forward pass.
# --------------------------------------------------------------------------
def bottleneck_forward(x, p, stride):
    # x: (N, H, W, Cin) NHWC bf16
    N, H, W, Cin = x.shape
    C = p['b1'].shape[-1]
    # conv1: 1x1 + BN + ReLU (tiled matmul)
    h = conv1x1_bn_act(x.reshape(N * H * W, Cin), p['w1'], p['b1'], act=True)
    h = h.reshape(N, H, W, C)
    # conv2: grouped 3x3 (stride) + BN + ReLU, with fused SE pooling; output is
    # already (N, HW, C) — no post-kernel transpose.
    h2, pooled, Ho, Wo = grouped_conv3x3_bn_relu(h, p['w2'], p['b2'], stride)
    HW = Ho * Wo
    # conv3 + SE gate + SE scaling + shortcut (+ fused downsample) + ReLU
    if 'wd' in p:
        # TODO(synk): fold this strided shortcut gather into the conv3 BlockSpec
        # instead of an XLA slice.
        xs = x[:, ::stride, ::stride, :] if stride > 1 else x
        out = conv3_se_shortcut(h2, pooled, p, xs.reshape(N, HW, Cin), HW,
                                downsample=True)
    else:
        out = conv3_se_shortcut(h2, pooled, p, x.reshape(N, HW, C), HW,
                                downsample=False)
    return out.reshape(N, Ho, Wo, C)


@jax.jit
def reg_stage_forward(x_nchw, params):
    x = jnp.transpose(x_nchw, (0, 2, 3, 1)).astype(ACT_DTYPE)   # NCHW -> NHWC
    for i, p in enumerate(params):
        stride = 2 if i == 0 else 1
        x = bottleneck_forward(x, p, stride)
    return jnp.transpose(x, (0, 3, 1, 2)).astype(jnp.float32)   # NHWC -> NCHW


# --------------------------------------------------------------------------
# main
# --------------------------------------------------------------------------
if __name__ == "__main__":
    key = jax.random.PRNGKey(0)
    kx, kp = jax.random.split(key)

    # RegStage(in_c=4, out_c=8, depth=2, group_width=4, se_ratio=0.25)
    in_c, out_c, depth, group_width, se_ratio = 4, 8, 2, 4, 0.25
    x = jax.random.normal(kx, (2, in_c, 16, 16), jnp.float32)   # NCHW like PyTorch

    params = init_reg_stage(kp, in_c, out_c, depth, group_width, se_ratio)

    y = reg_stage_forward(x, params)
    y = jax.block_until_ready(y)
    assert y.shape == (2, out_c, 8, 8), y.shape   # stride-2 first block halves spatial
    print("KERNEL_OK")
</pallas_src>

<mosaic_0001>
module attributes {stable_mosaic.version = 11 : i64} {
  func.func @_mm_bias_act_kernel(%arg0: i32, %arg1: i32, %arg2: i32, %arg3: memref<512x4xbf16, #tpu.memory_space<vmem>>, %arg4: memref<4x8xbf16, #tpu.memory_space<vmem>>, %arg5: memref<1x8xf32, #tpu.memory_space<vmem>>, %arg6: memref<512x8xbf16, #tpu.memory_space<vmem>>, %arg7: memref<512x8xf32, #tpu.memory_space<vmem>>) attributes {dimension_semantics = [#tpu.dimension_semantics<parallel>, #tpu.dimension_semantics<parallel>, #tpu.dimension_semantics<arbitrary>], iteration_bounds = array<i64: 1, 1, 1>, scalar_prefetch = 0 : i64, scratch_operands = 1 : i64, tpu.core_type = #tpu.core_type<tc>, window_params = [{transform_indices = @transform_0, window_bounds = array<i64: 512, 4>}, {transform_indices = @transform_1, window_bounds = array<i64: 4, 8>}, {transform_indices = @transform_2, window_bounds = array<i64: 1, 8>}, {transform_indices = @transform_3, window_bounds = array<i64: 512, 8>}]} {
    %c0_i32 = arith.constant 0 : i32
    %0 = arith.cmpi eq, %arg2, %c0_i32 : i32
    %1 = arith.extui %0 : i1 to i32
    %c0_i32_0 = arith.constant 0 : i32
    %2 = arith.cmpi ne, %1, %c0_i32_0 : i32
    scf.if %2 {
      %cst_10 = arith.constant 0.000000e+00 : f32
      %12 = vector.broadcast %cst_10 : f32 to vector<512x8xf32>
      %c0_11 = arith.constant 0 : index
      %c0_12 = arith.constant 0 : index
      %13 = vector.load %arg7[%c0_11, %c0_12] : memref<512x8xf32, #tpu.memory_space<vmem>>, vector<512x8xf32>
      tpu.vector_store %arg7[%c0_11, %c0_12], %12 {strides = array<i32>} : memref<512x8xf32, #tpu.memory_space<vmem>>, vector<512x8xf32>,
    } else {
    }
    %c0 = arith.constant 0 : index
    %c0_1 = arith.constant 0 : index
    %3 = vector.load %arg7[%c0, %c0_1] : memref<512x8xf32, #tpu.memory_space<vmem>>, vector<512x8xf32>
    %c0_2 = arith.constant 0 : index
    %c0_3 = arith.constant 0 : index
    %4 = vector.load %arg3[%c0_2, %c0_3] : memref<512x4xbf16, #tpu.memory_space<vmem>>, vector<512x4xbf16>
    %c0_4 = arith.constant 0 : index
    %c0_5 = arith.constant 0 : index
    %5 = vector.load %arg4[%c0_4, %c0_5] : memref<4x8xbf16, #tpu.memory_space<vmem>>, vector<4x8xbf16>
    %cst = arith.constant dense<0.000000e+00> : vector<512x8xf32>
    %6 = tpu.matmul %4, %5, %cst {dimension_numbers = #tpu.dot_dimension_numbers<[1], [0], [0], [1], [0, 0, 1, 1], [], []>} : vector<512x4xbf16>, vector<4x8xbf16>, vector<512x8xf32> -> vector<512x8xf32>
    %7 = arith.addf %3, %6 : vector<512x8xf32>
    %c0_6 = arith.constant 0 : index
    %c0_7 = arith.constant 0 : index
    %8 = vector.load %arg7[%c0_6, %c0_7] : memref<512x8xf32, #tpu.memory_space<vmem>>, vector<512x8xf32>
    tpu.vector_store %arg7[%c0_6, %c0_7], %7 {strides = array<i32>} : memref<512x8xf32, #tpu.memory_space<vmem>>, vector<512x8xf32>,
    %c0_i32_8 = arith.constant 0 : i32
    %9 = arith.cmpi eq, %arg2, %c0_i32_8 : i32
    %10 = arith.extui %9 : i1 to i32
    %c0_i32_9 = arith.constant 0 : i32
    %11 = arith.cmpi ne, %10, %c0_i32_9 : i32
    scf.if %11 {
      %c0_10 = arith.constant 0 : index
      %c0_11 = arith.constant 0 : index
      %12 = vector.load %arg7[%c0_10, %c0_11] : memref<512x8xf32, #tpu.memory_space<vmem>>, vector<512x8xf32>
      %c0_12 = arith.constant 0 : index
      %c0_13 = arith.constant 0 : index
      %13 = vector.load %arg5[%c0_12, %c0_13] : memref<1x8xf32, #tpu.memory_space<vmem>>, vector<1x8xf32>
      %14 = vector.broadcast %13 : vector<1x8xf32> to vector<512x8xf32>
      %15 = arith.addf %12, %14 : vector<512x8xf32>
      %cst_14 = arith.constant 0.000000e+00 : f32
      %16 = vector.broadcast %cst_14 : f32 to vector<512x8xf32>
      %17 = arith.maximumf %15, %16 : vector<512x8xf32>
      %18 = arith.truncf %17 : vector<512x8xf32> to vector<512x8xbf16>
      %c0_15 = arith.constant 0 : index
      %c0_16 = arith.constant 0 : index
      %19 = vector.load %arg6[%c0_15, %c0_16] : memref<512x8xbf16, #tpu.memory_space<vmem>>, vector<512x8xbf16>
      tpu.vector_store %arg6[%c0_15, %c0_16], %18 {strides = array<i32>} : memref<512x8xbf16, #tpu.memory_space<vmem>>, vector<512x8xbf16>,
    } else {
    }
    return
  }
  func.func @transform_0(%arg0: i32, %arg1: i32, %arg2: i32) -> (i32, i32) {
    %c0_i32 = arith.constant 0 : i32
    return %arg0, %arg2 : i32, i32
  }
  func.func @transform_1(%arg0: i32, %arg1: i32, %arg2: i32) -> (i32, i32) {
    %c0_i32 = arith.constant 0 : i32
    return %arg2, %arg1 : i32, i32
  }
  func.func @transform_2(%arg0: i32, %arg1: i32, %arg2: i32) -> (i32, i32) {
    %c0_i32 = arith.constant 0 : i32
    %c0_i32_0 = arith.constant 0 : i32
    return %c0_i32, %arg1 : i32, i32
  }
  func.func @transform_3(%arg0: i32, %arg1: i32, %arg2: i32) -> (i32, i32) {
    %c0_i32 = arith.constant 0 : i32
    return %arg0, %arg1 : i32, i32
  }
}

module attributes {stable_mosaic.version = 11 : i64} {
  func.func @_grouped_conv3x3_kernel(%arg0: i32, %arg1: i32, %arg2: i32, %arg3: memref<1x4x9x9x8xbf16, #tpu.memory_space<vmem>>, %arg4: memref<1x72x8xbf16, #tpu.memory_space<vmem>>, %arg5: memref<1x8xf32, #tpu.memory_space<vmem>>, %arg6: memref<1x64x8xbf16, #tpu.memory_space<vmem>>, %arg7: memref<1x1x8xf32, #tpu.memory_space<vmem>>) attributes {dimension_semantics = [#tpu.dimension_semantics<parallel>, #tpu.dimension_semantics<parallel>, #tpu.dimension_semantics<arbitrary>], iteration_bounds = array<i64: 1, 2, 1>, scalar_prefetch = 0 : i64, scratch_operands = 0 : i64, tpu.core_type = #tpu.core_type<tc>, window_params = [{transform_indices = @transform_0, window_bounds = array<i64: 1, 4, 9, 9, 8>}, {transform_indices = @transform_1, window_bounds = array<i64: 1, 72, 8>}, {transform_indices = @transform_2, window_bounds = array<i64: 1, 8>}, {transform_indices = @transform_3, window_bounds = array<i64: 1, 64, 8>}, {transform_indices = @transform_4, window_bounds = array<i64: 1, 1, 8>}]} {
    %c8_i32 = arith.constant 8 : i32
    %0 = arith.muli %arg2, %c8_i32 : i32
    %1 = tpu.assume_multiple %0, 8 : i32
    %c0_i32 = arith.constant 0 : i32
    %2 = arith.addi %1, %c0_i32 : i32
    %c0 = arith.constant 0 : index
    %c0_0 = arith.constant 0 : index
    %3 = arith.index_cast %2 : i32 to index
    %c0_1 = arith.constant 0 : index
    %c0_2 = arith.constant 0 : index
    %4 = vector.load %arg3[%c0, %c0_0, %3, %c0_1, %c0_2] : memref<1x4x9x9x8xbf16, #tpu.memory_space<vmem>>, vector<1x1x8x8x8xbf16>
    %5 = vector.shape_cast %4 : vector<1x1x8x8x8xbf16> to vector<8x8x8xbf16>
    %6 = vector.shape_cast %5 : vector<8x8x8xbf16> to vector<64x8xbf16>
    %c0_i32_3 = arith.constant 0 : i32
    %7 = arith.addi %1, %c0_i32_3 : i32
    %c0_4 = arith.constant 0 : index
    %c1 = arith.constant 1 : index
    %8 = arith.index_cast %7 : i32 to index
    %c0_5 = arith.constant 0 : index
    %c0_6 = arith.constant 0 : index
    %9 = vector.load %arg3[%c0_4, %c1, %8, %c0_5, %c0_6] : memref<1x4x9x9x8xbf16, #tpu.memory_space<vmem>>, vector<1x1x8x8x8xbf16>
    %10 = vector.shape_cast %9 : vector<1x1x8x8x8xbf16> to vector<8x8x8xbf16>
    %11 = vector.shape_cast %10 : vector<8x8x8xbf16> to vector<64x8xbf16>
    %c0_i32_7 = arith.constant 0 : i32
    %12 = arith.addi %1, %c0_i32_7 : i32
    %c0_8 = arith.constant 0 : index
    %c0_9 = arith.constant 0 : index
    %13 = arith.index_cast %12 : i32 to index
    %c1_10 = arith.constant 1 : index
    %c0_11 = arith.constant 0 : index
    %14 = vector.load %arg3[%c0_8, %c0_9, %13, %c1_10, %c0_11] : memref<1x4x9x9x8xbf16, #tpu.memory_space<vmem>>, vector<1x1x8x8x8xbf16>
    %15 = vector.shape_cast %14 : vector<1x1x8x8x8xbf16> to vector<8x8x8xbf16>
    %16 = vector.shape_cast %15 : vector<8x8x8xbf16> to vector<64x8xbf16>
    %c0_i32_12 = arith.constant 0 : i32
    %17 = arith.addi %1, %c0_i32_12 : i32
    %c0_13 = arith.constant 0 : index
    %c2 = arith.constant 2 : index
    %18 = arith.index_cast %17 : i32 to index
    %c0_14 = arith.constant 0 : index
    %c0_15 = arith.constant 0 : index
    %19 = vector.load %arg3[%c0_13, %c2, %18, %c0_14, %c0_15] : memref<1x4x9x9x8xbf16, #tpu.memory_space<vmem>>, vector<1x1x8x8x8xbf16>
    %20 = vector.shape_cast %19 : vector<1x1x8x8x8xbf16> to vector<8x8x8xbf16>
    %21 = vector.shape_cast %20 : vector<8x8x8xbf16> to vector<64x8xbf16>
    %c0_i32_16 = arith.constant 0 : i32
    %22 = arith.addi %1, %c0_i32_16 : i32
    %c0_17 = arith.constant 0 : index
    %c3 = arith.constant 3 : index
    %23 = arith.index_cast %22 : i32 to index
    %c0_18 = arith.constant 0 : index
    %c0_19 = arith.constant 0 : index
    %24 = vector.load %arg3[%c0_17, %c3, %23, %c0_18, %c0_19] : memref<1x4x9x9x8xbf16, #tpu.memory_space<vmem>>, vector<1x1x8x8x8xbf16>
    %25 = vector.shape_cast %24 : vector<1x1x8x8x8xbf16> to vector<8x8x8xbf16>
    %26 = vector.shape_cast %25 : vector<8x8x8xbf16> to vector<64x8xbf16>
    %c0_i32_20 = arith.constant 0 : i32
    %27 = arith.addi %1, %c0_i32_20 : i32
    %c0_21 = arith.constant 0 : index
    %c2_22 = arith.constant 2 : index
    %28 = arith.index_cast %27 : i32 to index
    %c1_23 = arith.constant 1 : index
    %c0_24 = arith.constant 0 : index
    %29 = vector.load %arg3[%c0_21, %c2_22, %28, %c1_23, %c0_24] : memref<1x4x9x9x8xbf16, #tpu.memory_space<vmem>>, vector<1x1x8x8x8xbf16>
    %30 = vector.shape_cast %29 : vector<1x1x8x8x8xbf16> to vector<8x8x8xbf16>
    %31 = vector.shape_cast %30 : vector<8x8x8xbf16> to vector<64x8xbf16>
    %c1_i32 = arith.constant 1 : i32
    %32 = arith.addi %1, %c1_i32 : i32
    %c0_25 = arith.constant 0 : index
    %c0_26 = arith.constant 0 : index
    %33 = arith.index_cast %32 : i32 to index
    %c0_27 = arith.constant 0 : index
    %c0_28 = arith.constant 0 : index
    %34 = vector.load %arg3[%c0_25, %c0_26, %33, %c0_27, %c0_28] : memref<1x4x9x9x8xbf16, #tpu.memory_space<vmem>>, vector<1x1x8x8x8xbf16>
    %35 = vector.shape_cast %34 : vector<1x1x8x8x8xbf16> to vector<8x8x8xbf16>
    %36 = vector.shape_cast %35 : vector<8x8x8xbf16> to vector<64x8xbf16>
    %c1_i32_29 = arith.constant 1 : i32
    %37 = arith.addi %1, %c1_i32_29 : i32
    %c0_30 = arith.constant 0 : index
    %c1_31 = arith.constant 1 : index
    %38 = arith.index_cast %37 : i32 to index
    %c0_32 = arith.constant 0 : index
    %c0_33 = arith.constant 0 : index
    %39 = vector.load %arg3[%c0_30, %c1_31, %38, %c0_32, %c0_33] : memref<1x4x9x9x8xbf16, #tpu.memory_space<vmem>>, vector<1x1x8x8x8xbf16>
    %40 = vector.shape_cast %39 : vector<1x1x8x8x8xbf16> to vector<8x8x8xbf16>
    %41 = vector.shape_cast %40 : vector<8x8x8xbf16> to vector<64x8xbf16>
    %c1_i32_34 = arith.constant 1 : i32
    %42 = arith.addi %1, %c1_i32_34 : i32
    %c0_35 = arith.constant 0 : index
    %c0_36 = arith.constant 0 : index
    %43 = arith.index_cast %42 : i32 to index
    %c1_37 = arith.constant 1 : index
    %c0_38 = arith.constant 0 : index
    %44 = vector.load %arg3[%c0_35, %c0_36, %43, %c1_37, %c0_38] : memref<1x4x9x9x8xbf16, #tpu.memory_space<vmem>>, vector<1x1x8x8x8xbf16>
    %45 = vector.shape_cast %44 : vector<1x1x8x8x8xbf16> to vector<8x8x8xbf16>
    %46 = vector.shape_cast %45 : vector<8x8x8xbf16> to vector<64x8xbf16>
    %47 = tpu.concatenate %6, %11, %16, %21, %26, %31, %36, %41, %46 in 1 : vector<64x8xbf16>, vector<64x8xbf16>, vector<64x8xbf16>, vector<64x8xbf16>, vector<64x8xbf16>, vector<64x8xbf16>, vector<64x8xbf16>, vector<64x8xbf16>, vector<64x8xbf16> -> vector<64x72xbf16>
    %c0_39 = arith.constant 0 : index
    %c0_40 = arith.constant 0 : index
    %c0_41 = arith.constant 0 : index
    %48 = vector.load %arg4[%c0_39, %c0_40, %c0_41] : memref<1x72x8xbf16, #tpu.memory_space<vmem>>, vector<1x72x8xbf16>
    %49 = vector.shape_cast %48 : vector<1x72x8xbf16> to vector<72x8xbf16>
    %cst = arith.constant dense<0.000000e+00> : vector<64x8xf32>
    %50 = tpu.matmul %47, %49, %cst {dimension_numbers = #tpu.dot_dimension_numbers<[1], [0], [0], [1], [0, 0, 1, 1], [], []>} : vector<64x72xbf16>, vector<72x8xbf16>, vector<64x8xf32> -> vector<64x8xf32>
    %c0_42 = arith.constant 0 : index
    %c0_43 = arith.constant 0 : index
    %51 = vector.load %arg5[%c0_42, %c0_43] : memref<1x8xf32, #tpu.memory_space<vmem>>, vector<1x8xf32>
    %52 = vector.broadcast %51 : vector<1x8xf32> to vector<64x8xf32>
    %53 = arith.addf %50, %52 : vector<64x8xf32>
    %cst_44 = arith.constant 0.000000e+00 : f32
    %54 = vector.broadcast %cst_44 : f32 to vector<64x8xf32>
    %55 = arith.maximumf %53, %54 : vector<64x8xf32>
    %56 = arith.truncf %55 : vector<64x8xf32> to vector<64x8xbf16>
    %c0_45 = arith.constant 0 : index
    %c0_46 = arith.constant 0 : index
    %c0_47 = arith.constant 0 : index
    %57 = vector.load %arg6[%c0_45, %c0_46, %c0_47] : memref<1x64x8xbf16, #tpu.memory_space<vmem>>, vector<1x64x8xbf16>
    %58 = vector.shape_cast %57 : vector<1x64x8xbf16> to vector<64x8xbf16>
    %59 = vector.shape_cast %56 : vector<64x8xbf16> to vector<1x64x8xbf16>
    tpu.vector_store %arg6[%c0_45, %c0_46, %c0_47], %59 {strides = array<i32>} : memref<1x64x8xbf16, #tpu.memory_space<vmem>>, vector<1x64x8xbf16>,
    %cst_48 = arith.constant dense<0.000000e+00> : vector<8xf32>
    %60 = vector.multi_reduction <add>, %55, %cst_48 [0] : vector<64x8xf32> to vector<8xf32>
    %61 = vector.shape_cast %60 : vector<8xf32> to vector<1x8xf32>
    %c0_i32_49 = arith.constant 0 : i32
    %62 = arith.cmpi eq, %arg2, %c0_i32_49 : i32
    %63 = arith.extui %62 : i1 to i32
    %c0_i32_50 = arith.constant 0 : i32
    %64 = arith.cmpi ne, %63, %c0_i32_50 : i32
    scf.if %64 {
      %cst_57 = arith.constant 0.000000e+00 : f32
      %71 = vector.broadcast %cst_57 : f32 to vector<1x1x8xf32>
      %c0_58 = arith.constant 0 : index
      %c0_59 = arith.constant 0 : index
      %c0_60 = arith.constant 0 : index
      %72 = vector.load %arg7[%c0_58, %c0_59, %c0_60] : memref<1x1x8xf32, #tpu.memory_space<vmem>>, vector<1x1x8xf32>
      tpu.vector_store %arg7[%c0_58, %c0_59, %c0_60], %71 {strides = array<i32>} : memref<1x1x8xf32, #tpu.memory_space<vmem>>, vector<1x1x8xf32>,
    } else {
    }
    %c0_51 = arith.constant 0 : index
    %c0_52 = arith.constant 0 : index
    %c0_53 = arith.constant 0 : index
    %65 = vector.load %arg7[%c0_51, %c0_52, %c0_53] : memref<1x1x8xf32, #tpu.memory_space<vmem>>, vector<1x1x8xf32>
    %66 = vector.shape_cast %65 : vector<1x1x8xf32> to vector<1x8xf32>
    %67 = arith.addf %66, %61 : vector<1x8xf32>
    %c0_54 = arith.constant 0 : index
    %c0_55 = arith.constant 0 : index
    %c0_56 = arith.constant 0 : index
    %68 = vector.load %arg7[%c0_54, %c0_55, %c0_56] : memref<1x1x8xf32, #tpu.memory_space<vmem>>, vector<1x1x8xf32>
    %69 = vector.shape_cast %68 : vector<1x1x8xf32> to vector<1x8xf32>
    %70 = vector.shape_cast %67 : vector<1x8xf32> to vector<1x1x8xf32>
    tpu.vector_store %arg7[%c0_54, %c0_55, %c0_56], %70 {strides = array<i32>} : memref<1x1x8xf32, #tpu.memory_space<vmem>>, vector<1x1x8xf32>,
    return
  }
  func.func @transform_0(%arg0: i32, %arg1: i32, %arg2: i32) -> (i32, i32, i32, i32, i32) {
    %c0_i32 = arith.constant 0 : i32
    %c0_i32_0 = arith.constant 0 : i32
    %c0_i32_1 = arith.constant 0 : i32
    %c0_i32_2 = arith.constant 0 : i32
    return %arg1, %c0_i32, %c0_i32_0, %c0_i32_1, %arg0 : i32, i32, i32, i32, i32
  }
  func.func @transform_1(%arg0: i32, %arg1: i32, %arg2: i32) -> (i32, i32, i32) {
    %c0_i32 = arith.constant 0 : i32
    %c0_i32_0 = arith.constant 0 : i32
    %c0_i32_1 = arith.constant 0 : i32
    return %arg0, %c0_i32, %c0_i32_0 : i32, i32, i32
  }
  func.func @transform_2(%arg0: i32, %arg1: i32, %arg2: i32) -> (i32, i32) {
    %c0_i32 = arith.constant 0 : i32
    %c0_i32_0 = arith.constant 0 : i32
    return %c0_i32, %arg0 : i32, i32
  }
  func.func @transform_3(%arg0: i32, %arg1: i32, %arg2: i32) -> (i32, i32, i32) {
    %c0_i32 = arith.constant 0 : i32
    return %arg1, %arg2, %arg0 : i32, i32, i32
  }
  func.func @transform_4(%arg0: i32, %arg1: i32, %arg2: i32) -> (i32, i32, i32) {
    %c0_i32 = arith.constant 0 : i32
    %c0_i32_0 = arith.constant 0 : i32
    return %arg1, %c0_i32, %arg0 : i32, i32, i32
  }
}

module attributes {stable_mosaic.version = 11 : i64} {
  func.func @_conv3_se_shortcut_kernel(%arg0: i32, %arg1: i32, %arg2: memref<1x1x8xf32, #tpu.memory_space<vmem>>, %arg3: memref<8x1xf32, #tpu.memory_space<vmem>>, %arg4: memref<1x1xf32, #tpu.memory_space<vmem>>, %arg5: memref<1x8xf32, #tpu.memory_space<vmem>>, %arg6: memref<1x8xf32, #tpu.memory_space<vmem>>, %arg7: memref<1x64x8xbf16, #tpu.memory_space<vmem>>, %arg8: memref<8x8xbf16, #tpu.memory_space<vmem>>, %arg9: memref<1x8xf32, #tpu.memory_space<vmem>>, %arg10: memref<1x64x4xbf16, #tpu.memory_space<vmem>>, %arg11: memref<4x8xbf16, #tpu.memory_space<vmem>>, %arg12: memref<1x8xf32, #tpu.memory_space<vmem>>, %arg13: memref<1x64x8xbf16, #tpu.memory_space<vmem>>, %arg14: memref<1x8xf32, #tpu.memory_space<vmem>>) attributes {dimension_semantics = [#tpu.dimension_semantics<parallel>, #tpu.dimension_semantics<arbitrary>], iteration_bounds = array<i64: 2, 1>, scalar_prefetch = 0 : i64, scratch_operands = 1 : i64, tpu.core_type = #tpu.core_type<tc>, window_params = [{transform_indices = @transform_0, window_bounds = array<i64: 1, 1, 8>}, {pipeline_mode = #tpu.pipeline_mode<synchronous>, transform_indices = @transform_1, window_bounds = array<i64: 8, 1>}, {pipeline_mode = #tpu.pipeline_mode<synchronous>, transform_indices = @transform_2, window_bounds = array<i64: 1, 1>}, {pipeline_mode = #tpu.pipeline_mode<synchronous>, transform_indices = @transform_3, window_bounds = array<i64: 1, 8>}, {pipeline_mode = #tpu.pipeline_mode<synchronous>, transform_indices = @transform_4, window_bounds = array<i64: 1, 8>}, {transform_indices = @transform_5, window_bounds = array<i64: 1, 64, 8>}, {pipeline_mode = #tpu.pipeline_mode<synchronous>, transform_indices = @transform_6, window_bounds = array<i64: 8, 8>}, {pipeline_mode = #tpu.pipeline_mode<synchronous>, transform_indices = @transform_7, window_bounds = array<i64: 1, 8>}, {transform_indices = @transform_8, window_bounds = array<i64: 1, 64, 4>}, {pipeline_mode = #tpu.pipeline_mode<synchronous>, transform_indices = @transform_9, window_bounds = array<i64: 4, 8>}, {pipeline_mode = #tpu.pipeline_mode<synchronous>, transform_indices = @transform_10, window_bounds = array<i64: 1, 8>}, {transform_indices = @transform_11, window_bounds = array<i64: 1, 64, 8>}]} {
    %c0_i32 = arith.constant 0 : i32
    %0 = arith.cmpi eq, %arg1, %c0_i32 : i32
    %1 = arith.extui %0 : i1 to i32
    %c0_i32_0 = arith.constant 0 : i32
    %2 = arith.cmpi ne, %1, %c0_i32_0 : i32
    scf.if %2 {
      %c0_21 = arith.constant 0 : index
      %c0_22 = arith.constant 0 : index
      %c0_23 = arith.constant 0 : index
      %28 = vector.load %arg2[%c0_21, %c0_22, %c0_23] : memref<1x1x8xf32, #tpu.memory_space<vmem>>, vector<1x1x8xf32>
      %29 = vector.shape_cast %28 : vector<1x1x8xf32> to vector<1x8xf32>
      %cst_24 = arith.constant 1.562500e-02 : f32
      %30 = vector.broadcast %cst_24 : f32 to vector<1x8xf32>
      %31 = arith.mulf %29, %30 : vector<1x8xf32>
      %c0_25 = arith.constant 0 : index
      %c0_26 = arith.constant 0 : index
      %32 = vector.load %arg3[%c0_25, %c0_26] : memref<8x1xf32, #tpu.memory_space<vmem>>, vector<8x1xf32>
      %cst_27 = arith.constant dense<0.000000e+00> : vector<1x1xf32>
      %33 = tpu.matmul %31, %32, %cst_27 {dimension_numbers = #tpu.dot_dimension_numbers<[1], [0], [0], [1], [0, 0, 1, 1], [], []>} : vector<1x8xf32>, vector<8x1xf32>, vector<1x1xf32> -> vector<1x1xf32>
      %c0_28 = arith.constant 0 : index
      %c0_29 = arith.constant 0 : index
      %34 = vector.load %arg4[%c0_28, %c0_29] : memref<1x1xf32, #tpu.memory_space<vmem>>, vector<1x1xf32>
      %35 = arith.addf %33, %34 : vector<1x1xf32>
      %cst_30 = arith.constant 0.000000e+00 : f32
      %36 = vector.broadcast %cst_30 : f32 to vector<1x1xf32>
      %37 = arith.maximumf %35, %36 : vector<1x1xf32>
      %c0_31 = arith.constant 0 : index
      %c0_32 = arith.constant 0 : index
      %38 = vector.load %arg5[%c0_31, %c0_32] : memref<1x8xf32, #tpu.memory_space<vmem>>, vector<1x8xf32>
      %cst_33 = arith.constant dense<0.000000e+00> : vector<1x8xf32>
      %39 = tpu.matmul %37, %38, %cst_33 {dimension_numbers = #tpu.dot_dimension_numbers<[1], [0], [0], [1], [0, 0, 1, 1], [], []>} : vector<1x1xf32>, vector<1x8xf32>, vector<1x8xf32> -> vector<1x8xf32>
      %c0_34 = arith.constant 0 : index
      %c0_35 = arith.constant 0 : index
      %40 = vector.load %arg6[%c0_34, %c0_35] : memref<1x8xf32, #tpu.memory_space<vmem>>, vector<1x8xf32>
      %41 = arith.addf %39, %40 : vector<1x8xf32>
      %42 = arith.negf %41 : vector<1x8xf32>
      %43 = math.exp %42 : vector<1x8xf32>
      %cst_36 = arith.constant 1.000000e+00 : f32
      %44 = vector.broadcast %cst_36 : f32 to vector<1x8xf32>
      %45 = arith.addf %44, %43 : vector<1x8xf32>
      %46 = arith.divf %44, %45 : vector<1x8xf32>
      %c0_37 = arith.constant 0 : index
      %c0_38 = arith.constant 0 : index
      %47 = vector.load %arg14[%c0_37, %c0_38] : memref<1x8xf32, #tpu.memory_space<vmem>>, vector<1x8xf32>
      tpu.vector_store %arg14[%c0_37, %c0_38], %46 {strides = array<i32>} : memref<1x8xf32, #tpu.memory_space<vmem>>, vector<1x8xf32>,
    } else {
    }
    %c0 = arith.constant 0 : index
    %c0_1 = arith.constant 0 : index
    %c0_2 = arith.constant 0 : index
    %3 = vector.load %arg7[%c0, %c0_1, %c0_2] : memref<1x64x8xbf16, #tpu.memory_space<vmem>>, vector<1x64x8xbf16>
    %4 = vector.shape_cast %3 : vector<1x64x8xbf16> to vector<64x8xbf16>
    %c0_3 = arith.constant 0 : index
    %c0_4 = arith.constant 0 : index
    %5 = vector.load %arg14[%c0_3, %c0_4] : memref<1x8xf32, #tpu.memory_space<vmem>>, vector<1x8xf32>
    %6 = arith.truncf %5 : vector<1x8xf32> to vector<1x8xbf16>
    %7 = vector.broadcast %6 : vector<1x8xbf16> to vector<64x8xbf16>
    %8 = arith.mulf %4, %7 : vector<64x8xbf16>
    %c0_5 = arith.constant 0 : index
    %c0_6 = arith.constant 0 : index
    %9 = vector.load %arg8[%c0_5, %c0_6] : memref<8x8xbf16, #tpu.memory_space<vmem>>, vector<8x8xbf16>
    %cst = arith.constant dense<0.000000e+00> : vector<64x8xf32>
    %10 = tpu.matmul %8, %9, %cst {dimension_numbers = #tpu.dot_dimension_numbers<[1], [0], [0], [1], [0, 0, 1, 1], [], []>} : vector<64x8xbf16>, vector<8x8xbf16>, vector<64x8xf32> -> vector<64x8xf32>
    %c0_7 = arith.constant 0 : index
    %c0_8 = arith.constant 0 : index
    %11 = vector.load %arg9[%c0_7, %c0_8] : memref<1x8xf32, #tpu.memory_space<vmem>>, vector<1x8xf32>
    %12 = vector.broadcast %11 : vector<1x8xf32> to vector<64x8xf32>
    %13 = arith.addf %10, %12 : vector<64x8xf32>
    %c0_9 = arith.constant 0 : index
    %c0_10 = arith.constant 0 : index
    %c0_11 = arith.constant 0 : index
    %14 = vector.load %arg10[%c0_9, %c0_10, %c0_11] : memref<1x64x4xbf16, #tpu.memory_space<vmem>>, vector<1x64x4xbf16>
    %15 = vector.shape_cast %14 : vector<1x64x4xbf16> to vector<64x4xbf16>
    %c0_12 = arith.constant 0 : index
    %c0_13 = arith.constant 0 : index
    %16 = vector.load %arg11[%c0_12, %c0_13] : memref<4x8xbf16, #tpu.memory_space<vmem>>, vector<4x8xbf16>
    %cst_14 = arith.constant dense<0.000000e+00> : vector<64x8xf32>
    %17 = tpu.matmul %15, %16, %cst_14 {dimension_numbers = #tpu.dot_dimension_numbers<[1], [0], [0], [1], [0, 0, 1, 1], [], []>} : vector<64x4xbf16>, vector<4x8xbf16>, vector<64x8xf32> -> vector<64x8xf32>
    %c0_15 = arith.constant 0 : index
    %c0_16 = arith.constant 0 : index
    %18 = vector.load %arg12[%c0_15, %c0_16] : memref<1x8xf32, #tpu.memory_space<vmem>>, vector<1x8xf32>
    %19 = vector.broadcast %18 : vector<1x8xf32> to vector<64x8xf32>
    %20 = arith.addf %17, %19 : vector<64x8xf32>
    %21 = arith.addf %13, %20 : vector<64x8xf32>
    %cst_17 = arith.constant 0.000000e+00 : f32
    %22 = vector.broadcast %cst_17 : f32 to vector<64x8xf32>
    %23 = arith.maximumf %21, %22 : vector<64x8xf32>
    %24 = arith.truncf %23 : vector<64x8xf32> to vector<64x8xbf16>
    %c0_18 = arith.constant 0 : index
    %c0_19 = arith.constant 0 : index
    %c0_20 = arith.constant 0 : index
    %25 = vector.load %arg13[%c0_18, %c0_19, %c0_20] : memref<1x64x8xbf16, #tpu.memory_space<vmem>>, vector<1x64x8xbf16>
    %26 = vector.shape_cast %25 : vector<1x64x8xbf16> to vector<64x8xbf16>
    %27 = vector.shape_cast %24 : vector<64x8xbf16> to vector<1x64x8xbf16>
    tpu.vector_store %arg13[%c0_18, %c0_19, %c0_20], %27 {strides = array<i32>} : memref<1x64x8xbf16, #tpu.memory_space<vmem>>, vector<1x64x8xbf16>,
    return
  }
  func.func @transform_0(%arg0: i32, %arg1: i32) -> (i32, i32, i32) {
    %c0_i32 = arith.constant 0 : i32
    %c0_i32_0 = arith.constant 0 : i32
    %c0_i32_1 = arith.constant 0 : i32
    return %arg0, %c0_i32, %c0_i32_0 : i32, i32, i32
  }
  func.func @transform_1(%arg0: i32, %arg1: i32) -> (i32, i32) {
    %c0_i32 = arith.constant 0 : i32
    %c0_i32_0 = arith.constant 0 : i32
    %c0_i32_1 = arith.constant 0 : i32
    return %c0_i32, %c0_i32_0 : i32, i32
  }
  func.func @transform_2(%arg0: i32, %arg1: i32) -> (i32, i32) {
    %c0_i32 = arith.constant 0 : i32
    %c0_i32_0 = arith.constant 0 : i32
    %c0_i32_1 = arith.constant 0 : i32
    return %c0_i32, %c0_i32_0 : i32, i32
  }
  func.func @transform_3(%arg0: i32, %arg1: i32) -> (i32, i32) {
    %c0_i32 = arith.constant 0 : i32
    %c0_i32_0 = arith.constant 0 : i32
    %c0_i32_1 = arith.constant 0 : i32
    return %c0_i32, %c0_i32_0 : i32, i32
  }
  func.func @transform_4(%arg0: i32, %arg1: i32) -> (i32, i32) {
    %c0_i32 = arith.constant 0 : i32
    %c0_i32_0 = arith.constant 0 : i32
    %c0_i32_1 = arith.constant 0 : i32
    return %c0_i32, %c0_i32_0 : i32, i32
  }
  func.func @transform_5(%arg0: i32, %arg1: i32) -> (i32, i32, i32) {
    %c0_i32 = arith.constant 0 : i32
    %c0_i32_0 = arith.constant 0 : i32
    return %arg0, %arg1, %c0_i32 : i32, i32, i32
  }
  func.func @transform_6(%arg0: i32, %arg1: i32) -> (i32, i32) {
    %c0_i32 = arith.constant 0 : i32
    %c0_i32_0 = arith.constant 0 : i32
    %c0_i32_1 = arith.constant 0 : i32
    return %c0_i32, %c0_i32_0 : i32, i32
  }
  func.func @transform_7(%arg0: i32, %arg1: i32) -> (i32, i32) {
    %c0_i32 = arith.constant 0 : i32
    %c0_i32_0 = arith.constant 0 : i32
    %c0_i32_1 = arith.constant 0 : i32
    return %c0_i32, %c0_i32_0 : i32, i32
  }
  func.func @transform_8(%arg0: i32, %arg1: i32) -> (i32, i32, i32) {
    %c0_i32 = arith.constant 0 : i32
    %c0_i32_0 = arith.constant 0 : i32
    return %arg0, %arg1, %c0_i32 : i32, i32, i32
  }
  func.func @transform_9(%arg0: i32, %arg1: i32) -> (i32, i32) {
    %c0_i32 = arith.constant 0 : i32
    %c0_i32_0 = arith.constant 0 : i32
    %c0_i32_1 = arith.constant 0 : i32
    return %c0_i32, %c0_i32_0 : i32, i32
  }
  func.func @transform_10(%arg0: i32, %arg1: i32) -> (i32, i32) {
    %c0_i32 = arith.constant 0 : i32
    %c0_i32_0 = arith.constant 0 : i32
    %c0_i32_1 = arith.constant 0 : i32
    return %c0_i32, %c0_i32_0 : i32, i32
  }
  func.func @transform_11(%arg0: i32, %arg1: i32) -> (i32, i32, i32) {
    %c0_i32 = arith.constant 0 : i32
    %c0_i32_0 = arith.constant 0 : i32
    return %arg0, %arg1, %c0_i32 : i32, i32, i32
  }
}

module attributes {stable_mosaic.version = 11 : i64} {
  func.func @_mm_bias_act_kernel(%arg0: i32, %arg1: i32, %arg2: i32, %arg3: memref<128x8xbf16, #tpu.memory_space<vmem>>, %arg4: memref<8x8xbf16, #tpu.memory_space<vmem>>, %arg5: memref<1x8xf32, #tpu.memory_space<vmem>>, %arg6: memref<128x8xbf16, #tpu.memory_space<vmem>>, %arg7: memref<128x8xf32, #tpu.memory_space<vmem>>) attributes {dimension_semantics = [#tpu.dimension_semantics<parallel>, #tpu.dimension_semantics<parallel>, #tpu.dimension_semantics<arbitrary>], iteration_bounds = array<i64: 1, 1, 1>, scalar_prefetch = 0 : i64, scratch_operands = 1 : i64, tpu.core_type = #tpu.core_type<tc>, window_params = [{transform_indices = @transform_0, window_bounds = array<i64: 128, 8>}, {transform_indices = @transform_1, window_bounds = array<i64: 8, 8>}, {transform_indices = @transform_2, window_bounds = array<i64: 1, 8>}, {transform_indices = @transform_3, window_bounds = array<i64: 128, 8>}]} {
    %c0_i32 = arith.constant 0 : i32
    %0 = arith.cmpi eq, %arg2, %c0_i32 : i32
    %1 = arith.extui %0 : i1 to i32
    %c0_i32_0 = arith.constant 0 : i32
    %2 = arith.cmpi ne, %1, %c0_i32_0 : i32
    scf.if %2 {
      %cst_10 = arith.constant 0.000000e+00 : f32
      %12 = vector.broadcast %cst_10 : f32 to vector<128x8xf32>
      %c0_11 = arith.constant 0 : index
      %c0_12 = arith.constant 0 : index
      %13 = vector.load %arg7[%c0_11, %c0_12] : memref<128x8xf32, #tpu.memory_space<vmem>>, vector<128x8xf32>
      tpu.vector_store %arg7[%c0_11, %c0_12], %12 {strides = array<i32>} : memref<128x8xf32, #tpu.memory_space<vmem>>, vector<128x8xf32>,
    } else {
    }
    %c0 = arith.constant 0 : index
    %c0_1 = arith.constant 0 : index
    %3 = vector.load %arg7[%c0, %c0_1] : memref<128x8xf32, #tpu.memory_space<vmem>>, vector<128x8xf32>
    %c0_2 = arith.constant 0 : index
    %c0_3 = arith.constant 0 : index
    %4 = vector.load %arg3[%c0_2, %c0_3] : memref<128x8xbf16, #tpu.memory_space<vmem>>, vector<128x8xbf16>
    %c0_4 = arith.constant 0 : index
    %c0_5 = arith.constant 0 : index
    %5 = vector.load %arg4[%c0_4, %c0_5] : memref<8x8xbf16, #tpu.memory_space<vmem>>, vector<8x8xbf16>
    %cst = arith.constant dense<0.000000e+00> : vector<128x8xf32>
    %6 = tpu.matmul %4, %5, %cst {dimension_numbers = #tpu.dot_dimension_numbers<[1], [0], [0], [1], [0, 0, 1, 1], [], []>} : vector<128x8xbf16>, vector<8x8xbf16>, vector<128x8xf32> -> vector<128x8xf32>
    %7 = arith.addf %3, %6 : vector<128x8xf32>
    %c0_6 = arith.constant 0 : index
    %c0_7 = arith.constant 0 : index
    %8 = vector.load %arg7[%c0_6, %c0_7] : memref<128x8xf32, #tpu.memory_space<vmem>>, vector<128x8xf32>
    tpu.vector_store %arg7[%c0_6, %c0_7], %7 {strides = array<i32>} : memref<128x8xf32, #tpu.memory_space<vmem>>, vector<128x8xf32>,
    %c0_i32_8 = arith.constant 0 : i32
    %9 = arith.cmpi eq, %arg2, %c0_i32_8 : i32
    %10 = arith.extui %9 : i1 to i32
    %c0_i32_9 = arith.constant 0 : i32
    %11 = arith.cmpi ne, %10, %c0_i32_9 : i32
    scf.if %11 {
      %c0_10 = arith.constant 0 : index
      %c0_11 = arith.constant 0 : index
      %12 = vector.load %arg7[%c0_10, %c0_11] : memref<128x8xf32, #tpu.memory_space<vmem>>, vector<128x8xf32>
      %c0_12 = arith.constant 0 : index
      %c0_13 = arith.constant 0 : index
      %13 = vector.load %arg5[%c0_12, %c0_13] : memref<1x8xf32, #tpu.memory_space<vmem>>, vector<1x8xf32>
      %14 = vector.broadcast %13 : vector<1x8xf32> to vector<128x8xf32>
      %15 = arith.addf %12, %14 : vector<128x8xf32>
      %cst_14 = arith.constant 0.000000e+00 : f32
      %16 = vector.broadcast %cst_14 : f32 to vector<128x8xf32>
      %17 = arith.maximumf %15, %16 : vector<128x8xf32>
      %18 = arith.truncf %17 : vector<128x8xf32> to vector<128x8xbf16>
      %c0_15 = arith.constant 0 : index
      %c0_16 = arith.constant 0 : index
      %19 = vector.load %arg6[%c0_15, %c0_16] : memref<128x8xbf16, #tpu.memory_space<vmem>>, vector<128x8xbf16>
      tpu.vector_store %arg6[%c0_15, %c0_16], %18 {strides = array<i32>} : memref<128x8xbf16, #tpu.memory_space<vmem>>, vector<128x8xbf16>,
    } else {
    }
    return
  }
  func.func @transform_0(%arg0: i32, %arg1: i32, %arg2: i32) -> (i32, i32) {
    %c0_i32 = arith.constant 0 : i32
    return %arg0, %arg2 : i32, i32
  }
  func.func @transform_1(%arg0: i32, %arg1: i32, %arg2: i32) -> (i32, i32) {
    %c0_i32 = arith.constant 0 : i32
    return %arg2, %arg1 : i32, i32
  }
  func.func @transform_2(%arg0: i32, %arg1: i32, %arg2: i32) -> (i32, i32) {
    %c0_i32 = arith.constant 0 : i32
    %c0_i32_0 = arith.constant 0 : i32
    return %c0_i32, %arg1 : i32, i32
  }
  func.func @transform_3(%arg0: i32, %arg1: i32, %arg2: i32) -> (i32, i32) {
    %c0_i32 = arith.constant 0 : i32
    return %arg0, %arg1 : i32, i32
  }
}

module attributes {stable_mosaic.version = 11 : i64} {
  func.func @_grouped_conv3x3_kernel(%arg0: i32, %arg1: i32, %arg2: i32, %arg3: memref<1x1x10x10x8xbf16, #tpu.memory_space<vmem>>, %arg4: memref<1x72x8xbf16, #tpu.memory_space<vmem>>, %arg5: memref<1x8xf32, #tpu.memory_space<vmem>>, %arg6: memref<1x64x8xbf16, #tpu.memory_space<vmem>>, %arg7: memref<1x1x8xf32, #tpu.memory_space<vmem>>) attributes {dimension_semantics = [#tpu.dimension_semantics<parallel>, #tpu.dimension_semantics<parallel>, #tpu.dimension_semantics<arbitrary>], iteration_bounds = array<i64: 1, 2, 1>, scalar_prefetch = 0 : i64, scratch_operands = 0 : i64, tpu.core_type = #tpu.core_type<tc>, window_params = [{transform_indices = @transform_0, window_bounds = array<i64: 1, 1, 10, 10, 8>}, {transform_indices = @transform_1, window_bounds = array<i64: 1, 72, 8>}, {transform_indices = @transform_2, window_bounds = array<i64: 1, 8>}, {transform_indices = @transform_3, window_bounds = array<i64: 1, 64, 8>}, {transform_indices = @transform_4, window_bounds = array<i64: 1, 1, 8>}]} {
    %c8_i32 = arith.constant 8 : i32
    %0 = arith.muli %arg2, %c8_i32 : i32
    %1 = tpu.assume_multiple %0, 8 : i32
    %c0_i32 = arith.constant 0 : i32
    %2 = arith.addi %1, %c0_i32 : i32
    %c0 = arith.constant 0 : index
    %c0_0 = arith.constant 0 : index
    %3 = arith.index_cast %2 : i32 to index
    %c0_1 = arith.constant 0 : index
    %c0_2 = arith.constant 0 : index
    %4 = vector.load %arg3[%c0, %c0_0, %3, %c0_1, %c0_2] : memref<1x1x10x10x8xbf16, #tpu.memory_space<vmem>>, vector<1x1x8x8x8xbf16>
    %5 = vector.shape_cast %4 : vector<1x1x8x8x8xbf16> to vector<8x8x8xbf16>
    %6 = vector.shape_cast %5 : vector<8x8x8xbf16> to vector<64x8xbf16>
    %c0_i32_3 = arith.constant 0 : i32
    %7 = arith.addi %1, %c0_i32_3 : i32
    %c0_4 = arith.constant 0 : index
    %c0_5 = arith.constant 0 : index
    %8 = arith.index_cast %7 : i32 to index
    %c1 = arith.constant 1 : index
    %c0_6 = arith.constant 0 : index
    %9 = vector.load %arg3[%c0_4, %c0_5, %8, %c1, %c0_6] : memref<1x1x10x10x8xbf16, #tpu.memory_space<vmem>>, vector<1x1x8x8x8xbf16>
    %10 = vector.shape_cast %9 : vector<1x1x8x8x8xbf16> to vector<8x8x8xbf16>
    %11 = vector.shape_cast %10 : vector<8x8x8xbf16> to vector<64x8xbf16>
    %c0_i32_7 = arith.constant 0 : i32
    %12 = arith.addi %1, %c0_i32_7 : i32
    %c0_8 = arith.constant 0 : index
    %c0_9 = arith.constant 0 : index
    %13 = arith.index_cast %12 : i32 to index
    %c2 = arith.constant 2 : index
    %c0_10 = arith.constant 0 : index
    %14 = vector.load %arg3[%c0_8, %c0_9, %13, %c2, %c0_10] : memref<1x1x10x10x8xbf16, #tpu.memory_space<vmem>>, vector<1x1x8x8x8xbf16>
    %15 = vector.shape_cast %14 : vector<1x1x8x8x8xbf16> to vector<8x8x8xbf16>
    %16 = vector.shape_cast %15 : vector<8x8x8xbf16> to vector<64x8xbf16>
    %c1_i32 = arith.constant 1 : i32
    %17 = arith.addi %1, %c1_i32 : i32
    %c0_11 = arith.constant 0 : index
    %c0_12 = arith.constant 0 : index
    %18 = arith.index_cast %17 : i32 to index
    %c0_13 = arith.constant 0 : index
    %c0_14 = arith.constant 0 : index
    %19 = vector.load %arg3[%c0_11, %c0_12, %18, %c0_13, %c0_14] : memref<1x1x10x10x8xbf16, #tpu.memory_space<vmem>>, vector<1x1x8x8x8xbf16>
    %20 = vector.shape_cast %19 : vector<1x1x8x8x8xbf16> to vector<8x8x8xbf16>
    %21 = vector.shape_cast %20 : vector<8x8x8xbf16> to vector<64x8xbf16>
    %c1_i32_15 = arith.constant 1 : i32
    %22 = arith.addi %1, %c1_i32_15 : i32
    %c0_16 = arith.constant 0 : index
    %c0_17 = arith.constant 0 : index
    %23 = arith.index_cast %22 : i32 to index
    %c1_18 = arith.constant 1 : index
    %c0_19 = arith.constant 0 : index
    %24 = vector.load %arg3[%c0_16, %c0_17, %23, %c1_18, %c0_19] : memref<1x1x10x10x8xbf16, #tpu.memory_space<vmem>>, vector<1x1x8x8x8xbf16>
    %25 = vector.shape_cast %24 : vector<1x1x8x8x8xbf16> to vector<8x8x8xbf16>
    %26 = vector.shape_cast %25 : vector<8x8x8xbf16> to vector<64x8xbf16>
    %c1_i32_20 = arith.constant 1 : i32
    %27 = arith.addi %1, %c1_i32_20 : i32
    %c0_21 = arith.constant 0 : index
    %c0_22 = arith.constant 0 : index
    %28 = arith.index_cast %27 : i32 to index
    %c2_23 = arith.constant 2 : index
    %c0_24 = arith.constant 0 : index
    %29 = vector.load %arg3[%c0_21, %c0_22, %28, %c2_23, %c0_24] : memref<1x1x10x10x8xbf16, #tpu.memory_space<vmem>>, vector<1x1x8x8x8xbf16>
    %30 = vector.shape_cast %29 : vector<1x1x8x8x8xbf16> to vector<8x8x8xbf16>
    %31 = vector.shape_cast %30 : vector<8x8x8xbf16> to vector<64x8xbf16>
    %c2_i32 = arith.constant 2 : i32
    %32 = arith.addi %1, %c2_i32 : i32
    %c0_25 = arith.constant 0 : index
    %c0_26 = arith.constant 0 : index
    %33 = arith.index_cast %32 : i32 to index
    %c0_27 = arith.constant 0 : index
    %c0_28 = arith.constant 0 : index
    %34 = vector.load %arg3[%c0_25, %c0_26, %33, %c0_27, %c0_28] : memref<1x1x10x10x8xbf16, #tpu.memory_space<vmem>>, vector<1x1x8x8x8xbf16>
    %35 = vector.shape_cast %34 : vector<1x1x8x8x8xbf16> to vector<8x8x8xbf16>
    %36 = vector.shape_cast %35 : vector<8x8x8xbf16> to vector<64x8xbf16>
    %c2_i32_29 = arith.constant 2 : i32
    %37 = arith.addi %1, %c2_i32_29 : i32
    %c0_30 = arith.constant 0 : index
    %c0_31 = arith.constant 0 : index
    %38 = arith.index_cast %37 : i32 to index
    %c1_32 = arith.constant 1 : index
    %c0_33 = arith.constant 0 : index
    %39 = vector.load %arg3[%c0_30, %c0_31, %38, %c1_32, %c0_33] : memref<1x1x10x10x8xbf16, #tpu.memory_space<vmem>>, vector<1x1x8x8x8xbf16>
    %40 = vector.shape_cast %39 : vector<1x1x8x8x8xbf16> to vector<8x8x8xbf16>
    %41 = vector.shape_cast %40 : vector<8x8x8xbf16> to vector<64x8xbf16>
    %c2_i32_34 = arith.constant 2 : i32
    %42 = arith.addi %1, %c2_i32_34 : i32
    %c0_35 = arith.constant 0 : index
    %c0_36 = arith.constant 0 : index
    %43 = arith.index_cast %42 : i32 to index
    %c2_37 = arith.constant 2 : index
    %c0_38 = arith.constant 0 : index
    %44 = vector.load %arg3[%c0_35, %c0_36, %43, %c2_37, %c0_38] : memref<1x1x10x10x8xbf16, #tpu.memory_space<vmem>>, vector<1x1x8x8x8xbf16>
    %45 = vector.shape_cast %44 : vector<1x1x8x8x8xbf16> to vector<8x8x8xbf16>
    %46 = vector.shape_cast %45 : vector<8x8x8xbf16> to vector<64x8xbf16>
    %47 = tpu.concatenate %6, %11, %16, %21, %26, %31, %36, %41, %46 in 1 : vector<64x8xbf16>, vector<64x8xbf16>, vector<64x8xbf16>, vector<64x8xbf16>, vector<64x8xbf16>, vector<64x8xbf16>, vector<64x8xbf16>, vector<64x8xbf16>, vector<64x8xbf16> -> vector<64x72xbf16>
    %c0_39 = arith.constant 0 : index
    %c0_40 = arith.constant 0 : index
    %c0_41 = arith.constant 0 : index
    %48 = vector.load %arg4[%c0_39, %c0_40, %c0_41] : memref<1x72x8xbf16, #tpu.memory_space<vmem>>, vector<1x72x8xbf16>
    %49 = vector.shape_cast %48 : vector<1x72x8xbf16> to vector<72x8xbf16>
    %cst = arith.constant dense<0.000000e+00> : vector<64x8xf32>
    %50 = tpu.matmul %47, %49, %cst {dimension_numbers = #tpu.dot_dimension_numbers<[1], [0], [0], [1], [0, 0, 1, 1], [], []>} : vector<64x72xbf16>, vector<72x8xbf16>, vector<64x8xf32> -> vector<64x8xf32>
    %c0_42 = arith.constant 0 : index
    %c0_43 = arith.constant 0 : index
    %51 = vector.load %arg5[%c0_42, %c0_43] : memref<1x8xf32, #tpu.memory_space<vmem>>, vector<1x8xf32>
    %52 = vector.broadcast %51 : vector<1x8xf32> to vector<64x8xf32>
    %53 = arith.addf %50, %52 : vector<64x8xf32>
    %cst_44 = arith.constant 0.000000e+00 : f32
    %54 = vector.broadcast %cst_44 : f32 to vector<64x8xf32>
    %55 = arith.maximumf %53, %54 : vector<64x8xf32>
    %56 = arith.truncf %55 : vector<64x8xf32> to vector<64x8xbf16>
    %c0_45 = arith.constant 0 : index
    %c0_46 = arith.constant 0 : index
    %c0_47 = arith.constant 0 : index
    %57 = vector.load %arg6[%c0_45, %c0_46, %c0_47] : memref<1x64x8xbf16, #tpu.memory_space<vmem>>, vector<1x64x8xbf16>
    %58 = vector.shape_cast %57 : vector<1x64x8xbf16> to vector<64x8xbf16>
    %59 = vector.shape_cast %56 : vector<64x8xbf16> to vector<1x64x8xbf16>
    tpu.vector_store %arg6[%c0_45, %c0_46, %c0_47], %59 {strides = array<i32>} : memref<1x64x8xbf16, #tpu.memory_space<vmem>>, vector<1x64x8xbf16>,
    %cst_48 = arith.constant dense<0.000000e+00> : vector<8xf32>
    %60 = vector.multi_reduction <add>, %55, %cst_48 [0] : vector<64x8xf32> to vector<8xf32>
    %61 = vector.shape_cast %60 : vector<8xf32> to vector<1x8xf32>
    %c0_i32_49 = arith.constant 0 : i32
    %62 = arith.cmpi eq, %arg2, %c0_i32_49 : i32
    %63 = arith.extui %62 : i1 to i32
    %c0_i32_50 = arith.constant 0 : i32
    %64 = arith.cmpi ne, %63, %c0_i32_50 : i32
    scf.if %64 {
      %cst_57 = arith.constant 0.000000e+00 : f32
      %71 = vector.broadcast %cst_57 : f32 to vector<1x1x8xf32>
      %c0_58 = arith.constant 0 : index
      %c0_59 = arith.constant 0 : index
      %c0_60 = arith.constant 0 : index
      %72 = vector.load %arg7[%c0_58, %c0_59, %c0_60] : memref<1x1x8xf32, #tpu.memory_space<vmem>>, vector<1x1x8xf32>
      tpu.vector_store %arg7[%c0_58, %c0_59, %c0_60], %71 {strides = array<i32>} : memref<1x1x8xf32, #tpu.memory_space<vmem>>, vector<1x1x8xf32>,
    } else {
    }
    %c0_51 = arith.constant 0 : index
    %c0_52 = arith.constant 0 : index
    %c0_53 = arith.constant 0 : index
    %65 = vector.load %arg7[%c0_51, %c0_52, %c0_53] : memref<1x1x8xf32, #tpu.memory_space<vmem>>, vector<1x1x8xf32>
    %66 = vector.shape_cast %65 : vector<1x1x8xf32> to vector<1x8xf32>
    %67 = arith.addf %66, %61 : vector<1x8xf32>
    %c0_54 = arith.constant 0 : index
    %c0_55 = arith.constant 0 : index
    %c0_56 = arith.constant 0 : index
    %68 = vector.load %arg7[%c0_54, %c0_55, %c0_56] : memref<1x1x8xf32, #tpu.memory_space<vmem>>, vector<1x1x8xf32>
    %69 = vector.shape_cast %68 : vector<1x1x8xf32> to vector<1x8xf32>
    %70 = vector.shape_cast %67 : vector<1x8xf32> to vector<1x1x8xf32>
    tpu.vector_store %arg7[%c0_54, %c0_55, %c0_56], %70 {strides = array<i32>} : memref<1x1x8xf32, #tpu.memory_space<vmem>>, vector<1x1x8xf32>,
    return
  }
  func.func @transform_0(%arg0: i32, %arg1: i32, %arg2: i32) -> (i32, i32, i32, i32, i32) {
    %c0_i32 = arith.constant 0 : i32
    %c0_i32_0 = arith.constant 0 : i32
    %c0_i32_1 = arith.constant 0 : i32
    %c0_i32_2 = arith.constant 0 : i32
    return %arg1, %c0_i32, %c0_i32_0, %c0_i32_1, %arg0 : i32, i32, i32, i32, i32
  }
  func.func @transform_1(%arg0: i32, %arg1: i32, %arg2: i32) -> (i32, i32, i32) {
    %c0_i32 = arith.constant 0 : i32
    %c0_i32_0 = arith.constant 0 : i32
    %c0_i32_1 = arith.constant 0 : i32
    return %arg0, %c0_i32, %c0_i32_0 : i32, i32, i32
  }
  func.func @transform_2(%arg0: i32, %arg1: i32, %arg2: i32) -> (i32, i32) {
    %c0_i32 = arith.constant 0 : i32
    %c0_i32_0 = arith.constant 0 : i32
    return %c0_i32, %arg0 : i32, i32
  }
  func.func @transform_3(%arg0: i32, %arg1: i32, %arg2: i32) -> (i32, i32, i32) {
    %c0_i32 = arith.constant 0 : i32
    return %arg1, %arg2, %arg0 : i32, i32, i32
  }
  func.func @transform_4(%arg0: i32, %arg1: i32, %arg2: i32) -> (i32, i32, i32) {
    %c0_i32 = arith.constant 0 : i32
    %c0_i32_0 = arith.constant 0 : i32
    return %arg1, %c0_i32, %arg0 : i32, i32, i32
  }
}

module attributes {stable_mosaic.version = 11 : i64} {
  func.func @_conv3_se_shortcut_kernel(%arg0: i32, %arg1: i32, %arg2: memref<1x1x8xf32, #tpu.memory_space<vmem>>, %arg3: memref<8x2xf32, #tpu.memory_space<vmem>>, %arg4: memref<1x2xf32, #tpu.memory_space<vmem>>, %arg5: memref<2x8xf32, #tpu.memory_space<vmem>>, %arg6: memref<1x8xf32, #tpu.memory_space<vmem>>, %arg7: memref<1x64x8xbf16, #tpu.memory_space<vmem>>, %arg8: memref<8x8xbf16, #tpu.memory_space<vmem>>, %arg9: memref<1x8xf32, #tpu.memory_space<vmem>>, %arg10: memref<1x64x8xbf16, #tpu.memory_space<vmem>>, %arg11: memref<1x64x8xbf16, #tpu.memory_space<vmem>>, %arg12: memref<1x8xf32, #tpu.memory_space<vmem>>) attributes {dimension_semantics = [#tpu.dimension_semantics<parallel>, #tpu.dimension_semantics<arbitrary>], iteration_bounds = array<i64: 2, 1>, scalar_prefetch = 0 : i64, scratch_operands = 1 : i64, tpu.core_type = #tpu.core_type<tc>, window_params = [{transform_indices = @transform_0, window_bounds = array<i64: 1, 1, 8>}, {pipeline_mode = #tpu.pipeline_mode<synchronous>, transform_indices = @transform_1, window_bounds = array<i64: 8, 2>}, {pipeline_mode = #tpu.pipeline_mode<synchronous>, transform_indices = @transform_2, window_bounds = array<i64: 1, 2>}, {pipeline_mode = #tpu.pipeline_mode<synchronous>, transform_indices = @transform_3, window_bounds = array<i64: 2, 8>}, {pipeline_mode = #tpu.pipeline_mode<synchronous>, transform_indices = @transform_4, window_bounds = array<i64: 1, 8>}, {transform_indices = @transform_5, window_bounds = array<i64: 1, 64, 8>}, {pipeline_mode = #tpu.pipeline_mode<synchronous>, transform_indices = @transform_6, window_bounds = array<i64: 8, 8>}, {pipeline_mode = #tpu.pipeline_mode<synchronous>, transform_indices = @transform_7, window_bounds = array<i64: 1, 8>}, {transform_indices = @transform_8, window_bounds = array<i64: 1, 64, 8>}, {transform_indices = @transform_9, window_bounds = array<i64: 1, 64, 8>}]} {
    %c0_i32 = arith.constant 0 : i32
    %0 = arith.cmpi eq, %arg1, %c0_i32 : i32
    %1 = arith.extui %0 : i1 to i32
    %c0_i32_0 = arith.constant 0 : i32
    %2 = arith.cmpi ne, %1, %c0_i32_0 : i32
    scf.if %2 {
      %c0_16 = arith.constant 0 : index
      %c0_17 = arith.constant 0 : index
      %c0_18 = arith.constant 0 : index
      %24 = vector.load %arg2[%c0_16, %c0_17, %c0_18] : memref<1x1x8xf32, #tpu.memory_space<vmem>>, vector<1x1x8xf32>
      %25 = vector.shape_cast %24 : vector<1x1x8xf32> to vector<1x8xf32>
      %cst_19 = arith.constant 1.562500e-02 : f32
      %26 = vector.broadcast %cst_19 : f32 to vector<1x8xf32>
      %27 = arith.mulf %25, %26 : vector<1x8xf32>
      %c0_20 = arith.constant 0 : index
      %c0_21 = arith.constant 0 : index
      %28 = vector.load %arg3[%c0_20, %c0_21] : memref<8x2xf32, #tpu.memory_space<vmem>>, vector<8x2xf32>
      %cst_22 = arith.constant dense<0.000000e+00> : vector<1x2xf32>
      %29 = tpu.matmul %27, %28, %cst_22 {dimension_numbers = #tpu.dot_dimension_numbers<[1], [0], [0], [1], [0, 0, 1, 1], [], []>} : vector<1x8xf32>, vector<8x2xf32>, vector<1x2xf32> -> vector<1x2xf32>
      %c0_23 = arith.constant 0 : index
      %c0_24 = arith.constant 0 : index
      %30 = vector.load %arg4[%c0_23, %c0_24] : memref<1x2xf32, #tpu.memory_space<vmem>>, vector<1x2xf32>
      %31 = arith.addf %29, %30 : vector<1x2xf32>
      %cst_25 = arith.constant 0.000000e+00 : f32
      %32 = vector.broadcast %cst_25 : f32 to vector<1x2xf32>
      %33 = arith.maximumf %31, %32 : vector<1x2xf32>
      %c0_26 = arith.constant 0 : index
      %c0_27 = arith.constant 0 : index
      %34 = vector.load %arg5[%c0_26, %c0_27] : memref<2x8xf32, #tpu.memory_space<vmem>>, vector<2x8xf32>
      %cst_28 = arith.constant dense<0.000000e+00> : vector<1x8xf32>
      %35 = tpu.matmul %33, %34, %cst_28 {dimension_numbers = #tpu.dot_dimension_numbers<[1], [0], [0], [1], [0, 0, 1, 1], [], []>} : vector<1x2xf32>, vector<2x8xf32>, vector<1x8xf32> -> vector<1x8xf32>
      %c0_29 = arith.constant 0 : index
      %c0_30 = arith.constant 0 : index
      %36 = vector.load %arg6[%c0_29, %c0_30] : memref<1x8xf32, #tpu.memory_space<vmem>>, vector<1x8xf32>
      %37 = arith.addf %35, %36 : vector<1x8xf32>
      %38 = arith.negf %37 : vector<1x8xf32>
      %39 = math.exp %38 : vector<1x8xf32>
      %cst_31 = arith.constant 1.000000e+00 : f32
      %40 = vector.broadcast %cst_31 : f32 to vector<1x8xf32>
      %41 = arith.addf %40, %39 : vector<1x8xf32>
      %42 = arith.divf %40, %41 : vector<1x8xf32>
      %c0_32 = arith.constant 0 : index
      %c0_33 = arith.constant 0 : index
      %43 = vector.load %arg12[%c0_32, %c0_33] : memref<1x8xf32, #tpu.memory_space<vmem>>, vector<1x8xf32>
      tpu.vector_store %arg12[%c0_32, %c0_33], %42 {strides = array<i32>} : memref<1x8xf32, #tpu.memory_space<vmem>>, vector<1x8xf32>,
    } else {
    }
    %c0 = arith.constant 0 : index
    %c0_1 = arith.constant 0 : index
    %c0_2 = arith.constant 0 : index
    %3 = vector.load %arg7[%c0, %c0_1, %c0_2] : memref<1x64x8xbf16, #tpu.memory_space<vmem>>, vector<1x64x8xbf16>
    %4 = vector.shape_cast %3 : vector<1x64x8xbf16> to vector<64x8xbf16>
    %c0_3 = arith.constant 0 : index
    %c0_4 = arith.constant 0 : index
    %5 = vector.load %arg12[%c0_3, %c0_4] : memref<1x8xf32, #tpu.memory_space<vmem>>, vector<1x8xf32>
    %6 = arith.truncf %5 : vector<1x8xf32> to vector<1x8xbf16>
    %7 = vector.broadcast %6 : vector<1x8xbf16> to vector<64x8xbf16>
    %8 = arith.mulf %4, %7 : vector<64x8xbf16>
    %c0_5 = arith.constant 0 : index
    %c0_6 = arith.constant 0 : index
    %9 = vector.load %arg8[%c0_5, %c0_6] : memref<8x8xbf16, #tpu.memory_space<vmem>>, vector<8x8xbf16>
    %cst = arith.constant dense<0.000000e+00> : vector<64x8xf32>
    %10 = tpu.matmul %8, %9, %cst {dimension_numbers = #tpu.dot_dimension_numbers<[1], [0], [0], [1], [0, 0, 1, 1], [], []>} : vector<64x8xbf16>, vector<8x8xbf16>, vector<64x8xf32> -> vector<64x8xf32>
    %c0_7 = arith.constant 0 : index
    %c0_8 = arith.constant 0 : index
    %11 = vector.load %arg9[%c0_7, %c0_8] : memref<1x8xf32, #tpu.memory_space<vmem>>, vector<1x8xf32>
    %12 = vector.broadcast %11 : vector<1x8xf32> to vector<64x8xf32>
    %13 = arith.addf %10, %12 : vector<64x8xf32>
    %c0_9 = arith.constant 0 : index
    %c0_10 = arith.constant 0 : index
    %c0_11 = arith.constant 0 : index
    %14 = vector.load %arg10[%c0_9, %c0_10, %c0_11] : memref<1x64x8xbf16, #tpu.memory_space<vmem>>, vector<1x64x8xbf16>
    %15 = vector.shape_cast %14 : vector<1x64x8xbf16> to vector<64x8xbf16>
    %16 = arith.extf %15 : vector<64x8xbf16> to vector<64x8xf32>
    %17 = arith.addf %13, %16 : vector<64x8xf32>
    %cst_12 = arith.constant 0.000000e+00 : f32
    %18 = vector.broadcast %cst_12 : f32 to vector<64x8xf32>
    %19 = arith.maximumf %17, %18 : vector<64x8xf32>
    %20 = arith.truncf %19 : vector<64x8xf32> to vector<64x8xbf16>
    %c0_13 = arith.constant 0 : index
    %c0_14 = arith.constant 0 : index
    %c0_15 = arith.constant 0 : index
    %21 = vector.load %arg11[%c0_13, %c0_14, %c0_15] : memref<1x64x8xbf16, #tpu.memory_space<vmem>>, vector<1x64x8xbf16>
    %22 = vector.shape_cast %21 : vector<1x64x8xbf16> to vector<64x8xbf16>
    %23 = vector.shape_cast %20 : vector<64x8xbf16> to vector<1x64x8xbf16>
    tpu.vector_store %arg11[%c0_13, %c0_14, %c0_15], %23 {strides = array<i32>} : memref<1x64x8xbf16, #tpu.memory_space<vmem>>, vector<1x64x8xbf16>,
    return
  }
  func.func @transform_0(%arg0: i32, %arg1: i32) -> (i32, i32, i32) {
    %c0_i32 = arith.constant 0 : i32
    %c0_i32_0 = arith.constant 0 : i32
    %c0_i32_1 = arith.constant 0 : i32
    return %arg0, %c0_i32, %c0_i32_0 : i32, i32, i32
  }
  func.func @transform_1(%arg0: i32, %arg1: i32) -> (i32, i32) {
    %c0_i32 = arith.constant 0 : i32
    %c0_i32_0 = arith.constant 0 : i32
    %c0_i32_1 = arith.constant 0 : i32
    return %c0_i32, %c0_i32_0 : i32, i32
  }
  func.func @transform_2(%arg0: i32, %arg1: i32) -> (i32, i32) {
    %c0_i32 = arith.constant 0 : i32
    %c0_i32_0 = arith.constant 0 : i32
    %c0_i32_1 = arith.constant 0 : i32
    return %c0_i32, %c0_i32_0 : i32, i32
  }
  func.func @transform_3(%arg0: i32, %arg1: i32) -> (i32, i32) {
    %c0_i32 = arith.constant 0 : i32
    %c0_i32_0 = arith.constant 0 : i32
    %c0_i32_1 = arith.constant 0 : i32
    return %c0_i32, %c0_i32_0 : i32, i32
  }
  func.func @transform_4(%arg0: i32, %arg1: i32) -> (i32, i32) {
    %c0_i32 = arith.constant 0 : i32
    %c0_i32_0 = arith.constant 0 : i32
    %c0_i32_1 = arith.constant 0 : i32
    return %c0_i32, %c0_i32_0 : i32, i32
  }
  func.func @transform_5(%arg0: i32, %arg1: i32) -> (i32, i32, i32) {
    %c0_i32 = arith.constant 0 : i32
    %c0_i32_0 = arith.constant 0 : i32
    return %arg0, %arg1, %c0_i32 : i32, i32, i32
  }
  func.func @transform_6(%arg0: i32, %arg1: i32) -> (i32, i32) {
    %c0_i32 = arith.constant 0 : i32
    %c0_i32_0 = arith.constant 0 : i32
    %c0_i32_1 = arith.constant 0 : i32
    return %c0_i32, %c0_i32_0 : i32, i32
  }
  func.func @transform_7(%arg0: i32, %arg1: i32) -> (i32, i32) {
    %c0_i32 = arith.constant 0 : i32
    %c0_i32_0 = arith.constant 0 : i32
    %c0_i32_1 = arith.constant 0 : i32
    return %c0_i32, %c0_i32_0 : i32, i32
  }
  func.func @transform_8(%arg0: i32, %arg1: i32) -> (i32, i32, i32) {
    %c0_i32 = arith.constant 0 : i32
    %c0_i32_0 = arith.constant 0 : i32
    return %arg0, %arg1, %c0_i32 : i32, i32, i32
  }
  func.func @transform_9(%arg0: i32, %arg1: i32) -> (i32, i32, i32) {
    %c0_i32 = arith.constant 0 : i32
    %c0_i32_0 = arith.constant 0 : i32
    return %arg0, %arg1, %c0_i32 : i32, i32, i32
  }
}

</mosaic_0001>

<bundles_post_ra>
// kernel: reg_stage_forward.6
= control target key start
LH: loop header
LB: loop body
LE: loop exit
PB: predicated region body
PF: predicated region fallthrough
CT: control target
= control target key end

     0   :  { %vm470_vm0 = vcmask 1041408   ;;  %vm373_vm1 = vcmask 31744   ;;  %vm19_vm2 = vcmask 64512   ;;  %v1749_v1 = vmov 0.0   ;;  %s2424_s1 = inlined_call_operand.vmem [shape: bf16[4,8], index: 1, kind: input, shape index: {}]   ;;  %s2425_s0 = inlined_call_operand.vmem [shape: bf16[512,4], index: 0, kind: input, shape index: {}]   ;;  %s2426_s2 = inlined_call_operand.vmem [shape: f32[1,8], index: 2, kind: input, shape index: {}]   ;;  %s2427_s3 = inlined_call_operand.vmem [shape: bf16[512,8], index: 3, kind: output, shape index: {}]  }
   0x1   :  { %v1773_v0 = vld [vmem:[%s2424_s1] sm:$0x3]  ;;  %22 = vst.msk [vmem:[#allocation2 + $0x10] sm:$0xff] %vm19_vm2, %v1749_v1  ;;  %20 = vst.msk [vmem:[#allocation2] sm:$0xff] %vm19_vm2, %v1749_v1  ;;  %v1718_v5 = vld [vmem:[%s2425_s0 + $0x8] sm:$0xff]   ;;  %vm1350_vm3 = vcmask 60416  }
   0x2   :  { %21 = vst.msk [vmem:[#allocation2 + $0x8] sm:$0xff] %vm19_vm2, %v1749_v1  ;;  %23 = vst.msk [vmem:[#allocation2 + $0x18] sm:$0xff] %vm19_vm2, %v1749_v1  ;;  %1713 = vmatprep.subr.msk.bf16.mxu0 %vm470_vm0, %v1773_v0  ;;  %1714 = vmatprep.subr.msk.bf16.mxu1 %vm470_vm0, %v1773_v0  ;;  %v472_v2 = vsel %vm470_vm0, %v1773_v0, 0  ;;  %v1716_v3 = vld [vmem:[%s2425_s0] sm:$0xff]   ;;  %v1719_v6 = vld [vmem:[%s2425_s0 + $0x88] sm:$0xff]  }
   0x3   :  { %24 = vst.msk [vmem:[#allocation2 + $0x20] sm:$0xff] %vm19_vm2, %v1749_v1  ;;  %25 = vst.msk [vmem:[#allocation2 + $0x28] sm:$0xff] %vm19_vm2, %v1749_v1  ;;  %1646 = vmatpush3.bf16.msra.mxu0 %v472_v2  ;;  %1712 = vmatpush3.bf16.msra.mxu1 %v472_v2  ;;  %v1717_v4 = vld [vmem:[%s2425_s0 + $0x80] sm:$0xff]   ;;  %v1720_v7 = vld [vmem:[%s2425_s0 + $0x10] sm:$0xff]  }
   0x4   :  { %26 = vst.msk [vmem:[#allocation2 + $0x30] sm:$0xff] %vm19_vm2, %v1749_v1  ;;  %27 = vst.msk [vmem:[#allocation2 + $0x38] sm:$0xff] %vm19_vm2, %v1749_v1  ;;  %1647 = vmatprep.mubr.msk.bf16.mxu0 %vm373_vm1, %v1716_v3  ;;  %1679 = vmatprep.mubr.msk.bf16.mxu1 %vm373_vm1, %v1717_v4  ;;  %v1721_v8 = vld [vmem:[%s2425_s0 + $0x90] sm:$0xff]   ;;  %v1722_v9 = vld [vmem:[%s2425_s0 + $0x18] sm:$0xff]  }
   0x5   :  { %28 = vst.msk [vmem:[#allocation2 + $0x40] sm:$0xff] %vm19_vm2, %v1749_v1  ;;  %29 = vst.msk [vmem:[#allocation2 + $0x48] sm:$0xff] %vm19_vm2, %v1749_v1  ;;  %v1723_v10 = vld [vmem:[%s2425_s0 + $0x98] sm:$0xff]   ;;  %v1724_v11 = vld [vmem:[%s2425_s0 + $0x20] sm:$0xff]  }
   0x6   :  { %30 = vst.msk [vmem:[#allocation2 + $0x50] sm:$0xff] %vm19_vm2, %v1749_v1  ;;  %31 = vst.msk [vmem:[#allocation2 + $0x58] sm:$0xff] %vm19_vm2, %v1749_v1  ;;  %1648 = vmatmul.mubr.msk.bf16.vlgmr.msra.gmra.mrb[0].mxu0 %vm373_vm1, %v1718_v5  ;;  %1680 = vmatmul.mubr.msk.bf16.vlgmr.msra.gmra.mrb[0].mxu1 %vm373_vm1, %v1719_v6  ;;  %v1725_v12 = vld [vmem:[%s2425_s0 + $0xa0] sm:$0xff]   ;;  %v1726_v13 = vld [vmem:[%s2425_s0 + $0x28] sm:$0xff]  }
   0x7   :  { %32 = vst.msk [vmem:[#allocation2 + $0x60] sm:$0xff] %vm19_vm2, %v1749_v1  ;;  %33 = vst.msk [vmem:[#allocation2 + $0x68] sm:$0xff] %vm19_vm2, %v1749_v1  ;;  %1651 = vmatprep.mubr.msk.bf16.mxu0 %vm373_vm1, %v1720_v7  ;;  %1683 = vmatprep.mubr.msk.bf16.mxu1 %vm373_vm1, %v1721_v8  ;;  %v1727_v14 = vld [vmem:[%s2425_s0 + $0xa8] sm:$0xff]   ;;  %v1728_v15 = vld [vmem:[%s2425_s0 + $0x30] sm:$0xff]  }
   0x8   :  { %34 = vst.msk [vmem:[#allocation2 + $0x70] sm:$0xff] %vm19_vm2, %v1749_v1  ;;  %35 = vst.msk [vmem:[#allocation2 + $0x78] sm:$0xff] %vm19_vm2, %v1749_v1  ;;  %v1729_v16 = vld [vmem:[%s2425_s0 + $0xb0] sm:$0xff]   ;;  %v1730_v17 = vld [vmem:[%s2425_s0 + $0x38] sm:$0xff]  }
   0x9   :  { %36 = vst.msk [vmem:[#allocation2 + $0x80] sm:$0xff] %vm19_vm2, %v1749_v1  ;;  %37 = vst.msk [vmem:[#allocation2 + $0x88] sm:$0xff] %vm19_vm2, %v1749_v1  ;;  %v1731_v18 = vld [vmem:[%s2425_s0 + $0xb8] sm:$0xff]   ;;  %v1732_v19 = vld [vmem:[%s2425_s0 + $0x40] sm:$0xff]  }
   0xa   :  { %38 = vst.msk [vmem:[#allocation2 + $0x90] sm:$0xff] %vm19_vm2, %v1749_v1  ;;  %39 = vst.msk [vmem:[#allocation2 + $0x98] sm:$0xff] %vm19_vm2, %v1749_v1  ;;  %v1733_v20 = vld [vmem:[%s2425_s0 + $0xc0] sm:$0xff]   ;;  %v1734_v21 = vld [vmem:[%s2425_s0 + $0x48] sm:$0xff]  }
   0xb   :  { %40 = vst.msk [vmem:[#allocation2 + $0xa0] sm:$0xff] %vm19_vm2, %v1749_v1  ;;  %41 = vst.msk [vmem:[#allocation2 + $0xa8] sm:$0xff] %vm19_vm2, %v1749_v1  ;;  %v1735_v22 = vld [vmem:[%s2425_s0 + $0xc8] sm:$0xff]   ;;  %v1736_v23 = vld [vmem:[%s2425_s0 + $0x50] sm:$0xff]  }
   0xc   :  { %42 = vst.msk [vmem:[#allocation2 + $0xb0] sm:$0xff] %vm19_vm2, %v1749_v1  ;;  %43 = vst.msk [vmem:[#allocation2 + $0xb8] sm:$0xff] %vm19_vm2, %v1749_v1  ;;  %v1737_v24 = vld [vmem:[%s2425_s0 + $0xd0] sm:$0xff]   ;;  %v1738_v25 = vld [vmem:[%s2425_s0 + $0x58] sm:$0xff]  }
   0xd   :  { %44 = vst.msk [vmem:[#allocation2 + $0xc0] sm:$0xff] %vm19_vm2, %v1749_v1  ;;  %45 = vst.msk [vmem:[#allocation2 + $0xc8] sm:$0xff] %vm19_vm2, %v1749_v1  ;;  %v1739_v26 = vld [vmem:[%s2425_s0 + $0xd8] sm:$0xff]   ;;  %v1740_v27 = vld [vmem:[%s2425_s0 + $0x60] sm:$0xff]  }
   0xe   :  { %46 = vst.msk [vmem:[#allocation2 + $0xd0] sm:$0xff] %vm19_vm2, %v1749_v1  ;;  %47 = vst.msk [vmem:[#allocation2 + $0xd8] sm:$0xff] %vm19_vm2, %v1749_v1  ;;  %1652 = vmatmul.mubr.msk.bf16.gmra.mrb[4].mxu0 %vm373_vm1, %v1722_v9  ;;  %1684 = vmatmul.mubr.msk.bf16.gmra.mrb[4].mxu1 %vm373_vm1, %v1723_v10  ;;  %v1741_v28 = vld [vmem:[%s2425_s0 + $0xe0] sm:$0xff]   ;;  %v1742_v29 = vld [vmem:[%s2425_s0 + $0x68] sm:$0xff]  }
   0xf   :  { %48 = vst.msk [vmem:[#allocation2 + $0xe0] sm:$0xff] %vm19_vm2, %v1749_v1  ;;  %49 = vst.msk [vmem:[#allocation2 + $0xe8] sm:$0xff] %vm19_vm2, %v1749_v1  ;;  %1655 = vmatprep.mubr.msk.bf16.mxu0 %vm373_vm1, %v1724_v11  ;;  %1687 = vmatprep.mubr.msk.bf16.mxu1 %vm373_vm1, %v1725_v12  ;;  %v1743_v30 = vld [vmem:[%s2425_s0 + $0xe8] sm:$0xff]   ;;  %v1744_v31 = vld [vmem:[%s2425_s0 + $0x70] sm:$0xff]  }
  0x10   :  { %50 = vst.msk [vmem:[#allocation2 + $0xf0] sm:$0xff] %vm19_vm2, %v1749_v1  ;;  %51 = vst.msk [vmem:[#allocation2 + $0xf8] sm:$0xff] %vm19_vm2, %v1749_v1  ;;  %v1745_v32 = vld [vmem:[%s2425_s0 + $0xf0] sm:$0xff]   ;;  %v1746_v33 = vld [vmem:[%s2425_s0 + $0x78] sm:$0xff]  }
  0x11   :  { %52 = vst.msk [vmem:[#allocation2 + $0x100] sm:$0xff] %vm19_vm2, %v1749_v1  ;;  %53 = vst.msk [vmem:[#allocation2 + $0x108] sm:$0xff] %vm19_vm2, %v1749_v1  ;;  %v1747_v34 = vld [vmem:[%s2425_s0 + $0xf8] sm:$0xff]   ;;  %v86_v35 = vld [vmem:[#allocation2 + $0x10] sm:$0xff] }
  0x12   :  { %54 = vst.msk [vmem:[#allocation2 + $0x110] sm:$0xff] %vm19_vm2, %v1749_v1  ;;  %55 = vst.msk [vmem:[#allocation2 + $0x118] sm:$0xff] %vm19_vm2, %v1749_v1  ;;  %v84_v37 = vld [vmem:[#allocation2] sm:$0xff]  ;;  %v87_v40 = vld [vmem:[#allocation2 + $0x18] sm:$0xff] }
  0x13   :  { %56 = vst.msk [vmem:[#allocation2 + $0x120] sm:$0xff] %vm19_vm2, %v1749_v1  ;;  %57 = vst.msk [vmem:[#allocation2 + $0x128] sm:$0xff] %vm19_vm2, %v1749_v1  ;;  %v85_v45 = vld [vmem:[#allocation2 + $0x8] sm:$0xff]  ;;  %v90_v59 = vld [vmem:[#allocation2 + $0x30] sm:$0xff] }
  0x14   :  { %58 = vst.msk [vmem:[#allocation2 + $0x130] sm:$0xff] %vm19_vm2, %v1749_v1  ;;  %59 = vst.msk [vmem:[#allocation2 + $0x138] sm:$0xff] %vm19_vm2, %v1749_v1  ;;  %v88_v61 = vld [vmem:[#allocation2 + $0x20] sm:$0xff]  ;;  %v89_v6 = vld [vmem:[#allocation2 + $0x28] sm:$0xff] }
  0x15   :  { %60 = vst.msk [vmem:[#allocation2 + $0x140] sm:$0xff] %vm19_vm2, %v1749_v1  ;;  %61 = vst.msk [vmem:[#allocation2 + $0x148] sm:$0xff] %vm19_vm2, %v1749_v1  ;;  %v2048_v62 = vld [vmem:[%s2426_s2] ss:$0 sm:$0xff] }
  0x16   :  { %62 = vst.msk [vmem:[#allocation2 + $0x150] sm:$0xff] %vm19_vm2, %v1749_v1  ;;  %63 = vst.msk [vmem:[#allocation2 + $0x158] sm:$0xff] %vm19_vm2, %v1749_v1  ;;  %1656 = vmatmul.mubr.msk.bf16.gmra.mrb[8].mxu0 %vm373_vm1, %v1726_v13  ;;  %1688 = vmatmul.mubr.msk.bf16.gmra.mrb[8].mxu1 %vm373_vm1, %v1727_v14 }
  0x17   :  { %64 = vst.msk [vmem:[#allocation2 + $0x160] sm:$0xff] %vm19_vm2, %v1749_v1  ;;  %65 = vst.msk [vmem:[#allocation2 + $0x168] sm:$0xff] %vm19_vm2, %v1749_v1  ;;  %1659 = vmatprep.mubr.msk.bf16.mxu0 %vm373_vm1, %v1728_v15  ;;  %1691 = vmatprep.mubr.msk.bf16.mxu1 %vm373_vm1, %v1729_v16 }
  0x18   :  { %66 = vst.msk [vmem:[#allocation2 + $0x170] sm:$0xff] %vm19_vm2, %v1749_v1  ;;  %67 = vst.msk [vmem:[#allocation2 + $0x178] sm:$0xff] %vm19_vm2, %v1749_v1  ;;  %v116_v39 = vld [vmem:[#allocation2 + $0x100] sm:$0xff]  ;;  %v117_v50 = vld [vmem:[#allocation2 + $0x108] sm:$0xff] }
  0x19   :  { %68 = vst.msk [vmem:[#allocation2 + $0x180] sm:$0xff] %vm19_vm2, %v1749_v1  ;;  %69 = vst.msk [vmem:[#allocation2 + $0x188] sm:$0xff] %vm19_vm2, %v1749_v1  ;;  %v118_v36 = vld [vmem:[#allocation2 + $0x110] sm:$0xff]  ;;  %v119_v44 = vld [vmem:[#allocation2 + $0x118] sm:$0xff] }
  0x1a   :  { %70 = vst.msk [vmem:[#allocation2 + $0x190] sm:$0xff] %vm19_vm2, %v1749_v1  ;;  %71 = vst.msk [vmem:[#allocation2 + $0x198] sm:$0xff] %vm19_vm2, %v1749_v1  ;;  %v120_v0 = vld [vmem:[#allocation2 + $0x120] sm:$0xff]  ;;  %v121_v12 = vld [vmem:[#allocation2 + $0x128] sm:$0xff] }
  0x1b   :  { %72 = vst.msk [vmem:[#allocation2 + $0x1a0] sm:$0xff] %vm19_vm2, %v1749_v1  ;;  %73 = vst.msk [vmem:[#allocation2 + $0x1a8] sm:$0xff] %vm19_vm2, %v1749_v1  ;;  %v122_v60 = vld [vmem:[#allocation2 + $0x130] sm:$0xff]  ;;  %v123_v5 = vld [vmem:[#allocation2 + $0x138] sm:$0xff] }
  0x1c   :  { %74 = vst.msk [vmem:[#allocation2 + $0x1b0] sm:$0xff] %vm19_vm2, %v1749_v1  ;;  %75 = vst.msk [vmem:[#allocation2 + $0x1b8] sm:$0xff] %vm19_vm2, %v1749_v1 }
  0x1d   :  { %76 = vst.msk [vmem:[#allocation2 + $0x1c0] sm:$0xff] %vm19_vm2, %v1749_v1  ;;  %77 = vst.msk [vmem:[#allocation2 + $0x1c8] sm:$0xff] %vm19_vm2, %v1749_v1 }
  0x1e   :  { %78 = vst.msk [vmem:[#allocation2 + $0x1d0] sm:$0xff] %vm19_vm2, %v1749_v1  ;;  %79 = vst.msk [vmem:[#allocation2 + $0x1d8] sm:$0xff] %vm19_vm2, %v1749_v1  ;;  %1660 = vmatmul.mubr.msk.bf16.gmra.mrb[12].mxu0 %vm373_vm1, %v1730_v17  ;;  %1692 = vmatmul.mubr.msk.bf16.gmra.mrb[12].mxu1 %vm373_vm1, %v1731_v18 }
  0x1f   :  { %80 = vst.msk [vmem:[#allocation2 + $0x1e0] sm:$0xff] %vm19_vm2, %v1749_v1  ;;  %81 = vst.msk [vmem:[#allocation2 + $0x1e8] sm:$0xff] %vm19_vm2, %v1749_v1  ;;  %1663 = vmatprep.mubr.msk.bf16.mxu0 %vm373_vm1, %v1732_v19  ;;  %1695 = vmatprep.mubr.msk.bf16.mxu1 %vm373_vm1, %v1733_v20 }
  0x20   :  { %82 = vst.msk [vmem:[#allocation2 + $0x1f0] sm:$0xff] %vm19_vm2, %v1749_v1  ;;  %83 = vst.msk [vmem:[#allocation2 + $0x1f8] sm:$0xff] %vm19_vm2, %v1749_v1  ;;  %v91_v1 = vld [vmem:[#allocation2 + $0x38] sm:$0xff] }
  0x26   :  { %1664 = vmatmul.mubr.msk.bf16.gmra.mrb[16].mxu0 %vm373_vm1, %v1734_v21  ;;  %1696 = vmatmul.mubr.msk.bf16.gmra.mrb[16].mxu1 %vm373_vm1, %v1735_v22 }
  0x27   :  { %1667 = vmatprep.mubr.msk.bf16.mxu0 %vm373_vm1, %v1736_v23  ;;  %1699 = vmatprep.mubr.msk.bf16.mxu1 %vm373_vm1, %v1737_v24 }
  0x2e   :  { %1668 = vmatmul.mubr.msk.bf16.gmra.mrb[20].mxu0 %vm373_vm1, %v1738_v25  ;;  %1700 = vmatmul.mubr.msk.bf16.gmra.mrb[20].mxu1 %vm373_vm1, %v1739_v26 }
  0x2f   :  { %1671 = vmatprep.mubr.msk.bf16.mxu0 %vm373_vm1, %v1740_v27  ;;  %1703 = vmatprep.mubr.msk.bf16.mxu1 %vm373_vm1, %v1741_v28 }
  0x36   :  { %1672 = vmatmul.mubr.msk.bf16.gmra.mrb[24].mxu0 %vm373_vm1, %v1742_v29  ;;  %1704 = vmatmul.mubr.msk.bf16.gmra.mrb[24].mxu1 %vm373_vm1, %v1743_v30 }
  0x37   :  { %1675 = vmatprep.mubr.msk.bf16.mxu0 %vm373_vm1, %v1744_v31  ;;  %1707 = vmatprep.mubr.msk.bf16.mxu1 %vm373_vm1, %v1745_v32 }
  0x3e   :  { %1676 = vmatmul.mubr.msk.bf16.gmra.mrb[28].mxu0 %vm373_vm1, %v1746_v33  ;;  %1708 = vmatmul.mubr.msk.bf16.gmra.mrb[28].mxu1 %vm373_vm1, %v1747_v34 }
  0xd9   :  { %v1649_v38 = vpop.f32.mrb[0].mxu0  ;;  %v1681_v42 = vpop.f32.mrb[0].mxu1 }
  0xda   :  { %v765_v41 = vadd.f32 %v1649_v38, %v86_v35  ;;  %v508_v43 = vpop.f32.mrb[1].mxu0  ;;  %v797_v46 = vadd.f32 %v1681_v42, %v118_v36  ;;  %v636_v48 = vpop.f32.mrb[1].mxu1  ;;  %v94_v38 = vld [vmem:[#allocation2 + $0x50] sm:$0xff] }
  0xdb   :  { %v763_v47 = vadd.f32 %v508_v43, %v84_v37  ;;  %v1650_v49 = vpop.f32.mrb[2].mxu0  ;;  %v795_v51 = vadd.f32 %v636_v48, %v116_v39  ;;  %v1682_v53 = vpop.f32.mrb[2].mxu1  ;;  %v126_v43 = vld [vmem:[#allocation2 + $0x150] sm:$0xff] }
  0xdc   :  { %830 = vst.msk [vmem:[#allocation2 + $0x10] sm:$0xff] %vm19_vm2, %v765_v41  ;;  %v766_v52 = vadd.f32 %v1650_v49, %v87_v40  ;;  %v511_v54 = vpop.f32.mrb[3].mxu0  ;;  %862 = vst.msk [vmem:[#allocation2 + $0x110] sm:$0xff] %vm19_vm2, %v797_v46  ;;  %v798_v55 = vadd.f32 %v1682_v53, %v119_v44  ;;  %v639_v57 = vpop.f32.mrb[3].mxu1  ;;  %v92_v44 = vld [vmem:[#allocation2 + $0x40] sm:$0xff] }
  0xdd   :  { %828 = vst.msk [vmem:[#allocation2] sm:$0xff] %vm19_vm2, %v763_v47  ;;  %v764_v56 = vadd.f32 %v511_v54, %v85_v45  ;;  %860 = vst.msk [vmem:[#allocation2 + $0x100] sm:$0xff] %vm19_vm2, %v795_v51  ;;  %v796_v58 = vadd.f32 %v639_v57, %v117_v50  ;;  %v124_v50 = vld [vmem:[#allocation2 + $0x140] sm:$0xff]  ;;  %v95_v51 = vld [vmem:[#allocation2 + $0x58] sm:$0xff] }
  0xde   :  { %831 = vst.msk [vmem:[#allocation2 + $0x18] sm:$0xff] %vm19_vm2, %v766_v52  ;;  %863 = vst.msk [vmem:[#allocation2 + $0x118] sm:$0xff] %vm19_vm2, %v798_v55 }
  0xdf   :  { %829 = vst.msk [vmem:[#allocation2 + $0x8] sm:$0xff] %vm19_vm2, %v764_v56  ;;  %861 = vst.msk [vmem:[#allocation2 + $0x108] sm:$0xff] %vm19_vm2, %v796_v58  ;;  %v127_v58 = vld [vmem:[#allocation2 + $0x158] sm:$0xff] }
  0xe1   :  { %v1653_v63 = vpop.f32.mrb[4].mxu0  ;;  %v1685_v3 = vpop.f32.mrb[4].mxu1 }
  0xe2   :  { %v769_v2 = vadd.f32 %v1653_v63, %v90_v59  ;;  %v524_v4 = vpop.f32.mrb[5].mxu0  ;;  %v801_v8 = vadd.f32 %v1685_v3, %v122_v60  ;;  %v652_v10 = vpop.f32.mrb[5].mxu1  ;;  %v93_v59 = vld [vmem:[#allocation2 + $0x48] sm:$0xff] }
  0xe3   :  { %v897_v7 = vld [vmem:[#allocation2 + $0x10] sm:$0xff]  ;;  %v767_v9 = vadd.f32 %v524_v4, %v88_v61  ;;  %v1654_v11 = vpop.f32.mrb[6].mxu0  ;;  %v799_v16 = vadd.f32 %v652_v10, %v120_v0  ;;  %v1686_v18 = vpop.f32.mrb[6].mxu1  ;;  %v125_v4 = vld [vmem:[#allocation2 + $0x148] sm:$0xff] }
  0xe4   :  { %v968_v13 = vadd.f32 %v2048_v62, %v897_v7  ;;  %v929_v14 = vld [vmem:[#allocation2 + $0x110] sm:$0xff]  ;;  %v895_v15 = vld [vmem:[#allocation2] sm:$0xff]  ;;  %834 = vst.msk [vmem:[#allocation2 + $0x30] sm:$0xff] %vm19_vm2, %v769_v2  ;;  %v770_v17 = vadd.f32 %v1654_v11, %v91_v1  ;;  %v527_v19 = vpop.f32.mrb[7].mxu0  ;;  %866 = vst.msk [vmem:[#allocation2 + $0x130] sm:$0xff] %vm19_vm2, %v801_v8  ;;  %v802_v24 = vadd.f32 %v1686_v18, %v123_v5  ;;  %v655_v26 = vpop.f32.mrb[7].mxu1 }
  0xe5   :  { %v1000_v20 = vadd.f32 %v2048_v62, %v929_v14  ;;  %v966_v21 = vadd.f32 %v2048_v62, %v895_v15  ;;  %v927_v22 = vld [vmem:[#allocation2 + $0x100] sm:$0xff]  ;;  %v898_v23 = vld [vmem:[#allocation2 + $0x18] sm:$0xff]  ;;  %832 = vst.msk [vmem:[#allocation2 + $0x20] sm:$0xff] %vm19_vm2, %v767_v9  ;;  %v768_v25 = vadd.f32 %v527_v19, %v89_v6  ;;  %864 = vst.msk [vmem:[#allocation2 + $0x120] sm:$0xff] %vm19_vm2, %v799_v16 }
  0xe6   :  { %v1032_v27 = vmax.f32 %v968_v13, 0.0  ;;  %v998_v28 = vadd.f32 %v2048_v62, %v927_v22  ;;  %v969_v29 = vadd.f32 %v2048_v62, %v898_v23  ;;  %v930_v30 = vld [vmem:[#allocation2 + $0x118] sm:$0xff]  ;;  %v896_v31 = vld [vmem:[#allocation2 + $0x8] sm:$0xff]  ;;  %835 = vst.msk [vmem:[#allocation2 + $0x38] sm:$0xff] %vm19_vm2, %v770_v17  ;;  %v800_v32 = vadd.f32 %v655_v26, %v121_v12  ;;  %867 = vst.msk [vmem:[#allocation2 + $0x138] sm:$0xff] %vm19_vm2, %v802_v24 }
  0xe7   :  { %v1064_v33 = vmax.f32 %v1000_v20, 0.0  ;;  %v1030_v34 = vmax.f32 %v966_v21, 0.0  ;;  %v1001_v35 = vadd.f32 %v2048_v62, %v930_v30  ;;  %v967_v36 = vadd.f32 %v2048_v62, %v896_v31  ;;  %v928_v37 = vld [vmem:[#allocation2 + $0x108] sm:$0xff]  ;;  %833 = vst.msk [vmem:[#allocation2 + $0x28] sm:$0xff] %vm19_vm2, %v768_v25  ;;  %v98_v31 = vld [vmem:[#allocation2 + $0x70] sm:$0xff] }
  0xe8   :  { %v1550_v39 = vpack.c.bf16 %v1032_v27, %v1032_v27  ;;  %v1062_v40 = vmax.f32 %v998_v28, 0.0  ;;  %v1033_v41 = vmax.f32 %v969_v29, 0.0  ;;  %v999_v42 = vadd.f32 %v2048_v62, %v928_v37  ;;  %865 = vst.msk [vmem:[#allocation2 + $0x128] sm:$0xff] %vm19_vm2, %v800_v32  ;;  %v96_v37 = vld [vmem:[#allocation2 + $0x60] sm:$0xff] }
  0xe9   :  { %v1582_v45 = vpack.c.bf16 %v1064_v33, %v1064_v33  ;;  %v1548_v46 = vpack.c.bf16 %v1030_v34, %v1030_v34  ;;  %v1065_v47 = vmax.f32 %v1001_v35, 0.0  ;;  %v1031_v48 = vmax.f32 %v967_v36, 0.0  ;;  %v1657_v49 = vpop.f32.mrb[8].mxu0  ;;  %v1689_v56 = vpop.f32.mrb[8].mxu1  ;;  %v130_v36 = vld [vmem:[#allocation2 + $0x170] sm:$0xff] }
  0xea   :  { %1353 = vst.msk [vmem:[%s2427_s3 + $0x8] sm:$0xf] %vm1350_vm3, %v1550_v39  ;;  %v1580_v52 = vpack.c.bf16 %v1062_v40, %v1062_v40  ;;  %v1551_v53 = vpack.c.bf16 %v1033_v41, %v1033_v41  ;;  %v1063_v54 = vmax.f32 %v999_v42, 0.0  ;;  %v773_v55 = vadd.f32 %v1657_v49, %v94_v38  ;;  %v540_v57 = vpop.f32.mrb[9].mxu0  ;;  %v668_v2 = vpop.f32.mrb[9].mxu1 }
  0xeb   :  { %1385 = vst.msk [vmem:[%s2427_s3 + $0x88] sm:$0xf] %vm1350_vm3, %v1582_v45  ;;  %1351 = vst.msk [vmem:[%s2427_s3] sm:$0xf] %vm1350_vm3, %v1548_v46  ;;  %v1583_v60 = vpack.c.bf16 %v1065_v47, %v1065_v47  ;;  %v1549_v61 = vpack.c.bf16 %v1031_v48, %v1031_v48  ;;  %v901_v63 = vld [vmem:[#allocation2 + $0x30] sm:$0xff]  ;;  %v805_v0 = vadd.f32 %v1689_v56, %v126_v43  ;;  %v1658_v3 = vpop.f32.mrb[10].mxu0 }
  0xec   :  { %v771_v1 = vadd.f32 %v540_v57, %v92_v44  ;;  %1383 = vst.msk [vmem:[%s2427_s3 + $0x80] sm:$0xf] %vm1350_vm3, %v1580_v52  ;;  %1354 = vst.msk [vmem:[%s2427_s3 + $0xc] sm:$0xf] %vm1350_vm3, %v1551_v53  ;;  %v1581_v5 = vpack.c.bf16 %v1063_v54, %v1063_v54  ;;  %v972_v6 = vadd.f32 %v2048_v62, %v901_v63  ;;  %v933_v7 = vld [vmem:[#allocation2 + $0x130] sm:$0xff]  ;;  %v899_v8 = vld [vmem:[#allocation2 + $0x20] sm:$0xff] }
  0xed   :  { %838 = vst.msk [vmem:[#allocation2 + $0x50] sm:$0xff] %vm19_vm2, %v773_v55  ;;  %v803_v9 = vadd.f32 %v668_v2, %v124_v50  ;;  %v774_v10 = vadd.f32 %v1658_v3, %v95_v51  ;;  %v1690_v11 = vpop.f32.mrb[10].mxu1  ;;  %v543_v12 = vpop.f32.mrb[11].mxu0  ;;  %v1004_v13 = vadd.f32 %v2048_v62, %v933_v7  ;;  %v970_v14 = vadd.f32 %v2048_v62, %v899_v8  ;;  %v931_v15 = vld [vmem:[#allocation2 + $0x120] sm:$0xff]  ;;  %v902_v16 = vld [vmem:[#allocation2 + $0x38] sm:$0xff]  ;;  %v97_v52 = vld [vmem:[#allocation2 + $0x68] sm:$0xff] }
  0xee   :  { %1386 = vst.msk [vmem:[%s2427_s3 + $0x8c] sm:$0xf] %vm1350_vm3, %v1583_v60  ;;  %1352 = vst.msk [vmem:[%s2427_s3 + $0x4] sm:$0xf] %vm1350_vm3, %v1549_v61  ;;  %v806_v17 = vadd.f32 %v1690_v11, %v127_v58  ;;  %v772_v18 = vadd.f32 %v543_v12, %v93_v59  ;;  %v671_v19 = vpop.f32.mrb[11].mxu1  ;;  %v1036_v20 = vmax.f32 %v972_v6, 0.0  ;;  %v1002_v21 = vadd.f32 %v2048_v62, %v931_v15 }
  0xef   :  { %870 = vst.msk [vmem:[#allocation2 + $0x150] sm:$0xff] %vm19_vm2, %v805_v0  ;;  %836 = vst.msk [vmem:[#allocation2 + $0x40] sm:$0xff] %vm19_vm2, %v771_v1  ;;  %v973_v22 = vadd.f32 %v2048_v62, %v902_v16  ;;  %v934_v23 = vld [vmem:[#allocation2 + $0x138] sm:$0xff]  ;;  %v900_v24 = vld [vmem:[#allocation2 + $0x28] sm:$0xff]  ;;  %v804_v25 = vadd.f32 %v671_v19, %v125_v4  ;;  %v1068_v26 = vmax.f32 %v1004_v13, 0.0  ;;  %v1034_v27 = vmax.f32 %v970_v14, 0.0 }
  0xf0   :  { %1384 = vst.msk [vmem:[%s2427_s3 + $0x84] sm:$0xf] %vm1350_vm3, %v1581_v5  ;;  %v1005_v28 = vadd.f32 %v2048_v62, %v934_v23  ;;  %v971_v29 = vadd.f32 %v2048_v62, %v900_v24  ;;  %v932_v30 = vld [vmem:[#allocation2 + $0x128] sm:$0xff]  ;;  %v1554_v32 = vpack.c.bf16 %v1036_v20, %v1036_v20  ;;  %v1066_v33 = vmax.f32 %v1002_v21, 0.0  ;;  %v128_v43 = vld [vmem:[#allocation2 + $0x160] sm:$0xff]  ;;  %v99_v44 = vld [vmem:[#allocation2 + $0x78] sm:$0xff] }
  0xf1   :  { %868 = vst.msk [vmem:[#allocation2 + $0x140] sm:$0xff] %vm19_vm2, %v803_v9  ;;  %839 = vst.msk [vmem:[#allocation2 + $0x58] sm:$0xff] %vm19_vm2, %v774_v10  ;;  %v1037_v34 = vmax.f32 %v973_v22, 0.0  ;;  %v1003_v35 = vadd.f32 %v2048_v62, %v932_v30  ;;  %v1586_v38 = vpack.c.bf16 %v1068_v26, %v1068_v26  ;;  %v1552_v39 = vpack.c.bf16 %v1034_v27, %v1034_v27  ;;  %v1661_v42 = vpop.f32.mrb[12].mxu0  ;;  %v1693_v49 = vpop.f32.mrb[12].mxu1  ;;  %v131_v51 = vld [vmem:[#allocation2 + $0x178] sm:$0xff] }
  0xf2   :  { %871 = vst.msk [vmem:[#allocation2 + $0x158] sm:$0xff] %vm19_vm2, %v806_v17  ;;  %837 = vst.msk [vmem:[#allocation2 + $0x48] sm:$0xff] %vm19_vm2, %v772_v18  ;;  %v1069_v40 = vmax.f32 %v1005_v28, 0.0  ;;  %v1035_v41 = vmax.f32 %v971_v29, 0.0  ;;  %v1584_v45 = vpack.c.bf16 %v1066_v33, %v1066_v33  ;;  %v777_v48 = vadd.f32 %v1661_v42, %v98_v31  ;;  %v556_v50 = vpop.f32.mrb[13].mxu0  ;;  %v684_v58 = vpop.f32.mrb[13].mxu1 }
  0xf3   :  { %869 = vst.msk [vmem:[#allocation2 + $0x148] sm:$0xff] %vm19_vm2, %v804_v25  ;;  %v1555_v46 = vpack.c.bf16 %v1037_v34, %v1037_v34  ;;  %v1067_v47 = vmax.f32 %v1003_v35, 0.0  ;;  %v809_v56 = vadd.f32 %v1693_v49, %v130_v36  ;;  %v775_v57 = vadd.f32 %v556_v50, %v96_v37  ;;  %v1662_v59 = vpop.f32.mrb[14].mxu0  ;;  %v129_v60 = vld [vmem:[#allocation2 + $0x168] sm:$0xff]  ;;  %v1694_v4 = vpop.f32.mrb[14].mxu1  ;;  %v102_v24 = vld [vmem:[#allocation2 + $0x90] sm:$0xff] }
  0xf4   :  { %1357 = vst.msk [vmem:[%s2427_s3 + $0x18] sm:$0xf] %vm1350_vm3, %v1554_v32  ;;  %1389 = vst.msk [vmem:[%s2427_s3 + $0x98] sm:$0xf] %vm1350_vm3, %v1586_v38  ;;  %v1587_v53 = vpack.c.bf16 %v1069_v40, %v1069_v40  ;;  %v1553_v54 = vpack.c.bf16 %v1035_v41, %v1035_v41  ;;  %v905_v55 = vld [vmem:[#allocation2 + $0x50] sm:$0xff]  ;;  %v807_v2 = vadd.f32 %v684_v58, %v128_v43  ;;  %v559_v5 = vpop.f32.mrb[15].mxu0 }
  0xf5   :  { %1355 = vst.msk [vmem:[%s2427_s3 + $0x10] sm:$0xf] %vm1350_vm3, %v1552_v39  ;;  %1387 = vst.msk [vmem:[%s2427_s3 + $0x90] sm:$0xf] %vm1350_vm3, %v1584_v45  ;;  %v1585_v61 = vpack.c.bf16 %v1067_v47, %v1067_v47  ;;  %v976_v63 = vadd.f32 %v2048_v62, %v905_v55  ;;  %v778_v3 = vadd.f32 %v1662_v59, %v99_v44  ;;  %v687_v12 = vpop.f32.mrb[15].mxu1  ;;  %v134_v29 = vld [vmem:[#allocation2 + $0x190] sm:$0xff] }
  0xf6   :  { %1358 = vst.msk [vmem:[%s2427_s3 + $0x1c] sm:$0xf] %vm1350_vm3, %v1555_v46  ;;  %v937_v0 = vld [vmem:[#allocation2 + $0x150] sm:$0xff]  ;;  %v903_v1 = vld [vmem:[#allocation2 + $0x40] sm:$0xff]  ;;  %1390 = vst.msk [vmem:[%s2427_s3 + $0x9c] sm:$0xf] %vm1350_vm3, %v1587_v53  ;;  %v810_v10 = vadd.f32 %v1694_v4, %v131_v51  ;;  %v776_v11 = vadd.f32 %v559_v5, %v97_v52  ;;  %v808_v18 = vadd.f32 %v687_v12, %v129_v60 }
  0xf7   :  { %842 = vst.msk [vmem:[#allocation2 + $0x70] sm:$0xff] %vm19_vm2, %v777_v48  ;;  %v1008_v6 = vadd.f32 %v2048_v62, %v937_v0  ;;  %v974_v7 = vadd.f32 %v2048_v62, %v903_v1  ;;  %874 = vst.msk [vmem:[#allocation2 + $0x170] sm:$0xff] %vm19_vm2, %v809_v56  ;;  %v1040_v13 = vmax.f32 %v976_v63, 0.0  ;;  %v100_v30 = vld [vmem:[#allocation2 + $0x80] sm:$0xff]  ;;  %v103_v37 = vld [vmem:[#allocation2 + $0x98] sm:$0xff] }
  0xf8   :  { %1356 = vst.msk [vmem:[%s2427_s3 + $0x14] sm:$0xf] %vm1350_vm3, %v1553_v54  ;;  %v935_v8 = vld [vmem:[#allocation2 + $0x140] sm:$0xff]  ;;  %v906_v9 = vld [vmem:[#allocation2 + $0x58] sm:$0xff]  ;;  %1388 = vst.msk [vmem:[%s2427_s3 + $0x94] sm:$0xf] %vm1350_vm3, %v1585_v61 }
  0xf9   :  { %840 = vst.msk [vmem:[#allocation2 + $0x60] sm:$0xff] %vm19_vm2, %v775_v57  ;;  %v1006_v14 = vadd.f32 %v2048_v62, %v935_v8  ;;  %v977_v15 = vadd.f32 %v2048_v62, %v906_v9  ;;  %v938_v16 = vld [vmem:[#allocation2 + $0x158] sm:$0xff]  ;;  %v904_v17 = vld [vmem:[#allocation2 + $0x48] sm:$0xff]  ;;  %872 = vst.msk [vmem:[#allocation2 + $0x160] sm:$0xff] %vm19_vm2, %v807_v2  ;;  %v1072_v19 = vmax.f32 %v1008_v6, 0.0  ;;  %v1038_v20 = vmax.f32 %v974_v7, 0.0 }
  0xfa   :  { %843 = vst.msk [vmem:[#allocation2 + $0x78] sm:$0xff] %vm19_vm2, %v778_v3  ;;  %v1009_v21 = vadd.f32 %v2048_v62, %v938_v16  ;;  %v975_v22 = vadd.f32 %v2048_v62, %v904_v17  ;;  %v936_v23 = vld [vmem:[#allocation2 + $0x148] sm:$0xff]  ;;  %875 = vst.msk [vmem:[#allocation2 + $0x178] sm:$0xff] %vm19_vm2, %v810_v10  ;;  %v1558_v25 = vpack.c.bf16 %v1040_v13, %v1040_v13  ;;  %v1665_v35 = vpop.f32.mrb[16].mxu0  ;;  %v132_v36 = vld [vmem:[#allocation2 + $0x180] sm:$0xff]  ;;  %v1697_v42 = vpop.f32.mrb[16].mxu1 }
  0xfb   :  { %841 = vst.msk [vmem:[#allocation2 + $0x68] sm:$0xff] %vm19_vm2, %v776_v11  ;;  %v1070_v26 = vmax.f32 %v1006_v14, 0.0  ;;  %v1041_v27 = vmax.f32 %v977_v15, 0.0  ;;  %v1007_v28 = vadd.f32 %v2048_v62, %v936_v23  ;;  %873 = vst.msk [vmem:[#allocation2 + $0x168] sm:$0xff] %vm19_vm2, %v808_v18  ;;  %v1590_v31 = vpack.c.bf16 %v1072_v19, %v1072_v19  ;;  %v572_v43 = vpop.f32.mrb[17].mxu0  ;;  %v135_v44 = vld [vmem:[#allocation2 + $0x198] sm:$0xff] }
  0xfc   :  { %v1556_v32 = vpack.c.bf16 %v1038_v20, %v1038_v20  ;;  %v1073_v33 = vmax.f32 %v1009_v21, 0.0  ;;  %v1039_v34 = vmax.f32 %v975_v22, 0.0  ;;  %1361 = vst.msk [vmem:[%s2427_s3 + $0x28] sm:$0xf] %vm1350_vm3, %v1558_v25  ;;  %v781_v41 = vadd.f32 %v1665_v35, %v102_v24  ;;  %v101_v45 = vld [vmem:[#allocation2 + $0x88] sm:$0xff]  ;;  %v700_v51 = vpop.f32.mrb[17].mxu1 }
  0xfd   :  { %v1588_v38 = vpack.c.bf16 %v1070_v26, %v1070_v26  ;;  %v1559_v39 = vpack.c.bf16 %v1041_v27, %v1041_v27  ;;  %v1071_v40 = vmax.f32 %v1007_v28, 0.0  ;;  %1393 = vst.msk [vmem:[%s2427_s3 + $0xa8] sm:$0xf] %vm1350_vm3, %v1590_v31  ;;  %v813_v49 = vadd.f32 %v1697_v42, %v134_v29  ;;  %v1666_v52 = vpop.f32.mrb[18].mxu0  ;;  %v133_v53 = vld [vmem:[#allocation2 + $0x188] sm:$0xff]  ;;  %v1698_v60 = vpop.f32.mrb[18].mxu1 }
  0xfe   :  { %1359 = vst.msk [vmem:[%s2427_s3 + $0x20] sm:$0xf] %vm1350_vm3, %v1556_v32  ;;  %v1591_v46 = vpack.c.bf16 %v1073_v33, %v1073_v33  ;;  %v1557_v47 = vpack.c.bf16 %v1039_v34, %v1039_v34  ;;  %v909_v48 = vld [vmem:[#allocation2 + $0x70] sm:$0xff]  ;;  %v779_v50 = vadd.f32 %v572_v43, %v100_v30  ;;  %v811_v58 = vadd.f32 %v700_v51, %v132_v36  ;;  %v575_v61 = vpop.f32.mrb[19].mxu0  ;;  %v703_v5 = vpop.f32.mrb[19].mxu1  ;;  %v104_v23 = vld [vmem:[#allocation2 + $0xa0] sm:$0xff] }
  0xff   :  { %1391 = vst.msk [vmem:[%s2427_s3 + $0xa0] sm:$0xf] %vm1350_vm3, %v1588_v38  ;;  %1362 = vst.msk [vmem:[%s2427_s3 + $0x2c] sm:$0xf] %vm1350_vm3, %v1559_v39  ;;  %v1589_v54 = vpack.c.bf16 %v1071_v40, %v1071_v40  ;;  %v980_v55 = vadd.f32 %v2048_v62, %v909_v48  ;;  %v941_v56 = vld [vmem:[#allocation2 + $0x170] sm:$0xff]  ;;  %v782_v59 = vadd.f32 %v1666_v52, %v103_v37  ;;  %v136_v29 = vld [vmem:[#allocation2 + $0x1a0] sm:$0xff] }
 0x100   :  { %v907_v57 = vld [vmem:[#allocation2 + $0x60] sm:$0xff]  ;;  %846 = vst.msk [vmem:[#allocation2 + $0x90] sm:$0xff] %vm19_vm2, %v781_v41  ;;  %v1012_v63 = vadd.f32 %v2048_v62, %v941_v56  ;;  %878 = vst.msk [vmem:[#allocation2 + $0x190] sm:$0xff] %vm19_vm2, %v813_v49  ;;  %v814_v3 = vadd.f32 %v1698_v60, %v135_v44  ;;  %v780_v4 = vadd.f32 %v575_v61, %v101_v45  ;;  %v106_v17 = vld [vmem:[#allocation2 + $0xb0] sm:$0xff] }
 0x101   :  { %1394 = vst.msk [vmem:[%s2427_s3 + $0xac] sm:$0xf] %vm1350_vm3, %v1591_v46  ;;  %1360 = vst.msk [vmem:[%s2427_s3 + $0x24] sm:$0xf] %vm1350_vm3, %v1557_v47  ;;  %v978_v0 = vadd.f32 %v2048_v62, %v907_v57  ;;  %v939_v1 = vld [vmem:[#allocation2 + $0x160] sm:$0xff]  ;;  %v910_v2 = vld [vmem:[#allocation2 + $0x78] sm:$0xff]  ;;  %v812_v11 = vadd.f32 %v703_v5, %v133_v53 }
 0x102   :  { %844 = vst.msk [vmem:[#allocation2 + $0x80] sm:$0xff] %vm19_vm2, %v779_v50  ;;  %v1044_v6 = vmax.f32 %v980_v55, 0.0  ;;  %v1010_v7 = vadd.f32 %v2048_v62, %v939_v1  ;;  %v981_v8 = vadd.f32 %v2048_v62, %v910_v2  ;;  %v942_v9 = vld [vmem:[#allocation2 + $0x178] sm:$0xff]  ;;  %v908_v10 = vld [vmem:[#allocation2 + $0x68] sm:$0xff]  ;;  %876 = vst.msk [vmem:[#allocation2 + $0x180] sm:$0xff] %vm19_vm2, %v811_v58  ;;  %v1076_v12 = vmax.f32 %v1012_v63, 0.0 }
 0x103   :  { %1392 = vst.msk [vmem:[%s2427_s3 + $0xa4] sm:$0xf] %vm1350_vm3, %v1589_v54  ;;  %v1042_v13 = vmax.f32 %v978_v0, 0.0  ;;  %v1013_v14 = vadd.f32 %v2048_v62, %v942_v9  ;;  %v979_v15 = vadd.f32 %v2048_v62, %v908_v10  ;;  %v940_v16 = vld [vmem:[#allocation2 + $0x168] sm:$0xff]  ;;  %v138_v22 = vld [vmem:[#allocation2 + $0x1b0] sm:$0xff]  ;;  %v1669_v28 = vpop.f32.mrb[20].mxu0 }
 0x104   :  { %847 = vst.msk [vmem:[#allocation2 + $0x98] sm:$0xff] %vm19_vm2, %v782_v59  ;;  %879 = vst.msk [vmem:[#allocation2 + $0x198] sm:$0xff] %vm19_vm2, %v814_v3  ;;  %v1562_v18 = vpack.c.bf16 %v1044_v6, %v1044_v6  ;;  %v1074_v19 = vmax.f32 %v1010_v7, 0.0  ;;  %v1045_v20 = vmax.f32 %v981_v8, 0.0  ;;  %v1011_v21 = vadd.f32 %v2048_v62, %v940_v16  ;;  %v107_v30 = vld [vmem:[#allocation2 + $0xb8] sm:$0xff]  ;;  %v1701_v35 = vpop.f32.mrb[20].mxu1 }
 0x105   :  { %845 = vst.msk [vmem:[#allocation2 + $0x88] sm:$0xff] %vm19_vm2, %v780_v4  ;;  %877 = vst.msk [vmem:[#allocation2 + $0x188] sm:$0xff] %vm19_vm2, %v812_v11  ;;  %v1594_v24 = vpack.c.bf16 %v1076_v12, %v1076_v12  ;;  %v1560_v25 = vpack.c.bf16 %v1042_v13, %v1042_v13  ;;  %v1077_v26 = vmax.f32 %v1013_v14, 0.0  ;;  %v1043_v27 = vmax.f32 %v979_v15, 0.0  ;;  %v588_v36 = vpop.f32.mrb[21].mxu0  ;;  %v139_v37 = vld [vmem:[#allocation2 + $0x1b8] sm:$0xff] }
 0x106   :  { %1365 = vst.msk [vmem:[%s2427_s3 + $0x38] sm:$0xf] %vm1350_vm3, %v1562_v18  ;;  %v1592_v31 = vpack.c.bf16 %v1074_v19, %v1074_v19  ;;  %v1563_v32 = vpack.c.bf16 %v1045_v20, %v1045_v20  ;;  %v1075_v33 = vmax.f32 %v1011_v21, 0.0  ;;  %v785_v34 = vadd.f32 %v1669_v28, %v106_v17  ;;  %v105_v38 = vld [vmem:[#allocation2 + $0xa8] sm:$0xff]  ;;  %v716_v44 = vpop.f32.mrb[21].mxu1  ;;  %v1670_v45 = vpop.f32.mrb[22].mxu0 }
 0x107   :  { %1397 = vst.msk [vmem:[%s2427_s3 + $0xb8] sm:$0xf] %vm1350_vm3, %v1594_v24  ;;  %1363 = vst.msk [vmem:[%s2427_s3 + $0x30] sm:$0xf] %vm1350_vm3, %v1560_v25  ;;  %v1595_v39 = vpack.c.bf16 %v1077_v26, %v1077_v26  ;;  %v1561_v40 = vpack.c.bf16 %v1043_v27, %v1043_v27  ;;  %v913_v41 = vld [vmem:[#allocation2 + $0x90] sm:$0xff]  ;;  %v817_v42 = vadd.f32 %v1701_v35, %v138_v22  ;;  %v137_v46 = vld [vmem:[#allocation2 + $0x1a8] sm:$0xff] }
 0x108   :  { %v783_v43 = vadd.f32 %v588_v36, %v104_v23  ;;  %1395 = vst.msk [vmem:[%s2427_s3 + $0xb0] sm:$0xf] %vm1350_vm3, %v1592_v31  ;;  %1366 = vst.msk [vmem:[%s2427_s3 + $0x3c] sm:$0xf] %vm1350_vm3, %v1563_v32  ;;  %v1593_v47 = vpack.c.bf16 %v1075_v33, %v1075_v33  ;;  %v984_v48 = vadd.f32 %v2048_v62, %v913_v41  ;;  %v945_v49 = vld [vmem:[#allocation2 + $0x190] sm:$0xff]  ;;  %v1702_v53 = vpop.f32.mrb[22].mxu1 }
 0x109   :  { %v911_v50 = vld [vmem:[#allocation2 + $0x80] sm:$0xff]  ;;  %850 = vst.msk [vmem:[#allocation2 + $0xb0] sm:$0xff] %vm19_vm2, %v785_v34  ;;  %v815_v51 = vadd.f32 %v716_v44, %v136_v29  ;;  %v786_v52 = vadd.f32 %v1670_v45, %v107_v30  ;;  %v591_v54 = vpop.f32.mrb[23].mxu0  ;;  %v1016_v55 = vadd.f32 %v2048_v62, %v945_v49  ;;  %882 = vst.msk [vmem:[#allocation2 + $0x1b0] sm:$0xff] %vm19_vm2, %v817_v42  ;;  %v719_v61 = vpop.f32.mrb[23].mxu1  ;;  %v110_v10 = vld [vmem:[#allocation2 + $0xd0] sm:$0xff] }
 0x10a   :  { %1398 = vst.msk [vmem:[%s2427_s3 + $0xbc] sm:$0xf] %vm1350_vm3, %v1595_v39  ;;  %1364 = vst.msk [vmem:[%s2427_s3 + $0x34] sm:$0xf] %vm1350_vm3, %v1561_v40  ;;  %v982_v56 = vadd.f32 %v2048_v62, %v911_v50  ;;  %v943_v57 = vld [vmem:[#allocation2 + $0x180] sm:$0xff]  ;;  %v818_v59 = vadd.f32 %v1702_v53, %v139_v37  ;;  %v784_v60 = vadd.f32 %v591_v54, %v105_v38  ;;  %v1048_v63 = vmax.f32 %v984_v48, 0.0 }
 0x10b   :  { %v914_v58 = vld [vmem:[#allocation2 + $0x98] sm:$0xff]  ;;  %848 = vst.msk [vmem:[#allocation2 + $0xa0] sm:$0xff] %vm19_vm2, %v783_v43  ;;  %v1014_v0 = vadd.f32 %v2048_v62, %v943_v57  ;;  %880 = vst.msk [vmem:[#allocation2 + $0x1a0] sm:$0xff] %vm19_vm2, %v815_v51  ;;  %v816_v4 = vadd.f32 %v719_v61, %v137_v46  ;;  %v1080_v5 = vmax.f32 %v1016_v55, 0.0  ;;  %v142_v15 = vld [vmem:[#allocation2 + $0x1d0] sm:$0xff]  ;;  %v1673_v21 = vpop.f32.mrb[24].mxu0 }
 0x10c   :  { %1396 = vst.msk [vmem:[%s2427_s3 + $0xb4] sm:$0xf] %vm1350_vm3, %v1593_v47  ;;  %v985_v1 = vadd.f32 %v2048_v62, %v914_v58  ;;  %v946_v2 = vld [vmem:[#allocation2 + $0x198] sm:$0xff]  ;;  %v912_v3 = vld [vmem:[#allocation2 + $0x88] sm:$0xff]  ;;  %v1046_v6 = vmax.f32 %v982_v56, 0.0  ;;  %v1566_v11 = vpack.c.bf16 %v1048_v63, %v1048_v63  ;;  %v108_v16 = vld [vmem:[#allocation2 + $0xc0] sm:$0xff]  ;;  %v789_v27 = vadd.f32 %v1673_v21, %v110_v10 }
 0x10d   :  { %851 = vst.msk [vmem:[#allocation2 + $0xb8] sm:$0xff] %vm19_vm2, %v786_v52  ;;  %v1017_v7 = vadd.f32 %v2048_v62, %v946_v2  ;;  %v983_v8 = vadd.f32 %v2048_v62, %v912_v3  ;;  %v944_v9 = vld [vmem:[#allocation2 + $0x188] sm:$0xff]  ;;  %883 = vst.msk [vmem:[#allocation2 + $0x1b8] sm:$0xff] %vm19_vm2, %v818_v59  ;;  %v1078_v12 = vmax.f32 %v1014_v0, 0.0  ;;  %v1598_v17 = vpack.c.bf16 %v1080_v5, %v1080_v5  ;;  %v140_v22 = vld [vmem:[#allocation2 + $0x1c0] sm:$0xff]  ;;  %v1705_v28 = vpop.f32.mrb[24].mxu1 }
 0x10e   :  { %849 = vst.msk [vmem:[#allocation2 + $0xa8] sm:$0xff] %vm19_vm2, %v784_v60  ;;  %v1049_v13 = vmax.f32 %v985_v1, 0.0  ;;  %v1015_v14 = vadd.f32 %v2048_v62, %v944_v9  ;;  %881 = vst.msk [vmem:[#allocation2 + $0x1a8] sm:$0xff] %vm19_vm2, %v816_v4  ;;  %v1564_v18 = vpack.c.bf16 %v1046_v6, %v1046_v6  ;;  %v111_v23 = vld [vmem:[#allocation2 + $0xd8] sm:$0xff]  ;;  %v604_v29 = vpop.f32.mrb[25].mxu0  ;;  %v109_v31 = vld [vmem:[#allocation2 + $0xc8] sm:$0xff]  ;;  %v821_v35 = vadd.f32 %v1705_v28, %v142_v15 }
 0x10f   :  { %v1081_v19 = vmax.f32 %v1017_v7, 0.0  ;;  %v1047_v20 = vmax.f32 %v983_v8, 0.0  ;;  %1369 = vst.msk [vmem:[%s2427_s3 + $0x48] sm:$0xf] %vm1350_vm3, %v1566_v11  ;;  %v1596_v24 = vpack.c.bf16 %v1078_v12, %v1078_v12  ;;  %v143_v30 = vld [vmem:[#allocation2 + $0x1d8] sm:$0xff]  ;;  %v787_v36 = vadd.f32 %v604_v29, %v108_v16  ;;  %v732_v37 = vpop.f32.mrb[25].mxu1 }
 0x110   :  { %v1567_v25 = vpack.c.bf16 %v1049_v13, %v1049_v13  ;;  %v1079_v26 = vmax.f32 %v1015_v14, 0.0  ;;  %1401 = vst.msk [vmem:[%s2427_s3 + $0xc8] sm:$0xf] %vm1350_vm3, %v1598_v17  ;;  %1367 = vst.msk [vmem:[%s2427_s3 + $0x40] sm:$0xf] %vm1350_vm3, %v1564_v18  ;;  %v917_v34 = vld [vmem:[#allocation2 + $0xb0] sm:$0xff]  ;;  %v819_v44 = vadd.f32 %v732_v37, %v140_v22 }
 0x111   :  { %v1599_v32 = vpack.c.bf16 %v1081_v19, %v1081_v19  ;;  %v1565_v33 = vpack.c.bf16 %v1047_v20, %v1047_v20  ;;  %v1674_v38 = vpop.f32.mrb[26].mxu0  ;;  %v141_v39 = vld [vmem:[#allocation2 + $0x1c8] sm:$0xff]  ;;  %1399 = vst.msk [vmem:[%s2427_s3 + $0xc0] sm:$0xf] %vm1350_vm3, %v1596_v24  ;;  %v988_v41 = vadd.f32 %v2048_v62, %v917_v34  ;;  %v949_v42 = vld [vmem:[#allocation2 + $0x1b0] sm:$0xff]  ;;  %v1706_v46 = vpop.f32.mrb[26].mxu1 }
 0x112   :  { %1370 = vst.msk [vmem:[%s2427_s3 + $0x4c] sm:$0xf] %vm1350_vm3, %v1567_v25  ;;  %v1597_v40 = vpack.c.bf16 %v1079_v26, %v1079_v26  ;;  %v915_v43 = vld [vmem:[#allocation2 + $0xa0] sm:$0xff]  ;;  %v790_v45 = vadd.f32 %v1674_v38, %v111_v23  ;;  %v607_v47 = vpop.f32.mrb[27].mxu0  ;;  %v1020_v48 = vadd.f32 %v2048_v62, %v949_v42  ;;  %v822_v52 = vadd.f32 %v1706_v46, %v143_v30  ;;  %v735_v54 = vpop.f32.mrb[27].mxu1  ;;  %v114_v3 = vld [vmem:[#allocation2 + $0xf0] sm:$0xff] }
 0x113   :  { %854 = vst.msk [vmem:[#allocation2 + $0xd0] sm:$0xff] %vm19_vm2, %v789_v27  ;;  %v986_v49 = vadd.f32 %v2048_v62, %v915_v43  ;;  %v947_v50 = vld [vmem:[#allocation2 + $0x1a0] sm:$0xff]  ;;  %886 = vst.msk [vmem:[#allocation2 + $0x1d0] sm:$0xff] %vm19_vm2, %v821_v35  ;;  %v788_v53 = vadd.f32 %v607_v47, %v109_v31  ;;  %v1052_v55 = vmax.f32 %v988_v41, 0.0  ;;  %v820_v60 = vadd.f32 %v735_v54, %v141_v39  ;;  %v146_v8 = vld [vmem:[#allocation2 + $0x1f0] sm:$0xff]  ;;  %v1677_v14 = vpop.f32.mrb[28].mxu0 }
 0x114   :  { %1402 = vst.msk [vmem:[%s2427_s3 + $0xcc] sm:$0xf] %vm1350_vm3, %v1599_v32  ;;  %1368 = vst.msk [vmem:[%s2427_s3 + $0x44] sm:$0xf] %vm1350_vm3, %v1565_v33  ;;  %v918_v51 = vld [vmem:[#allocation2 + $0xb8] sm:$0xff]  ;;  %v1018_v56 = vadd.f32 %v2048_v62, %v947_v50  ;;  %v1084_v61 = vmax.f32 %v1020_v48, 0.0  ;;  %v793_v20 = vadd.f32 %v1677_v14, %v114_v3 }
 0x115   :  { %852 = vst.msk [vmem:[#allocation2 + $0xc0] sm:$0xff] %vm19_vm2, %v787_v36  ;;  %v989_v57 = vadd.f32 %v2048_v62, %v918_v51  ;;  %v950_v58 = vld [vmem:[#allocation2 + $0x1b8] sm:$0xff]  ;;  %v916_v59 = vld [vmem:[#allocation2 + $0xa8] sm:$0xff]  ;;  %884 = vst.msk [vmem:[#allocation2 + $0x1c0] sm:$0xff] %vm19_vm2, %v819_v44  ;;  %v1050_v63 = vmax.f32 %v986_v49, 0.0  ;;  %v1570_v4 = vpack.c.bf16 %v1052_v55, %v1052_v55  ;;  %v1709_v21 = vpop.f32.mrb[28].mxu1 }
 0x116   :  { %1400 = vst.msk [vmem:[%s2427_s3 + $0xc4] sm:$0xf] %vm1350_vm3, %v1597_v40  ;;  %v1021_v0 = vadd.f32 %v2048_v62, %v950_v58  ;;  %v987_v1 = vadd.f32 %v2048_v62, %v916_v59  ;;  %v948_v2 = vld [vmem:[#allocation2 + $0x1a8] sm:$0xff]  ;;  %v1082_v5 = vmax.f32 %v1018_v56, 0.0  ;;  %v112_v9 = vld [vmem:[#allocation2 + $0xe0] sm:$0xff]  ;;  %v1602_v10 = vpack.c.bf16 %v1084_v61, %v1084_v61  ;;  %v115_v16 = vld [vmem:[#allocation2 + $0xf8] sm:$0xff] }
 0x117   :  { %855 = vst.msk [vmem:[#allocation2 + $0xd8] sm:$0xff] %vm19_vm2, %v790_v45  ;;  %887 = vst.msk [vmem:[#allocation2 + $0x1d8] sm:$0xff] %vm19_vm2, %v822_v52  ;;  %v1053_v6 = vmax.f32 %v989_v57, 0.0  ;;  %v1019_v7 = vadd.f32 %v2048_v62, %v948_v2  ;;  %v1568_v11 = vpack.c.bf16 %v1050_v63, %v1050_v63  ;;  %v144_v15 = vld [vmem:[#allocation2 + $0x1e0] sm:$0xff]  ;;  %v620_v22 = vpop.f32.mrb[29].mxu0  ;;  %v147_v23 = vld [vmem:[#allocation2 + $0x1f8] sm:$0xff]  ;;  %v825_v28 = vadd.f32 %v1709_v21, %v146_v8 }
 0x118   :  { %853 = vst.msk [vmem:[#allocation2 + $0xc8] sm:$0xff] %vm19_vm2, %v788_v53  ;;  %885 = vst.msk [vmem:[#allocation2 + $0x1c8] sm:$0xff] %vm19_vm2, %v820_v60  ;;  %v1085_v12 = vmax.f32 %v1021_v0, 0.0  ;;  %v1051_v13 = vmax.f32 %v987_v1, 0.0  ;;  %v1600_v17 = vpack.c.bf16 %v1082_v5, %v1082_v5  ;;  %v113_v24 = vld [vmem:[#allocation2 + $0xe8] sm:$0xff]  ;;  %v791_v29 = vadd.f32 %v620_v22, %v112_v9  ;;  %v748_v30 = vpop.f32.mrb[29].mxu1 }
 0x119   :  { %1373 = vst.msk [vmem:[%s2427_s3 + $0x58] sm:$0xf] %vm1350_vm3, %v1570_v4  ;;  %v1571_v18 = vpack.c.bf16 %v1053_v6, %v1053_v6  ;;  %v1083_v19 = vmax.f32 %v1019_v7, 0.0  ;;  %1405 = vst.msk [vmem:[%s2427_s3 + $0xd8] sm:$0xf] %vm1350_vm3, %v1602_v10  ;;  %v1678_v31 = vpop.f32.mrb[30].mxu0  ;;  %v823_v37 = vadd.f32 %v748_v30, %v144_v15 }
 0x11a   :  { %1371 = vst.msk [vmem:[%s2427_s3 + $0x50] sm:$0xf] %vm1350_vm3, %v1568_v11  ;;  %v1603_v25 = vpack.c.bf16 %v1085_v12, %v1085_v12  ;;  %v1569_v26 = vpack.c.bf16 %v1051_v13, %v1051_v13  ;;  %v921_v27 = vld [vmem:[#allocation2 + $0xd0] sm:$0xff]  ;;  %v145_v32 = vld [vmem:[#allocation2 + $0x1e8] sm:$0xff]  ;;  %1403 = vst.msk [vmem:[%s2427_s3 + $0xd0] sm:$0xf] %vm1350_vm3, %v1600_v17  ;;  %v794_v38 = vadd.f32 %v1678_v31, %v115_v16 }
 0x11b   :  { %1374 = vst.msk [vmem:[%s2427_s3 + $0x5c] sm:$0xf] %vm1350_vm3, %v1571_v18  ;;  %v1601_v33 = vpack.c.bf16 %v1083_v19, %v1083_v19  ;;  %v992_v34 = vadd.f32 %v2048_v62, %v921_v27  ;;  %v953_v35 = vld [vmem:[#allocation2 + $0x1d0] sm:$0xff]  ;;  %v1710_v39 = vpop.f32.mrb[30].mxu1  ;;  %v623_v40 = vpop.f32.mrb[31].mxu0 }
 0x11c   :  { %v919_v36 = vld [vmem:[#allocation2 + $0xc0] sm:$0xff]  ;;  %858 = vst.msk [vmem:[#allocation2 + $0xf0] sm:$0xff] %vm19_vm2, %v793_v20  ;;  %v1024_v41 = vadd.f32 %v2048_v62, %v953_v35  ;;  %890 = vst.msk [vmem:[#allocation2 + $0x1f0] sm:$0xff] %vm19_vm2, %v825_v28  ;;  %v826_v45 = vadd.f32 %v1710_v39, %v147_v23  ;;  %v792_v46 = vadd.f32 %v623_v40, %v113_v24  ;;  %v751_v47 = vpop.f32.mrb[31].mxu1 }
 0x11d   :  { %1406 = vst.msk [vmem:[%s2427_s3 + $0xdc] sm:$0xf] %vm1350_vm3, %v1603_v25  ;;  %1372 = vst.msk [vmem:[%s2427_s3 + $0x54] sm:$0xf] %vm1350_vm3, %v1569_v26  ;;  %v990_v42 = vadd.f32 %v2048_v62, %v919_v36  ;;  %v951_v43 = vld [vmem:[#allocation2 + $0x1c0] sm:$0xff]  ;;  %v1056_v48 = vmax.f32 %v992_v34, 0.0  ;;  %v824_v53 = vadd.f32 %v751_v47, %v145_v32 }
 0x11e   :  { %v922_v44 = vld [vmem:[#allocation2 + $0xd8] sm:$0xff]  ;;  %856 = vst.msk [vmem:[#allocation2 + $0xe0] sm:$0xff] %vm19_vm2, %v791_v29  ;;  %v1022_v49 = vadd.f32 %v2048_v62, %v951_v43  ;;  %888 = vst.msk [vmem:[#allocation2 + $0x1e0] sm:$0xff] %vm19_vm2, %v823_v37  ;;  %v1088_v54 = vmax.f32 %v1024_v41, 0.0  ;;  %v1748_v19 = vld [vmem:[%s2426_s2] ss:$0 sm:$0xff] }
 0x11f   :  { %1404 = vst.msk [vmem:[%s2427_s3 + $0xd4] sm:$0xf] %vm1350_vm3, %v1601_v33  ;;  %v993_v50 = vadd.f32 %v2048_v62, %v922_v44  ;;  %v954_v51 = vld [vmem:[#allocation2 + $0x1d8] sm:$0xff]  ;;  %v920_v52 = vld [vmem:[#allocation2 + $0xc8] sm:$0xff]  ;;  %v1054_v55 = vmax.f32 %v990_v42, 0.0  ;;  %v1574_v59 = vpack.c.bf16 %v1056_v48, %v1056_v48 }
 0x120   :  { %859 = vst.msk [vmem:[#allocation2 + $0xf8] sm:$0xff] %vm19_vm2, %v794_v38  ;;  %v1025_v56 = vadd.f32 %v2048_v62, %v954_v51  ;;  %v991_v57 = vadd.f32 %v2048_v62, %v920_v52  ;;  %v952_v58 = vld [vmem:[#allocation2 + $0x1c8] sm:$0xff]  ;;  %891 = vst.msk [vmem:[#allocation2 + $0x1f8] sm:$0xff] %vm19_vm2, %v826_v45  ;;  %v1086_v60 = vmax.f32 %v1022_v49, 0.0  ;;  %v1606_v0 = vpack.c.bf16 %v1088_v54, %v1088_v54 }
 0x121   :  { %857 = vst.msk [vmem:[#allocation2 + $0xe8] sm:$0xff] %vm19_vm2, %v792_v46  ;;  %v1057_v61 = vmax.f32 %v993_v50, 0.0  ;;  %v1023_v63 = vadd.f32 %v2048_v62, %v952_v58  ;;  %889 = vst.msk [vmem:[#allocation2 + $0x1e8] sm:$0xff] %vm19_vm2, %v824_v53  ;;  %v1572_v1 = vpack.c.bf16 %v1054_v55, %v1054_v55 }
 0x122   :  { %v1089_v2 = vmax.f32 %v1025_v56, 0.0  ;;  %v1055_v3 = vmax.f32 %v991_v57, 0.0  ;;  %1377 = vst.msk [vmem:[%s2427_s3 + $0x68] sm:$0xf] %vm1350_vm3, %v1574_v59  ;;  %v1604_v4 = vpack.c.bf16 %v1086_v60, %v1086_v60  ;;  %1409 = vst.msk [vmem:[%s2427_s3 + $0xe8] sm:$0xf] %vm1350_vm3, %v1606_v0 }
 0x123   :  { %v1575_v5 = vpack.c.bf16 %v1057_v61, %v1057_v61  ;;  %v1087_v6 = vmax.f32 %v1023_v63, 0.0  ;;  %1375 = vst.msk [vmem:[%s2427_s3 + $0x60] sm:$0xf] %vm1350_vm3, %v1572_v1  ;;  %v925_v9 = vld [vmem:[#allocation2 + $0xf0] sm:$0xff] }
 0x124   :  { %v1607_v7 = vpack.c.bf16 %v1089_v2, %v1089_v2  ;;  %v1573_v8 = vpack.c.bf16 %v1055_v3, %v1055_v3  ;;  %1407 = vst.msk [vmem:[%s2427_s3 + $0xe0] sm:$0xf] %vm1350_vm3, %v1604_v4  ;;  %v996_v11 = vadd.f32 %v2048_v62, %v925_v9  ;;  %v957_v12 = vld [vmem:[#allocation2 + $0x1f0] sm:$0xff] }
 0x125   :  { %1378 = vst.msk [vmem:[%s2427_s3 + $0x6c] sm:$0xf] %vm1350_vm3, %v1575_v5  ;;  %v1605_v10 = vpack.c.bf16 %v1087_v6, %v1087_v6  ;;  %v923_v13 = vld [vmem:[#allocation2 + $0xe0] sm:$0xff]  ;;  %v1028_v14 = vadd.f32 %v2048_v62, %v957_v12 }
 0x126   :  { %1410 = vst.msk [vmem:[%s2427_s3 + $0xec] sm:$0xf] %vm1350_vm3, %v1607_v7  ;;  %1376 = vst.msk [vmem:[%s2427_s3 + $0x64] sm:$0xf] %vm1350_vm3, %v1573_v8  ;;  %v994_v15 = vadd.f32 %v2048_v62, %v923_v13  ;;  %v955_v16 = vld [vmem:[#allocation2 + $0x1e0] sm:$0xff]  ;;  %v1060_v18 = vmax.f32 %v996_v11, 0.0 }
 0x127   :  { %v926_v17 = vld [vmem:[#allocation2 + $0xf8] sm:$0xff]  ;;  %1408 = vst.msk [vmem:[%s2427_s3 + $0xe4] sm:$0xf] %vm1350_vm3, %v1605_v10  ;;  %v1026_v20 = vadd.f32 %v1748_v19, %v955_v16  ;;  %v1092_v24 = vmax.f32 %v1028_v14, 0.0 }
 0x128   :  { %v997_v21 = vadd.f32 %v1748_v19, %v926_v17  ;;  %v958_v22 = vld [vmem:[#allocation2 + $0x1f8] sm:$0xff]  ;;  %v924_v23 = vld [vmem:[#allocation2 + $0xe8] sm:$0xff]  ;;  %v1058_v25 = vmax.f32 %v994_v15, 0.0  ;;  %v1578_v28 = vpack.c.bf16 %v1060_v18, %v1060_v18 }
 0x129   :  { %v1029_v26 = vadd.f32 %v1748_v19, %v958_v22  ;;  %v995_v62 = vadd.f32 %v1748_v19, %v924_v23  ;;  %v956_v27 = vld [vmem:[#allocation2 + $0x1e8] sm:$0xff]  ;;  %v1090_v29 = vmax.f32 %v1026_v20, 0.0  ;;  %v1610_v32 = vpack.c.bf16 %v1092_v24, %v1092_v24 }
 0x12a   :  { %v1061_v30 = vmax.f32 %v997_v21, 0.0  ;;  %v1027_v31 = vadd.f32 %v1748_v19, %v956_v27  ;;  %v1576_v33 = vpack.c.bf16 %v1058_v25, %v1058_v25  ;;  %1381 = vst.msk [vmem:[%s2427_s3 + $0x78] sm:$0xf] %vm1350_vm3, %v1578_v28 }
 0x12b   :  { %v1093_v34 = vmax.f32 %v1029_v26, 0.0  ;;  %v1059_v35 = vmax.f32 %v995_v62, 0.0  ;;  %v1608_v36 = vpack.c.bf16 %v1090_v29, %v1090_v29  ;;  %1413 = vst.msk [vmem:[%s2427_s3 + $0xf8] sm:$0xf] %vm1350_vm3, %v1610_v32 }
 0x12c   :  { %v1579_v37 = vpack.c.bf16 %v1061_v30, %v1061_v30  ;;  %v1091_v38 = vmax.f32 %v1027_v31, 0.0  ;;  %1379 = vst.msk [vmem:[%s2427_s3 + $0x70] sm:$0xf] %vm1350_vm3, %v1576_v33 }
 0x12d   :  { %v1611_v39 = vpack.c.bf16 %v1093_v34, %v1093_v34  ;;  %v1577_v40 = vpack.c.bf16 %v1059_v35, %v1059_v35  ;;  %1411 = vst.msk [vmem:[%s2427_s3 + $0xf0] sm:$0xf] %vm1350_vm3, %v1608_v36 }
 0x12e   :  { %1382 = vst.msk [vmem:[%s2427_s3 + $0x7c] sm:$0xf] %vm1350_vm3, %v1579_v37  ;;  %v1609_v41 = vpack.c.bf16 %v1091_v38, %v1091_v38 }
 0x12f   :  { %1414 = vst.msk [vmem:[%s2427_s3 + $0xfc] sm:$0xf] %vm1350_vm3, %v1611_v39  ;;  %1380 = vst.msk [vmem:[%s2427_s3 + $0x74] sm:$0xf] %vm1350_vm3, %v1577_v40 }
 0x130   :  { %1412 = vst.msk [vmem:[%s2427_s3 + $0xf4] sm:$0xf] %vm1350_vm3, %v1609_v41 }

// kernel: reg_stage_forward.9
= control target key start
LH: loop header
LB: loop body
LE: loop exit
PB: predicated region body
PF: predicated region fallthrough
CT: control target
= control target key end

     0   :  { %vm134_vm0 = vcmask 1043456   ;;  %vm19_vm1 = vcmask 64512   ;;  %v499_v1 = vmov 0.0   ;;  %vm389_vm2 = vcmask 60416   ;;  %s675_s1 = inlined_call_operand.vmem [shape: bf16[8,8], index: 1, kind: input, shape index: {}]   ;;  %s676_s0 = inlined_call_operand.vmem [shape: bf16[128,8], index: 0, kind: input, shape index: {}]   ;;  %s677_s2 = inlined_call_operand.vmem [shape: f32[1,8], index: 2, kind: input, shape index: {}]   ;;  %s678_s3 = inlined_call_operand.vmem [shape: bf16[128,8], index: 3, kind: output, shape index: {}]  }
   0x1   :  { %v68_v0 = vld [vmem:[%s675_s1] sm:$0xf]  ;;  %22 = vst.msk [vmem:[#allocation2 + $0x10] sm:$0xff] %vm19_vm1, %v499_v1  ;;  %20 = vst.msk [vmem:[#allocation2] sm:$0xff] %vm19_vm1, %v499_v1  ;;  %v493_v5 = vld [vmem:[%s676_s0 + $0x8] sm:$0xff]  }
   0x2   :  { %21 = vst.msk [vmem:[#allocation2 + $0x8] sm:$0xff] %vm19_vm1, %v499_v1  ;;  %23 = vst.msk [vmem:[#allocation2 + $0x18] sm:$0xff] %vm19_vm1, %v499_v1  ;;  %488 = vmatprep.subr.msk.bf16.mxu0 %vm134_vm0, %v68_v0  ;;  %489 = vmatprep.subr.msk.bf16.mxu1 %vm134_vm0, %v68_v0  ;;  %v136_v2 = vsel %vm134_vm0, %v68_v0, 0  ;;  %v491_v3 = vld [vmem:[%s676_s0] sm:$0xff]   ;;  %v494_v6 = vld [vmem:[%s676_s0 + $0x28] sm:$0xff]  }
   0x3   :  { %24 = vst.msk [vmem:[#allocation2 + $0x20] sm:$0xff] %vm19_vm1, %v499_v1  ;;  %25 = vst.msk [vmem:[#allocation2 + $0x28] sm:$0xff] %vm19_vm1, %v499_v1  ;;  %469 = vmatpush3.bf16.msra.mxu0 %v136_v2  ;;  %487 = vmatpush3.bf16.msra.mxu1 %v136_v2  ;;  %v492_v4 = vld [vmem:[%s676_s0 + $0x20] sm:$0xff]   ;;  %v495_v7 = vld [vmem:[%s676_s0 + $0x10] sm:$0xff]  }
   0x4   :  { %26 = vst.msk [vmem:[#allocation2 + $0x30] sm:$0xff] %vm19_vm1, %v499_v1  ;;  %27 = vst.msk [vmem:[#allocation2 + $0x38] sm:$0xff] %vm19_vm1, %v499_v1  ;;  %470 = vmatprep.mubr.msk.bf16.mxu0 %vm19_vm1, %v491_v3  ;;  %478 = vmatprep.mubr.msk.bf16.mxu1 %vm19_vm1, %v492_v4  ;;  %v496_v8 = vld [vmem:[%s676_s0 + $0x30] sm:$0xff]   ;;  %v497_v9 = vld [vmem:[%s676_s0 + $0x18] sm:$0xff]  }
   0x5   :  { %28 = vst.msk [vmem:[#allocation2 + $0x40] sm:$0xff] %vm19_vm1, %v499_v1  ;;  %29 = vst.msk [vmem:[#allocation2 + $0x48] sm:$0xff] %vm19_vm1, %v499_v1  ;;  %v498_v10 = vld [vmem:[%s676_s0 + $0x38] sm:$0xff]   ;;  %v585_v38 = vld [vmem:[%s677_s2] ss:$0 sm:$0xff] }
   0x6   :  { %30 = vst.msk [vmem:[#allocation2 + $0x50] sm:$0xff] %vm19_vm1, %v499_v1  ;;  %31 = vst.msk [vmem:[#allocation2 + $0x58] sm:$0xff] %vm19_vm1, %v499_v1  ;;  %471 = vmatmul.mubr.msk.bf16.vlgmr.msra.gmra.mrb[0].mxu0 %vm19_vm1, %v493_v5  ;;  %479 = vmatmul.mubr.msk.bf16.vlgmr.msra.gmra.mrb[0].mxu1 %vm19_vm1, %v494_v6 }
   0x7   :  { %32 = vst.msk [vmem:[#allocation2 + $0x60] sm:$0xff] %vm19_vm1, %v499_v1  ;;  %33 = vst.msk [vmem:[#allocation2 + $0x68] sm:$0xff] %vm19_vm1, %v499_v1  ;;  %474 = vmatprep.mubr.msk.bf16.mxu0 %vm19_vm1, %v495_v7  ;;  %482 = vmatprep.mubr.msk.bf16.mxu1 %vm19_vm1, %v496_v8 }
   0x8   :  { %34 = vst.msk [vmem:[#allocation2 + $0x70] sm:$0xff] %vm19_vm1, %v499_v1  ;;  %35 = vst.msk [vmem:[#allocation2 + $0x78] sm:$0xff] %vm19_vm1, %v499_v1  ;;  %v38_v11 = vld [vmem:[#allocation2 + $0x10] sm:$0xff]  ;;  %v36_v13 = vld [vmem:[#allocation2] sm:$0xff] }
   0x9   :  { %v39_v16 = vld [vmem:[#allocation2 + $0x18] sm:$0xff]  ;;  %v37_v21 = vld [vmem:[#allocation2 + $0x8] sm:$0xff] }
   0xa   :  { %v40_v37 = vld [vmem:[#allocation2 + $0x20] sm:$0xff]  ;;  %v41_v46 = vld [vmem:[#allocation2 + $0x28] sm:$0xff] }
   0xb   :  { %v42_v35 = vld [vmem:[#allocation2 + $0x30] sm:$0xff]  ;;  %v43_v41 = vld [vmem:[#allocation2 + $0x38] sm:$0xff] }
   0xc   :  { %v44_v15 = vld [vmem:[#allocation2 + $0x40] sm:$0xff]  ;;  %v45_v26 = vld [vmem:[#allocation2 + $0x48] sm:$0xff] }
   0xd   :  { %v46_v12 = vld [vmem:[#allocation2 + $0x50] sm:$0xff]  ;;  %v47_v20 = vld [vmem:[#allocation2 + $0x58] sm:$0xff] }
   0xe   :  { %475 = vmatmul.mubr.msk.bf16.gmra.mrb[4].mxu0 %vm19_vm1, %v497_v9  ;;  %483 = vmatmul.mubr.msk.bf16.gmra.mrb[4].mxu1 %vm19_vm1, %v498_v10  ;;  %v48_v40 = vld [vmem:[#allocation2 + $0x60] sm:$0xff]  ;;  %v49_v52 = vld [vmem:[#allocation2 + $0x68] sm:$0xff] }
   0xf   :  { %v50_v36 = vld [vmem:[#allocation2 + $0x70] sm:$0xff]  ;;  %v51_v45 = vld [vmem:[#allocation2 + $0x78] sm:$0xff] }
  0xd9   :  { %v472_v14 = vpop.f32.mrb[0].mxu0  ;;  %v480_v18 = vpop.f32.mrb[0].mxu1 }
  0xda   :  { %v237_v17 = vadd.f32 %v472_v14, %v38_v11  ;;  %v172_v19 = vpop.f32.mrb[1].mxu0  ;;  %v245_v22 = vadd.f32 %v480_v18, %v46_v12  ;;  %v204_v24 = vpop.f32.mrb[1].mxu1 }
  0xdb   :  { %v235_v23 = vadd.f32 %v172_v19, %v36_v13  ;;  %v473_v25 = vpop.f32.mrb[2].mxu0  ;;  %v243_v27 = vadd.f32 %v204_v24, %v44_v15  ;;  %v481_v29 = vpop.f32.mrb[2].mxu1 }
  0xdc   :  { %253 = vst.msk [vmem:[#allocation2 + $0x10] sm:$0xff] %vm19_vm1, %v237_v17  ;;  %v238_v28 = vadd.f32 %v473_v25, %v39_v16  ;;  %v175_v30 = vpop.f32.mrb[3].mxu0  ;;  %261 = vst.msk [vmem:[#allocation2 + $0x50] sm:$0xff] %vm19_vm1, %v245_v22  ;;  %v246_v31 = vadd.f32 %v481_v29, %v47_v20  ;;  %v207_v33 = vpop.f32.mrb[3].mxu1 }
  0xdd   :  { %251 = vst.msk [vmem:[#allocation2] sm:$0xff] %vm19_vm1, %v235_v23  ;;  %v236_v32 = vadd.f32 %v175_v30, %v37_v21  ;;  %259 = vst.msk [vmem:[#allocation2 + $0x40] sm:$0xff] %vm19_vm1, %v243_v27  ;;  %v244_v34 = vadd.f32 %v207_v33, %v45_v26 }
  0xde   :  { %254 = vst.msk [vmem:[#allocation2 + $0x18] sm:$0xff] %vm19_vm1, %v238_v28  ;;  %262 = vst.msk [vmem:[#allocation2 + $0x58] sm:$0xff] %vm19_vm1, %v246_v31 }
  0xdf   :  { %252 = vst.msk [vmem:[#allocation2 + $0x8] sm:$0xff] %vm19_vm1, %v236_v32  ;;  %260 = vst.msk [vmem:[#allocation2 + $0x48] sm:$0xff] %vm19_vm1, %v244_v34 }
  0xe1   :  { %v476_v39 = vpop.f32.mrb[4].mxu0  ;;  %v484_v43 = vpop.f32.mrb[4].mxu1 }
  0xe2   :  { %v241_v42 = vadd.f32 %v476_v39, %v42_v35  ;;  %v188_v44 = vpop.f32.mrb[5].mxu0  ;;  %v249_v48 = vadd.f32 %v484_v43, %v50_v36  ;;  %v220_v50 = vpop.f32.mrb[5].mxu1 }
  0xe3   :  { %v272_v47 = vld [vmem:[#allocation2 + $0x10] sm:$0xff]  ;;  %v239_v49 = vadd.f32 %v188_v44, %v40_v37  ;;  %v477_v51 = vpop.f32.mrb[6].mxu0  ;;  %v247_v56 = vadd.f32 %v220_v50, %v48_v40  ;;  %v485_v58 = vpop.f32.mrb[6].mxu1 }
  0xe4   :  { %v295_v53 = vadd.f32 %v585_v38, %v272_v47  ;;  %v280_v54 = vld [vmem:[#allocation2 + $0x50] sm:$0xff]  ;;  %v270_v55 = vld [vmem:[#allocation2] sm:$0xff]  ;;  %257 = vst.msk [vmem:[#allocation2 + $0x30] sm:$0xff] %vm19_vm1, %v241_v42  ;;  %v242_v57 = vadd.f32 %v477_v51, %v43_v41  ;;  %v191_v59 = vpop.f32.mrb[7].mxu0  ;;  %265 = vst.msk [vmem:[#allocation2 + $0x70] sm:$0xff] %vm19_vm1, %v249_v48  ;;  %v250_v0 = vadd.f32 %v485_v58, %v51_v45  ;;  %v223_v2 = vpop.f32.mrb[7].mxu1 }
  0xe5   :  { %v303_v60 = vadd.f32 %v585_v38, %v280_v54  ;;  %v293_v61 = vadd.f32 %v585_v38, %v270_v55  ;;  %v278_v62 = vld [vmem:[#allocation2 + $0x40] sm:$0xff]  ;;  %v273_v63 = vld [vmem:[#allocation2 + $0x18] sm:$0xff]  ;;  %255 = vst.msk [vmem:[#allocation2 + $0x20] sm:$0xff] %vm19_vm1, %v239_v49  ;;  %v240_v1 = vadd.f32 %v191_v59, %v41_v46  ;;  %263 = vst.msk [vmem:[#allocation2 + $0x60] sm:$0xff] %vm19_vm1, %v247_v56 }
  0xe6   :  { %v311_v3 = vmax.f32 %v295_v53, 0.0  ;;  %v301_v4 = vadd.f32 %v585_v38, %v278_v62  ;;  %v296_v5 = vadd.f32 %v585_v38, %v273_v63  ;;  %v281_v6 = vld [vmem:[#allocation2 + $0x58] sm:$0xff]  ;;  %v271_v7 = vld [vmem:[#allocation2 + $0x8] sm:$0xff]  ;;  %258 = vst.msk [vmem:[#allocation2 + $0x38] sm:$0xff] %vm19_vm1, %v242_v57  ;;  %v248_v8 = vadd.f32 %v223_v2, %v49_v52  ;;  %266 = vst.msk [vmem:[#allocation2 + $0x78] sm:$0xff] %vm19_vm1, %v250_v0 }
  0xe7   :  { %v319_v9 = vmax.f32 %v303_v60, 0.0  ;;  %v309_v10 = vmax.f32 %v293_v61, 0.0  ;;  %v304_v11 = vadd.f32 %v585_v38, %v281_v6  ;;  %v294_v12 = vadd.f32 %v585_v38, %v271_v7  ;;  %v279_v13 = vld [vmem:[#allocation2 + $0x48] sm:$0xff]  ;;  %256 = vst.msk [vmem:[#allocation2 + $0x28] sm:$0xff] %vm19_vm1, %v240_v1 }
  0xe8   :  { %v445_v14 = vpack.c.bf16 %v311_v3, %v311_v3  ;;  %v317_v15 = vmax.f32 %v301_v4, 0.0  ;;  %v312_v16 = vmax.f32 %v296_v5, 0.0  ;;  %v302_v17 = vadd.f32 %v585_v38, %v279_v13  ;;  %264 = vst.msk [vmem:[#allocation2 + $0x68] sm:$0xff] %vm19_vm1, %v248_v8 }
  0xe9   :  { %v453_v18 = vpack.c.bf16 %v319_v9, %v319_v9  ;;  %v443_v19 = vpack.c.bf16 %v309_v10, %v309_v10  ;;  %v320_v20 = vmax.f32 %v304_v11, 0.0  ;;  %v310_v21 = vmax.f32 %v294_v12, 0.0 }
  0xea   :  { %392 = vst.msk [vmem:[%s678_s3 + $0x8] sm:$0xf] %vm389_vm2, %v445_v14  ;;  %v451_v22 = vpack.c.bf16 %v317_v15, %v317_v15  ;;  %v446_v23 = vpack.c.bf16 %v312_v16, %v312_v16  ;;  %v318_v24 = vmax.f32 %v302_v17, 0.0 }
  0xeb   :  { %400 = vst.msk [vmem:[%s678_s3 + $0x28] sm:$0xf] %vm389_vm2, %v453_v18  ;;  %390 = vst.msk [vmem:[%s678_s3] sm:$0xf] %vm389_vm2, %v443_v19  ;;  %v454_v25 = vpack.c.bf16 %v320_v20, %v320_v20  ;;  %v444_v26 = vpack.c.bf16 %v310_v21, %v310_v21  ;;  %v276_v27 = vld [vmem:[#allocation2 + $0x30] sm:$0xff] }
  0xec   :  { %398 = vst.msk [vmem:[%s678_s3 + $0x20] sm:$0xf] %vm389_vm2, %v451_v22  ;;  %393 = vst.msk [vmem:[%s678_s3 + $0xc] sm:$0xf] %vm389_vm2, %v446_v23  ;;  %v452_v28 = vpack.c.bf16 %v318_v24, %v318_v24  ;;  %v299_v29 = vadd.f32 %v585_v38, %v276_v27  ;;  %v284_v30 = vld [vmem:[#allocation2 + $0x70] sm:$0xff]  ;;  %v274_v31 = vld [vmem:[#allocation2 + $0x20] sm:$0xff] }
  0xed   :  { %401 = vst.msk [vmem:[%s678_s3 + $0x2c] sm:$0xf] %vm389_vm2, %v454_v25  ;;  %391 = vst.msk [vmem:[%s678_s3 + $0x4] sm:$0xf] %vm389_vm2, %v444_v26  ;;  %v307_v32 = vadd.f32 %v585_v38, %v284_v30  ;;  %v297_v33 = vadd.f32 %v585_v38, %v274_v31  ;;  %v282_v34 = vld [vmem:[#allocation2 + $0x60] sm:$0xff]  ;;  %v277_v35 = vld [vmem:[#allocation2 + $0x38] sm:$0xff] }
  0xee   :  { %399 = vst.msk [vmem:[%s678_s3 + $0x24] sm:$0xf] %vm389_vm2, %v452_v28  ;;  %v315_v36 = vmax.f32 %v299_v29, 0.0  ;;  %v305_v37 = vadd.f32 %v585_v38, %v282_v34  ;;  %v300_v39 = vadd.f32 %v585_v38, %v277_v35  ;;  %v285_v40 = vld [vmem:[#allocation2 + $0x78] sm:$0xff]  ;;  %v275_v41 = vld [vmem:[#allocation2 + $0x28] sm:$0xff] }
  0xef   :  { %v323_v42 = vmax.f32 %v307_v32, 0.0  ;;  %v313_v43 = vmax.f32 %v297_v33, 0.0  ;;  %v308_v44 = vadd.f32 %v585_v38, %v285_v40  ;;  %v298_v45 = vadd.f32 %v585_v38, %v275_v41  ;;  %v283_v46 = vld [vmem:[#allocation2 + $0x68] sm:$0xff] }
  0xf0   :  { %v449_v47 = vpack.c.bf16 %v315_v36, %v315_v36  ;;  %v321_v48 = vmax.f32 %v305_v37, 0.0  ;;  %v316_v49 = vmax.f32 %v300_v39, 0.0  ;;  %v306_v50 = vadd.f32 %v585_v38, %v283_v46 }
  0xf1   :  { %v457_v51 = vpack.c.bf16 %v323_v42, %v323_v42  ;;  %v447_v52 = vpack.c.bf16 %v313_v43, %v313_v43  ;;  %v324_v53 = vmax.f32 %v308_v44, 0.0  ;;  %v314_v54 = vmax.f32 %v298_v45, 0.0 }
  0xf2   :  { %396 = vst.msk [vmem:[%s678_s3 + $0x18] sm:$0xf] %vm389_vm2, %v449_v47  ;;  %v455_v55 = vpack.c.bf16 %v321_v48, %v321_v48  ;;  %v450_v56 = vpack.c.bf16 %v316_v49, %v316_v49  ;;  %v322_v57 = vmax.f32 %v306_v50, 0.0 }
  0xf3   :  { %404 = vst.msk [vmem:[%s678_s3 + $0x38] sm:$0xf] %vm389_vm2, %v457_v51  ;;  %394 = vst.msk [vmem:[%s678_s3 + $0x10] sm:$0xf] %vm389_vm2, %v447_v52  ;;  %v458_v38 = vpack.c.bf16 %v324_v53, %v324_v53  ;;  %v448_v58 = vpack.c.bf16 %v314_v54, %v314_v54 }
  0xf4   :  { %402 = vst.msk [vmem:[%s678_s3 + $0x30] sm:$0xf] %vm389_vm2, %v455_v55  ;;  %397 = vst.msk [vmem:[%s678_s3 + $0x1c] sm:$0xf] %vm389_vm2, %v450_v56  ;;  %v456_v59 = vpack.c.bf16 %v322_v57, %v322_v57 }
  0xf5   :  { %405 = vst.msk [vmem:[%s678_s3 + $0x3c] sm:$0xf] %vm389_vm2, %v458_v38  ;;  %395 = vst.msk [vmem:[%s678_s3 + $0x14] sm:$0xf] %vm389_vm2, %v448_v58 }
  0xf6   :  { %403 = vst.msk [vmem:[%s678_s3 + $0x34] sm:$0xf] %vm389_vm2, %v456_v59 }

// kernel: reg_stage_forward.8
= control target key start
LH: loop header
LB: loop body
LE: loop exit
PB: predicated region body
PF: predicated region fallthrough
CT: control target
= control target key end

     0   :  { %s1326_s19 = smov 0   ;;  %s1328_s20 = smov 0   ;;  %s1420_s0 = inlined_call_operand.vmem [shape: f32[2,1,8], index: 0, kind: input, shape index: {}]   ;;  %s1421_s1 = inlined_call_operand.vmem [shape: f32[8,1], index: 1, kind: input, shape index: {}]   ;;  %s1422_s2 = inlined_call_operand.<no memory space> [shape: f32[1,1], index: 2, kind: input, shape index: {}]   ;;  %s1423_s3 = inlined_call_operand.vmem [shape: f32[1,8], index: 3, kind: input, shape index: {}]   ;;  %s1424_s4 = inlined_call_operand.vmem [shape: f32[1,8], index: 4, kind: input, shape index: {}]   ;;  %s1425_s5 = inlined_call_operand.vmem [shape: bf16[2,64,8], index: 5, kind: input, shape index: {}]   ;;  %s1426_s6 = inlined_call_operand.vmem [shape: bf16[8,8], index: 6, kind: input, shape index: {}]   ;;  %s1427_s7 = inlined_call_operand.vmem [shape: f32[1,8], index: 7, kind: input, shape index: {}]   ;;  %s1428_s8 = inlined_call_operand.vmem [shape: bf16[2,64,4], index: 8, kind: input, shape index: {}]   ;;  %s1429_s9 = inlined_call_operand.vmem [shape: bf16[4,8], index: 9, kind: input, shape index: {}]   ;;  %s1430_s10 = inlined_call_operand.vmem [shape: f32[1,8], index: 10, kind: input, shape index: {}]   ;;  %s1431_s11 = inlined_call_operand.vmem [shape: bf16[2,64,8], index: 11, kind: output, shape index: {}]  }
   0x1   :  { %v16_v0 = vstv %s1422_s2  ;;  %s1330_s21 = smov 0  }
   0x2   :  { %17 = vst [vmem:[#allocation3] sm:$0x1] %v16_v0 }
   0x3 LB: > { %s35_s2 = sadd.s32 1, %s1255_s20  ;;  %p1082_p0 = scmp.ge.s32.totalorder %s1259_s21, 1  ;;  %s1259_s21 = sphi %s1330_s21, %s23_s21   ;;  %s1255_s20 = sphi %s1328_s20, %s1433_s20   ;;  %s1251_s19 = sphi %s1326_s19, %s1432_s19  }
   0x4   : > { %p37_p1 = scmp.ge.s32.totalorder %s35_s2, 2  ;;  %p385_p2 = scmp.lt.s32.totalorder %s1259_s21, 3 }
   0x6   : > { %s1435_s2 = smov (%p37_p1, %s35_s2), 0  ;;  %p386_p3 = pnand %p1082_p0, %p385_p2 }
   0x7   : > { %v485_v1 = vld [vmem:[%s1421_s1] sm:$0xff] (!%p386_p3)  ;;  %p445_p4 = scmp.lt.s32.totalorder (!%p386_p3), %s1251_s19, 1  ;;  %v1261_v2 = vmov (!%p386_p3), 0.0   ;;  %vm1262_vm0 = vmmov (!%p386_p3), 0   ;;  %vm487_vm1 = vcmask (!%p386_p3), 64512   ;;  %vm568_vm2 = vcmask (!%p386_p3), 1040384  }
   0x8   : > { %389 = sbr.rel (%p386_p3) target bundleno = 731 (0x2db), region = 64  ;;  %1147 = vmatprep.subr.mxu0 (!%p386_p3), %v1261_v2  ;;  %1149 = vmatprep.mubr.msk.f32.mxu0 (!%p386_p3), %vm1262_vm0, %v1261_v2  ;;  %v562_v5 = vld [vmem:[%s1423_s3] sm:$0x1] (!%p386_p3)  ;;  %vm564_vm3 = vcmask (!%p386_p3), 7168   ;;  %vm720_vm4 = vcmask (!%p386_p3), 1043456   ;;  %vm838_vm5 = vcmask (!%p386_p3), 1041408   ;;  %v663_v27 = vlaneseq (!%p386_p3) }
   0x9   : > { %1148 = vmatpush3.msra.mxu0 (!%p386_p3), %v485_v1  ;;  %1152 = vmatprep.subr.mxu1 (!%p386_p3), %v1261_v2  ;;  %v486_v6 = vld [vmem:[#allocation3] sm:$0x1] (!%p386_p3)  ;;  %vm825_vm6 = vcmask (!%p386_p3), 31744   ;;  %v563_v19 = vld [vmem:[%s1424_s4] sm:$0x1] (!%p386_p3)  ;;  %vm648_vm7 = vcmask (!%p386_p3), 57344  }
   0xa   : > { %1154 = vmatprep.mubr.msk.f32.mxu1 (!%p386_p3), %vm1262_vm0, %v1261_v2  ;;  %1153 = vmatpush3.msk.msra.mxu1 (!%p386_p3), %vm568_vm2, %v562_v5  ;;  %v679_v11 = vld [vmem:[%s1426_s6] sm:$0xf] (!%p386_p3)  ;;  %v664_v28 = vshrl.u32 (!%p386_p3), %v663_v27, 7  ;;  %vm955_vm8 = vcmask (!%p386_p3), 60416  }
   0xb   : > { %v797_v12 = vld [vmem:[%s1429_s9] sm:$0x3] (!%p386_p3)  ;;  %1201 = vmatprep.subr.msk.bf16.mxu1 (!%p386_p3), %vm720_vm4, %v679_v11  ;;  %v722_v13 = vsel (!%p386_p3), %vm720_vm4, %v679_v11, 0 }
   0xc   : > { %1202 = vmatprep.subr.msk.bf16.mxu0 (!%p386_p3), %vm838_vm5, %v797_v12  ;;  %v840_v14 = vsel (!%p386_p3), %vm838_vm5, %v797_v12, 0  ;;  %v665_v31 = vsub.s32 (!%p386_p3), 0, %v664_v28  ;;  %v1094_v63 = vld [vmem:[%s1427_s7] ss:$0 sm:$0xff] (!%p386_p3) }
   0xf   : > { %s1437_s19 = smov (!%p445_p4, %s1251_s19), 1 }
  0x10   : > { %s447_s26 = scalar_lea.vmem %s1420_s0, %s1437_s19  ;;  %s1350_s27 = sshll.u32 %s1437_s19, 5 }
  0x11   : > { %s1356_s30 = scalar_lea.vmem %s1428_s8, %s1350_s27  ;;  %v483_v3 = vld [vmem:[%s447_s26] sm:$0x1]  ;;  %s456_s24 = scalar_lea.vmem %s1425_s5, %s1350_s27 }
  0x12   : > { %v484_v4 = vmul.f32 0.015625, %v483_v3  ;;  %v1229_v15 = vld [vmem:[%s1356_s30] sm:$0xff]   ;;  %v1230_v16 = vld [vmem:[%s1356_s30 + $0x8] sm:$0xff]   ;;  %v1231_v17 = vld [vmem:[%s1356_s30 + $0x10] sm:$0xff]   ;;  %s1393_s13 = scalar_lea.vmem %s1431_s11, %s1350_s27 }
  0x13   : > { %v1232_v18 = vld [vmem:[%s1356_s30 + $0x18] sm:$0xff]   ;;  %v650_v33 = vld [vmem:[%s456_s24] sm:$0xf]  ;;  %v651_v35 = vld [vmem:[%s456_s24 + $0x4] sm:$0xf] }
  0x14   : > { %1150 = vmatmul.mubr.msk.f32.vlgmr.msra.gmra.mrb[0].mxu0 %vm487_vm1, %v484_v4  ;;  %v652_v36 = vld [vmem:[%s456_s24 + $0x8] sm:$0xf]  ;;  %v653_v37 = vld [vmem:[%s456_s24 + $0xc] sm:$0xf]  ;;  %v654_v39 = vld [vmem:[%s456_s24 + $0x10] sm:$0xf] }
  0x15   : > { %1168 = vmatpush3.bf16.msra.mxu0 %v840_v14  ;;  %1169 = vmatprep.mubr.msk.bf16.mxu0 %vm825_vm6, %v1229_v15  ;;  %v655_v40 = vld [vmem:[%s456_s24 + $0x14] sm:$0xf]  ;;  %v656_v50 = vld [vmem:[%s456_s24 + $0x18] sm:$0xf]  ;;  %v657_v51 = vld [vmem:[%s456_s24 + $0x1c] sm:$0xf] }
  0x16   : > { %v1103_v4 = vld [vmem:[%s1430_s10] ss:$0 sm:$0xff] }
  0x18   : > { %1170 = vmatmul.mubr.msk.bf16.vlgmr.msra.gmra.mrb[4].mxu0 %vm825_vm6, %v1230_v16 }
  0x19   : > { %1173 = vmatprep.mubr.msk.bf16.mxu0 %vm825_vm6, %v1231_v17 }
  0x20   : > { %1174 = vmatmul.mubr.msk.bf16.gmra.mrb[8].mxu0 %vm825_vm6, %v1232_v18 }
  0xe7   : > { %v557_v7 = vpop.f32.mrb[0].mxu0 }
  0xe8   : > { %v558_v8 = vadd.f32 %v557_v7, %v486_v6  ;;  %v1151_v9 = vpop.f32.mrb[1].mxu0 }
  0xea   : > { %v561_v10 = vmax.f32 %v558_v8, 0.0 }
  0xeb   : > { %v1171_v55 = vpop.f32.mrb[4].mxu0 }
  0xec   : > { %1155 = vmatmul.mubr.msk.f32.vlgmr.msra.gmra.mrb[0].mxu1 %vm564_vm3, %v561_v10  ;;  %v876_v56 = vpop.f32.mrb[5].mxu0 }
  0xed   : > { %1158 = vmatpush3.bf16.msra.mxu1 %v722_v13  ;;  %v1172_v57 = vpop.f32.mrb[6].mxu0 }
  0xee   : > { %v879_v58 = vpop.f32.mrb[7].mxu0 }
  0xf3   : > { %v1175_v59 = vpop.f32.mrb[8].mxu0 }
  0xf4   : > { %v892_v60 = vpop.f32.mrb[9].mxu0 }
  0xf5   : > { %v1176_v61 = vpop.f32.mrb[10].mxu0 }
  0xf6   : > { %v895_v62 = vpop.f32.mrb[11].mxu0 }
 0x1bf   : > { %v638_v20 = vpop.f32.mrb[0].mxu1 }
 0x1c0   : > { %v639_v21 = vadd.f32 %v638_v20, %v563_v19  ;;  %v1156_v22 = vpop.f32.mrb[1].mxu1 }
 0x1c2   : > { %v1092_v23 = vmul.f32 -1.442695, %v639_v21 }
 0x1c4   : > { %1233 = vpow2.f32 %v1092_v23 }
 0x1ce   : > { %v1234_v24 = vpop.eup %1233 }
 0x1cf   : > { %v645_v25 = vadd.f32 1.0, %v1234_v24 }
 0x1d1   : > { %1235 = vrcp.f32 %v645_v25 }
 0x1db   : > { %v1236_v26 = vpop.eup %1235 }
 0x1dc   : > { %649 = vst.msk [vmem:[#allocation2] sm:$0x1] %vm648_vm7, %v1236_v26 }
 0x1e3   : > { %v658_v29 = vld [vmem:[#allocation2] sm:$0x1] }
 0x1e4   : > { %v659_v30 = vpack.c.bf16 %v658_v29, %v658_v29 }
 0x1e6   : > { %v661_v32 = vpack.i.b16 %v659_v30, %v659_v30 }
 0x1e8   : > { %v666_v34 = vrot.slane %v661_v32, %v665_v31 }
 0x1ea   : > { %v1093_v38 = vcombine.low %v666_v34, %v666_v34 }
 0x1ec   : > { %v671_v41 = vmul.bf16 %v1093_v38, %v650_v33  ;;  %v672_v42 = vmul.bf16 %v1093_v38, %v651_v35  ;;  %v673_v43 = vmul.bf16 %v1093_v38, %v652_v36  ;;  %v674_v44 = vmul.bf16 %v1093_v38, %v653_v37 }
 0x1ed   : > { %v675_v45 = vmul.bf16 %v1093_v38, %v654_v39  ;;  %v676_v46 = vmul.bf16 %v1093_v38, %v655_v40  ;;  %v677_v52 = vmul.bf16 %v1093_v38, %v656_v50  ;;  %v678_v53 = vmul.bf16 %v1093_v38, %v657_v51 }
 0x1ee   : > { %v1095_v47 = vcombine.low %v671_v41, %v672_v42  ;;  %v1096_v48 = vcombine.low %v673_v43, %v674_v44 }
 0x1ef   : > { %v1097_v49 = vcombine.low %v675_v45, %v676_v46  ;;  %v1098_v54 = vcombine.low %v677_v52, %v678_v53 }
 0x1f0   : > { %1159 = vmatprep.mubr.msk.bf16.mxu1 %vm487_vm1, %v1095_v47 }
 0x1f1   : > { %1160 = vmatmul.mubr.msk.bf16.vlgmr.msra.gmra.mrb[4].mxu1 %vm487_vm1, %v1096_v48 }
 0x1f2   : > { %1163 = vmatprep.mubr.msk.bf16.mxu1 %vm487_vm1, %v1097_v49 }
 0x1f9   : > { %1164 = vmatmul.mubr.msk.bf16.gmra.mrb[8].mxu1 %vm487_vm1, %v1098_v54 }
 0x2c4   : > { %v1161_v0 = vpop.f32.mrb[4].mxu1 }
 0x2c5   : > { %v767_v1 = vadd.f32 %v1161_v0, %v1094_v63  ;;  %v758_v2 = vpop.f32.mrb[5].mxu1 }
 0x2c6   : > { %v759_v3 = vadd.f32 %v1094_v63, %v758_v2  ;;  %v1162_v5 = vpop.f32.mrb[6].mxu1 }
 0x2c7   : > { %v1178_v6 = vadd.f32 %v1171_v55, %v767_v1  ;;  %v770_v7 = vadd.f32 %v1162_v5, %v1094_v63  ;;  %v761_v8 = vpop.f32.mrb[7].mxu1 }
 0x2c8   : > { %v1181_v9 = vadd.f32 %v876_v56, %v759_v3  ;;  %v762_v10 = vadd.f32 %v1094_v63, %v761_v8 }
 0x2c9   : > { %v1179_v11 = vadd.f32 %v1178_v6, %v1103_v4  ;;  %v1184_v12 = vadd.f32 %v1103_v4, %v770_v7 }
 0x2ca   : > { %v1182_v13 = vadd.f32 %v1181_v9, %v1103_v4  ;;  %v1187_v14 = vadd.f32 %v1103_v4, %v762_v10 }
 0x2cb   : > { %v917_v15 = vmax.f32 %v1179_v11, 0.0  ;;  %v1185_v16 = vadd.f32 %v1184_v12, %v1172_v57 }
 0x2cc   : > { %v915_v17 = vmax.f32 %v1182_v13, 0.0  ;;  %v1188_v18 = vadd.f32 %v1187_v14, %v879_v58  ;;  %v1165_v19 = vpop.f32.mrb[8].mxu1 }
 0x2cd   : > { %v1127_v20 = vpack.c.bf16 %v917_v15, %v917_v15  ;;  %v918_v21 = vmax.f32 %v1185_v16, 0.0  ;;  %v783_v22 = vadd.f32 %v1165_v19, %v1094_v63  ;;  %v774_v23 = vpop.f32.mrb[9].mxu1 }
 0x2ce   : > { %v1125_v24 = vpack.c.bf16 %v915_v17, %v915_v17  ;;  %v916_v25 = vmax.f32 %v1188_v18, 0.0  ;;  %v775_v26 = vadd.f32 %v1094_v63, %v774_v23  ;;  %v1166_v27 = vpop.f32.mrb[10].mxu1 }
 0x2cf   : > { %958 = vst.msk [vmem:[%s1393_s13 + $0x8] sm:$0xf] %vm955_vm8, %v1127_v20  ;;  %v1128_v28 = vpack.c.bf16 %v918_v21, %v918_v21  ;;  %v1190_v29 = vadd.f32 %v1103_v4, %v783_v22  ;;  %v786_v30 = vadd.f32 %v1166_v27, %v1094_v63  ;;  %v777_v31 = vpop.f32.mrb[11].mxu1 }
 0x2d0   : > { %956 = vst.msk [vmem:[%s1393_s13] sm:$0xf] %vm955_vm8, %v1125_v24  ;;  %v1126_v32 = vpack.c.bf16 %v916_v25, %v916_v25  ;;  %v1193_v33 = vadd.f32 %v1103_v4, %v775_v26  ;;  %v778_v34 = vadd.f32 %v1094_v63, %v777_v31 }
 0x2d1   : > { %959 = vst.msk [vmem:[%s1393_s13 + $0xc] sm:$0xf] %vm955_vm8, %v1128_v28  ;;  %v1191_v35 = vadd.f32 %v1190_v29, %v1175_v59  ;;  %v1196_v36 = vadd.f32 %v1103_v4, %v786_v30 }
 0x2d2   : > { %957 = vst.msk [vmem:[%s1393_s13 + $0x4] sm:$0xf] %vm955_vm8, %v1126_v32  ;;  %v1194_v37 = vadd.f32 %v1193_v33, %v892_v60  ;;  %v1199_v38 = vadd.f32 %v1103_v4, %v778_v34 }
 0x2d3   : > { %v921_v39 = vmax.f32 %v1191_v35, 0.0  ;;  %v1197_v40 = vadd.f32 %v1196_v36, %v1176_v61 }
 0x2d4   : > { %v919_v41 = vmax.f32 %v1194_v37, 0.0  ;;  %v1200_v42 = vadd.f32 %v1199_v38, %v895_v62 }
 0x2d5   : > { %v1131_v43 = vpack.c.bf16 %v921_v39, %v921_v39  ;;  %v922_v44 = vmax.f32 %v1197_v40, 0.0 }
 0x2d6   : > { %v1129_v45 = vpack.c.bf16 %v919_v41, %v919_v41  ;;  %v920_v46 = vmax.f32 %v1200_v42, 0.0 }
 0x2d7   : > { %962 = vst.msk [vmem:[%s1393_s13 + $0x18] sm:$0xf] %vm955_vm8, %v1131_v43  ;;  %v1132_v47 = vpack.c.bf16 %v922_v44, %v922_v44 }
 0x2d8   : > { %960 = vst.msk [vmem:[%s1393_s13 + $0x10] sm:$0xf] %vm955_vm8, %v1129_v45  ;;  %v1130_v48 = vpack.c.bf16 %v920_v46, %v920_v46 }
 0x2d9   : > { %963 = vst.msk [vmem:[%s1393_s13 + $0x1c] sm:$0xf] %vm955_vm8, %v1132_v47 }
 0x2da   : > { %961 = vst.msk [vmem:[%s1393_s13 + $0x14] sm:$0xf] %vm955_vm8, %v1130_v48 }
 0x2db PF: > { %s23_s21 = sadd.s32 1, %s1259_s21   ;;  %s1432_s19 = smov %s1255_s20 }
 0x2dc   : > { %p20_p5 = scmp.ge.s32.totalorder %s23_s21, 4   ;;  %s1433_s20 = smov %s1435_s2 }
 0x2de   :  { %22 = sbr.rel (!%p20_p5) target bundleno = 3 (0x3), region = 104 }

// kernel: reg_stage_forward.7
= control target key start
LH: loop header
LB: loop body
LE: loop exit
PB: predicated region body
PF: predicated region fallthrough
CT: control target
= control target key end

     0   :  { %s1703_s15 = smov 0   ;;  %s1705_s16 = smov 0   ;;  %s2077_s0 = inlined_call_operand.vmem [shape: bf16[2,4,9,9,8], index: 0, kind: input, shape index: {}]   ;;  %s2078_s1 = inlined_call_operand.vmem [shape: bf16[1,72,8], index: 1, kind: input, shape index: {}]   ;;  %s2079_s2 = inlined_call_operand.vmem [shape: f32[1,8], index: 2, kind: input, shape index: {}]   ;;  %s2080_s3 = inlined_call_operand.vmem [shape: bf16[2,64,8], index: 3, kind: output, shape index: {0}]   ;;  %s2081_s4 = inlined_call_operand.vmem [shape: f32[2,1,8], index: 4, kind: output, shape index: {1}]  }
   0x1   :  { %s1707_s17 = smov 0  }
   0x2 LB: > { %s30_s18 = sadd.s32 1, %s1663_s16  ;;  %p1418_p0 = scmp.ge.s32.totalorder %s1667_s17, 1  ;;  %s1667_s17 = sphi %s1707_s17, %s15_s17   ;;  %s1663_s16 = sphi %s1705_s16, %s2085_s16   ;;  %s1659_s15 = sphi %s1703_s15, %s2084_s15  }
   0x3   : > { %p32_p1 = scmp.ge.s32.totalorder %s30_s18, 2  ;;  %p213_p2 = scmp.lt.s32.totalorder %s1667_s17, 3 }
   0x5   : > { %s2087_s18 = smov (%p32_p1, %s30_s18), 0  ;;  %p214_p3 = pnand %p1418_p0, %p213_p2 }
   0x6   : > { %p263_p4 = scmp.lt.s32.totalorder (!%p214_p3), %s1659_s15, 1  ;;  %s1669_s23 = smov (!%p214_p3), 8   ;;  %vm330_vm0 = vsmask.f32 (!%p214_p3), 3328  ;;  %vm331_vm1 = vsmask.f32 (!%p214_p3), 7440 }
   0x7   : > { %217 = sbr.rel (%p214_p3) target bundleno = 446 (0x1be), region = 32  ;;  %s1670_s24 = smov (!%p214_p3), 24   ;;  %vm1772_vm2 = vmor (!%p214_p3), %vm330_vm0, %vm331_vm1  ;;  %v1638_v62 = vld [vmem:[%s2078_s1] sm:$0xff] (!%p214_p3)   ;;  %vm1078_vm3 = vcmask (!%p214_p3), 1043456   ;;  %vm950_vm4 = vcmask (!%p214_p3), 64512   ;;  %vm963_vm5 = vcmask (!%p214_p3), 130048  }
   0x8   : > { %s1671_s25 = smov (!%p214_p3), 32   ;;  %1552 = vmatprep.subr.bf16.mxu0 (!%p214_p3), %v1638_v62  ;;  %1570 = vmatprep.subr.bf16.mxu1 (!%p214_p3), %v1638_v62  ;;  %s1672_s30 = smov (!%p214_p3), 16   ;;  %vm972_vm6 = vcmask (!%p214_p3), 195584   ;;  %vm981_vm7 = vcmask (!%p214_p3), 261120   ;;  %vm990_vm8 = vcmask (!%p214_p3), 326656   ;;  %vm999_vm9 = vcmask (!%p214_p3), 392192  }
   0x9   : > { %1553 = vmatpush3.bf16.msra.mxu0 (!%p214_p3), %v1638_v62  ;;  %1575 = vmatpush3.bf16.msra.mxu1 (!%p214_p3), %v1638_v62  ;;  %s1673_s9 = smov (!%p214_p3), 40   ;;  %s1674_s10 = smov (!%p214_p3), 48   ;;  %vm1008_vm10 = vcmask (!%p214_p3), 457728   ;;  %vm1017_vm11 = vcmask (!%p214_p3), 523264   ;;  %vm1069_vm12 = vcmask (!%p214_p3), 588800   ;;  %vm1221_vm13 = vcmask (!%p214_p3), 57344  }
   0xa   : > { %s1675_s11 = smov (!%p214_p3), 56   ;;  %s1676_s12 = smov (!%p214_p3), 64   ;;  %vm1187_vm14 = vcmask (!%p214_p3), 60416  }
   0xe   : > { %s2089_s15 = smov (!%p263_p4, %s1659_s15), 1 }
   0xf   : > { %s1582_s19 = smul.u32 288, %s2089_s15  ;;  %s2028_s21 = scalar_lea.vmem %s2081_s4, %s2089_s15 }
  0x11   : > { %s1727_s22 = scalar_lea.vmem %s2077_s0, %s1582_s19 }
  0x12   : > { %v1616_v0 = vld [vmem:[%s1727_s22 + $0x48] ss:$8 sps:$4 sm:$0xff]   ;;  %v1432_v1 = vld [vmem:[%s1727_s22 + $0xa0] sm:$0xf]  ;;  %v1431_v16 = vld [vmem:[%s1727_s22 + $0x98] sm:$0xf] }
  0x13   : > { %v1433_v2 = vld [vmem:[%s1727_s22 + $0xa8] sm:$0xf]  ;;  %770 = vrot.lane.b32.xlu0 %v1616_v0, %s1669_s23  ;;  %v504_v6 = vshrl.u32 %v1432_v1, 16  ;;  %v507_v7 = vshll.u32 %v1432_v1, 16  ;;  %v1618_v8 = vld [vmem:[%s1727_s22 + $0x58] ss:$8 sps:$4 sm:$0xff]  }
  0x14   : > { %v518_v3 = vshrl.u32 %v1433_v2, 16  ;;  %v521_v4 = vshll.u32 %v1433_v2, 16  ;;  %v1491_v5 = vcombine.low %v1432_v1, %v1433_v2  ;;  %v1619_v13 = vld [vmem:[%s1727_s22 + $0xe8] ss:$8 sps:$4 sm:$0xff]   ;;  %v1740_v19 = vld [vmem:[%s1727_s22] sm:$0xf] }
  0x15   : > { %v506_v11 = vrot.slane %v504_v6, 4  ;;  %v509_v12 = vrot.slane %v507_v7, 5  ;;  %v1430_v14 = vld [vmem:[%s1727_s22 + $0x90] sm:$0xf]  ;;  %v490_v21 = vshrl.u32 %v1431_v16, 16  ;;  %v493_v22 = vshll.u32 %v1431_v16, 16 }
  0x16   : > { %v520_v9 = vrot.slane %v518_v3, 4  ;;  %v523_v10 = vrot.slane %v521_v4, 5  ;;  %820 = vrot.lane.b32.xlu1 %v1491_v5, %s1670_s24  ;;  %v476_v17 = vshrl.u32 %v1430_v14, 16  ;;  %v479_v18 = vshll.u32 %v1430_v14, 16  ;;  %v1743_v24 = vld [vmem:[%s1727_s22 + $0x8] sm:$0xf] }
  0x17   : > { %772 = vrot.lane.b32.xlu0 %v1618_v8, %s1669_s23  ;;  %v510_v20 = vor.u32 %v509_v12, %v506_v11  ;;  %v1490_v23 = vcombine.low %v1430_v14, %v1431_v16  ;;  %v322_v25 = vld [vmem:[%s1727_s22 + $0x4] sm:$0x1]  ;;  %v323_v29 = vld [vmem:[%s1727_s22 + $0xc] sm:$0x1]  ;;  %v334_v30 = vshrl.u32 %v1740_v19, 16  ;;  %v492_v32 = vrot.slane %v490_v21, 4 }
  0x18   : > { %v524_v15 = vor.u32 %v523_v10, %v520_v9  ;;  %v478_v27 = vrot.slane %v476_v17, 4  ;;  %v481_v28 = vrot.slane %v479_v18, 5  ;;  %v495_v33 = vrot.slane %v493_v22, 5  ;;  %v1621_v41 = vld [vmem:[%s1727_s22 + $0xd8] ss:$8 sps:$4 sm:$0xff]  }
  0x19   : > { %v1751_v31 = vrot.slane %v510_v20, 4  ;;  %v337_v34 = vshll.u32 %v1740_v19, 16  ;;  %v336_v35 = vrot.slane %v334_v30, 4  ;;  %v343_v36 = vshll.u32 %v322_v25, 16  ;;  %v1759_v42 = vld [vmem:[%s1727_s22 + $0x10] sm:$0xf] }
  0x1a   : > { %v1746_v26 = vrot.slane %v524_v15, 4  ;;  %848 = vrot.lane.b32.xlu1 %v1619_v13, %s1671_s25  ;;  %v348_v37 = vshrl.u32 %v1743_v24, 16  ;;  %v351_v38 = vshll.u32 %v1743_v24, 16  ;;  %v357_v40 = vshll.u32 %v323_v29, 16  ;;  %v1762_v48 = vld [vmem:[%s1727_s22 + $0x18] sm:$0xf] }
  0x1b   : > { %818 = vrot.lane.b32.xlu0 %v1490_v23, %s1670_s24  ;;  %v339_v39 = vrot.slane %v337_v34, 5  ;;  %v482_v43 = vor.u32 %v481_v28, %v478_v27  ;;  %v496_v44 = vor.u32 %v495_v33, %v492_v32  ;;  %v345_v45 = vrot.slane %v343_v36, 5  ;;  %v324_v52 = vld [vmem:[%s1727_s22 + $0x14] sm:$0x1]  ;;  %v325_v53 = vld [vmem:[%s1727_s22 + $0x1c] sm:$0x1] }
  0x1c   : > { %v350_v46 = vrot.slane %v348_v37, 4  ;;  %v353_v47 = vrot.slane %v351_v38, 5  ;;  %v362_v49 = vshrl.u32 %v1759_v42, 16  ;;  %v359_v51 = vrot.slane %v357_v40, 5  ;;  %v1446_v61 = vld [vmem:[%s1727_s22 + $0x94] sm:$0x1] }
  0x1d   : > { %v340_v50 = vor.u32 %v339_v39, %v336_v35  ;;  %v365_v54 = vshll.u32 %v1759_v42, 16  ;;  %v1478_v55 = vcombine.low %v1740_v19, %v1743_v24  ;;  %v371_v59 = vshll.u32 %v324_v52, 16  ;;  %v1447_v3 = vld [vmem:[%s1727_s22 + $0x9c] sm:$0x1]  ;;  %v1448_v8 = vld [vmem:[%s1727_s22 + $0xa4] sm:$0x1] }
  0x1e   : > { %v354_v57 = vor.u32 %v353_v47, %v350_v46  ;;  %v364_v58 = vrot.slane %v362_v49, 4  ;;  %v376_v60 = vshrl.u32 %v1762_v48, 16  ;;  %v379_v1 = vshll.u32 %v1762_v48, 16  ;;  %v1449_v13 = vld [vmem:[%s1727_s22 + $0xac] sm:$0x1]  ;;  %v1640_v37 = vld [vmem:[%s2078_s1 + $0x10] sm:$0xff]  }
  0x1f   : > { %846 = vrot.lane.b32.xlu0 %v1621_v41, %s1671_s25  ;;  %v341_v63 = vrot.slane %v340_v50, 4  ;;  %v367_v0 = vrot.slane %v365_v54, 5  ;;  %v385_v2 = vshll.u32 %v325_v53, 16  ;;  %v373_v5 = vrot.slane %v371_v59, 5  ;;  %v1789_v14 = vld [vmem:[%s1727_s22 + $0x8] sm:$0xf] }
  0x20   : > { %v355_v4 = vrot.slane %v354_v57, 4  ;;  %v378_v6 = vrot.slane %v376_v60, 4  ;;  %v483_v7 = vrot.slane %v482_v43, 4  ;;  %v381_v11 = vrot.slane %v379_v1, 5  ;;  %v1639_v20 = vld [vmem:[%s2078_s1 + $0x8] sm:$0xff]   ;;  %v1641_v50 = vld [vmem:[%s2078_s1 + $0x18] sm:$0xff]  }
  0x21   : > { %v346_v9 = vsel %vm1772_vm2, %v341_v63, %v345_v45  ;;  %v368_v10 = vor.u32 %v367_v0, %v364_v58  ;;  %v387_v12 = vrot.slane %v385_v2, 5  ;;  %v485_v16 = vshll.u32 %v1446_v61, 16  ;;  %v1455_v27 = vld [vmem:[%s1727_s22 + $0x10] sm:$0xf]  ;;  %1554 = vmatprep.subr.bf16.mxu0 %v1639_v20  ;;  %1571 = vmatprep.subr.bf16.mxu1 %v1639_v20  ;;  %v1810_v43 = vld [vmem:[%s1727_s22 + $0x18] sm:$0xf] }
  0x22   : > { %v360_v15 = vsel %vm1772_vm2, %v355_v4, %v359_v51  ;;  %v497_v17 = vrot.slane %v496_v44, 4  ;;  %v499_v18 = vshll.u32 %v1447_v3, 16  ;;  %v382_v23 = vor.u32 %v381_v11, %v378_v6  ;;  %1555 = vmatpush3.bf16.msra.mxu0 %v1639_v20  ;;  %1576 = vmatpush3.bf16.msra.mxu1 %v1639_v20  ;;  %v1818_v49 = vld [vmem:[%s1727_s22 + $0x20] sm:$0xf]  ;;  %v1470_v57 = vld [vmem:[%s1727_s22 + $0xc] sm:$0x1] }
  0x23   : > { %v1486_v21 = vcombine.low %v346_v9, %v360_v15  ;;  %v369_v22 = vrot.slane %v368_v10, 4  ;;  %v513_v25 = vshll.u32 %v1448_v8, 16  ;;  %v487_v28 = vrot.slane %v485_v16, 5  ;;  %1556 = vmatprep.subr.bf16.mxu0 %v1640_v37  ;;  %1572 = vmatprep.subr.bf16.mxu1 %v1640_v37  ;;  %v1471_v0 = vld [vmem:[%s1727_s22 + $0x14] sm:$0x1] }
  0x24   : > { %v501_v29 = vrot.slane %v499_v18, 5  ;;  %v527_v30 = vshll.u32 %v1449_v13, 16  ;;  %v619_v32 = vshrl.u32 %v1789_v14, 16  ;;  %v383_v34 = vrot.slane %v382_v23, 4  ;;  %v1624_v4 = vld [vmem:[%s1727_s22 + $0x50] ss:$8 sps:$4 sm:$0xff]  }
  0x25   : > { %790 = vrot.lane.b32.xlu1 %v1486_v21, %s1672_s30  ;;  %v374_v33 = vsel %vm1772_vm2, %v369_v22, %v373_v5  ;;  %v515_v35 = vrot.slane %v513_v25, 5  ;;  %v622_v36 = vshll.u32 %v1789_v14, 16  ;;  %v488_v38 = vsel %vm1772_vm2, %v483_v7, %v487_v28  ;;  %v1472_v6 = vld [vmem:[%s1727_s22 + $0x1c] sm:$0x1]  ;;  %v1473_v7 = vld [vmem:[%s1727_s22 + $0x24] sm:$0x1] }
  0x26   : > { %v502_v39 = vsel %vm1772_vm2, %v497_v17, %v501_v29  ;;  %v529_v40 = vrot.slane %v527_v30, 5  ;;  %v621_v41 = vrot.slane %v619_v32, 4  ;;  %v388_v44 = vsel %vm1772_vm2, %v383_v34, %v387_v12  ;;  %1557 = vmatpush3.bf16.msra.mxu0 %v1640_v37  ;;  %1577 = vmatpush3.bf16.msra.mxu1 %v1640_v37  ;;  %v1843_v25 = vld [vmem:[%s1727_s22 + $0x20] sm:$0xf]  ;;  %v1850_v32 = vld [vmem:[%s1727_s22 + $0x28] sm:$0xf] }
  0x27   : > { %v1498_v45 = vcombine.low %v488_v38, %v502_v39  ;;  %v516_v46 = vsel %vm1772_vm2, %v1751_v31, %v515_v35  ;;  %v624_v47 = vrot.slane %v622_v36, 5  ;;  %v1487_v51 = vcombine.low %v374_v33, %v388_v44  ;;  %1558 = vmatprep.subr.bf16.mxu0 %v1641_v50  ;;  %1573 = vmatprep.subr.bf16.mxu1 %v1641_v50  ;;  %v326_v33 = vld [vmem:[%s1727_s22 + $0x24] sm:$0x1]  ;;  %v327_v36 = vld [vmem:[%s1727_s22 + $0x2c] sm:$0x1] }
  0x28   : > { %v530_v52 = vsel %vm1772_vm2, %v1746_v26, %v529_v40  ;;  %v633_v53 = vshrl.u32 %v1455_v27, 16  ;;  %v636_v54 = vshll.u32 %v1455_v27, 16  ;;  %v1502_v58 = vcombine.low %v1789_v14, %v1455_v27  ;;  %v1862_v39 = vld [vmem:[%s1727_s22 + $0x30] sm:$0xf]  ;;  %v1625_v40 = vld [vmem:[%s1727_s22 + $0x60] ss:$8 sps:$4 sm:$0xff]  }
  0x29   : > { %866 = vrot.lane.b32.xlu0 %v1498_v45, %s1673_s9  ;;  %v1499_v31 = vcombine.low %v516_v46, %v530_v52  ;;  %v647_v59 = vshrl.u32 %v1810_v43, 16  ;;  %v650_v60 = vshll.u32 %v1810_v43, 16  ;;  %792 = vrot.lane.b32.xlu1 %v1487_v51, %s1672_s30  ;;  %v661_v62 = vshrl.u32 %v1818_v49, 16  ;;  %v328_v46 = vld [vmem:[%s1727_s22 + $0x34] sm:$0x1] }
  0x2a   : > { %v635_v26 = vrot.slane %v633_v53, 4  ;;  %v638_v61 = vrot.slane %v636_v54, 5  ;;  %v664_v63 = vshll.u32 %v1818_v49, 16  ;;  %v1503_v3 = vcombine.low %v1810_v43, %v1818_v49  ;;  %1559 = vmatpush3.bf16.msra.mxu0 %v1641_v50  ;;  %1578 = vmatpush3.bf16.msra.mxu1 %v1641_v50  ;;  %v1872_v52 = vld [vmem:[%s1727_s22 + $0x38] sm:$0xf] }
  0x2b   : > { %v649_v1 = vrot.slane %v647_v59, 4  ;;  %v652_v2 = vrot.slane %v650_v60, 5  ;;  %v625_v5 = vor.u32 %v624_v47, %v621_v41  ;;  %v663_v8 = vrot.slane %v661_v62, 4  ;;  %v1879_v62 = vld [vmem:[%s1727_s22 + $0xb0] sm:$0xf] }
  0x2c   : > { %v666_v9 = vrot.slane %v664_v63, 5  ;;  %v628_v10 = vshll.u32 %v1470_v57, 16  ;;  %v639_v11 = vor.u32 %v638_v61, %v635_v26  ;;  %v642_v13 = vshll.u32 %v1471_v0, 16  ;;  %v1626_v63 = vld [vmem:[%s1727_s22 + $0x68] ss:$8 sps:$4 sm:$0xff]  }
  0x2d   : > { %894 = vrot.lane.b32.xlu0 %v1502_v58, %s1674_s10  ;;  %v626_v12 = vrot.slane %v625_v5, 4  ;;  %v653_v14 = vor.u32 %v652_v2, %v649_v1  ;;  %v656_v15 = vshll.u32 %v1472_v6, 16  ;;  %868 = vrot.lane.b32.xlu1 %v1499_v31, %s1673_s9  ;;  %v670_v20 = vshll.u32 %v1473_v7, 16  ;;  %v329_v31 = vld [vmem:[%s1727_s22 + $0x3c] sm:$0x1] }
  0x2e   : > { %v630_v16 = vrot.slane %v628_v10, 5  ;;  %v640_v17 = vrot.slane %v639_v11, 4  ;;  %v667_v18 = vor.u32 %v666_v9, %v663_v8  ;;  %v644_v21 = vrot.slane %v642_v13, 5  ;;  %v1435_v8 = vld [vmem:[%s1727_s22 + $0xb8] sm:$0xf] }
  0x2f   : > { %v654_v22 = vrot.slane %v653_v14, 4  ;;  %v658_v23 = vrot.slane %v656_v15, 5  ;;  %v1479_v27 = vcombine.low %v1759_v42, %v1762_v48  ;;  %v672_v30 = vrot.slane %v670_v20, 5  ;;  %v1627_v9 = vld [vmem:[%s1727_s22 + $0x78] ss:$8 sps:$4 sm:$0xff]  }
  0x30   : > { %v631_v28 = vsel %vm1772_vm2, %v626_v12, %v630_v16  ;;  %v668_v29 = vrot.slane %v667_v18, 4  ;;  %v645_v34 = vsel %vm1772_vm2, %v640_v17, %v644_v21  ;;  %v390_v37 = vshrl.u32 %v1843_v25, 16  ;;  %v1889_v14 = vld [vmem:[%s1727_s22 + $0xc0] sm:$0xf]  ;;  %v1896_v20 = vld [vmem:[%s1727_s22 + $0xc8] sm:$0xf] }
  0x31   : > { %922 = vrot.lane.b32.xlu0 %v1624_v4, %s1675_s11  ;;  %v659_v35 = vsel %vm1772_vm2, %v654_v22, %v658_v23  ;;  %v393_v38 = vshll.u32 %v1843_v25, 16  ;;  %896 = vrot.lane.b32.xlu1 %v1503_v3, %s1674_s10  ;;  %v1510_v41 = vcombine.low %v631_v28, %v645_v34  ;;  %v399_v44 = vshll.u32 %v326_v33, 16 }
  0x32   : > { %v673_v43 = vsel %vm1772_vm2, %v668_v29, %v672_v30  ;;  %v404_v45 = vshrl.u32 %v1850_v32, 16  ;;  %v392_v49 = vrot.slane %v390_v37, 4  ;;  %v407_v51 = vshll.u32 %v1850_v32, 16 }
  0x33   : > { %v1511_v47 = vcombine.low %v659_v35, %v673_v43  ;;  %v395_v50 = vrot.slane %v393_v38, 5  ;;  %v401_v53 = vrot.slane %v399_v44, 5  ;;  %v413_v57 = vshll.u32 %v327_v36, 16 }
  0x34   : > { %v406_v54 = vrot.slane %v404_v45, 4  ;;  %v418_v58 = vshrl.u32 %v1862_v39, 16  ;;  %v409_v60 = vrot.slane %v407_v51, 5  ;;  %v421_v26 = vshll.u32 %v1862_v39, 16  ;;  %v1450_v45 = vld [vmem:[%s1727_s22 + $0xb4] sm:$0x1] }
  0x35   : > { %942 = vrot.lane.b32.xlu0 %v1510_v41, %s1676_s12  ;;  %v396_v59 = vor.u32 %v395_v50, %v392_v49  ;;  %v427_v61 = vshll.u32 %v328_v46, 16  ;;  %924 = vrot.lane.b32.xlu1 %v1625_v40, %s1675_s11  ;;  %v415_v0 = vrot.slane %v413_v57, 5  ;;  %v432_v2 = vshrl.u32 %v1872_v52, 16  ;;  %v1451_v51 = vld [vmem:[%s1727_s22 + $0xbc] sm:$0x1] }
  0x36   : > { %v420_v1 = vrot.slane %v418_v58, 4  ;;  %v435_v3 = vshll.u32 %v1872_v52, 16  ;;  %v410_v5 = vor.u32 %v409_v60, %v406_v54  ;;  %v423_v6 = vrot.slane %v421_v26, 5 }
  0x37   : > { %v397_v4 = vrot.slane %v396_v59, 4  ;;  %v429_v7 = vrot.slane %v427_v61, 5  ;;  %v434_v10 = vrot.slane %v432_v2, 4  ;;  %v441_v12 = vshll.u32 %v329_v31, 16  ;;  %v1453_v59 = vld [vmem:[%s1727_s22 + $0xcc] sm:$0x1] }
  0x38   : > { %v437_v11 = vrot.slane %v435_v3, 5  ;;  %v532_v13 = vshrl.u32 %v1879_v62, 16  ;;  %v411_v16 = vrot.slane %v410_v5, 4  ;;  %v424_v17 = vor.u32 %v423_v6, %v420_v1  ;;  %v1630_v61 = vld [vmem:[%s1727_s22 + $0xf8] ss:$8 sps:$4 sm:$0xff]  }
  0x39   : > { %944 = vrot.lane.b32.xlu0 %v1511_v47, %s1676_s12  ;;  %v402_v15 = vsel %vm1772_vm2, %v397_v4, %v401_v53  ;;  %v535_v18 = vshll.u32 %v1879_v62, 16  ;;  %774 = vrot.lane.b32.xlu1 %v1626_v63, %s1669_s23  ;;  %v443_v22 = vrot.slane %v441_v12, 5  ;;  %v546_v28 = vshrl.u32 %v1435_v8, 16  ;;  %v1452_v53 = vld [vmem:[%s1727_s22 + $0xc4] sm:$0x1] }
  0x3a   : > { %v438_v21 = vor.u32 %v437_v11, %v434_v10  ;;  %v534_v23 = vrot.slane %v532_v13, 4  ;;  %v416_v29 = vsel %vm1772_vm2, %v411_v16, %v415_v0  ;;  %v425_v30 = vrot.slane %v424_v17, 4  ;;  %v1920_v0 = vld [vmem:[%s1727_s22 + $0x28] sm:$0xf]  ;;  %v1459_v5 = vld [vmem:[%s1727_s22 + $0x30] sm:$0xf] }
  0x3b   : > { %v537_v33 = vrot.slane %v535_v18, 5  ;;  %v549_v34 = vshll.u32 %v1435_v8, 16  ;;  %v1488_v35 = vcombine.low %v402_v15, %v416_v29  ;;  %v548_v37 = vrot.slane %v546_v28, 4  ;;  %v1926_v10 = vld [vmem:[%s1727_s22 + $0x38] sm:$0xf] }
  0x3c   : > { %v439_v36 = vrot.slane %v438_v21, 4  ;;  %v1492_v38 = vcombine.low %v1879_v62, %v1435_v8  ;;  %v430_v40 = vsel %vm1772_vm2, %v425_v30, %v429_v7  ;;  %v560_v43 = vshrl.u32 %v1889_v14, 16  ;;  %v1631_v29 = vld [vmem:[%s1727_s22 + $0x108] ss:$8 sps:$4 sm:$0xff]  }
  0x3d   : > { %v551_v41 = vrot.slane %v549_v34, 5  ;;  %v563_v44 = vshll.u32 %v1889_v14, 16  ;;  %776 = vrot.lane.b32.xlu1 %v1627_v9, %s1669_s23  ;;  %794 = vrot.lane.b32.xlu0 %v1488_v35, %s1672_s30  ;;  %v574_v47 = vshrl.u32 %v1896_v20, 16  ;;  %v577_v49 = vshll.u32 %v1896_v20, 16 }
  0x3e   : > { %v444_v46 = vsel %vm1772_vm2, %v439_v36, %v443_v22  ;;  %v1493_v50 = vcombine.low %v1889_v14, %v1896_v20  ;;  %v562_v57 = vrot.slane %v560_v43, 4  ;;  %v538_v58 = vor.u32 %v537_v33, %v534_v23  ;;  %v1461_v20 = vld [vmem:[%s1727_s22 + $0x40] sm:$0xf]  ;;  %v1474_v36 = vld [vmem:[%s1727_s22 + $0x2c] sm:$0x1] }
  0x3f   : > { %v1489_v54 = vcombine.low %v430_v40, %v444_v46  ;;  %v565_v31 = vrot.slane %v563_v44, 5  ;;  %v576_v60 = vrot.slane %v574_v47, 4  ;;  %v579_v26 = vrot.slane %v577_v49, 5  ;;  %v1476_v47 = vld [vmem:[%s1727_s22 + $0x3c] sm:$0x1] }
  0x40   : > { %v541_v62 = vshll.u32 %v1450_v45, 16  ;;  %v552_v63 = vor.u32 %v551_v41, %v548_v37  ;;  %v539_v1 = vrot.slane %v538_v58, 4  ;;  %v555_v2 = vshll.u32 %v1451_v51, 16  ;;  %v1475_v41 = vld [vmem:[%s1727_s22 + $0x34] sm:$0x1] }
  0x41   : > { %v566_v3 = vor.u32 %v565_v31, %v562_v57  ;;  %v569_v4 = vshll.u32 %v1452_v53, 16  ;;  %796 = vrot.lane.b32.xlu1 %v1489_v54, %s1672_s30  ;;  %822 = vrot.lane.b32.xlu0 %v1492_v38, %s1670_s24  ;;  %v580_v8 = vor.u32 %v579_v26, %v576_v60  ;;  %v583_v9 = vshll.u32 %v1453_v59, 16  ;;  %v1477_v54 = vld [vmem:[%s1727_s22 + $0x44] sm:$0x1] }
  0x42   : > { %v543_v6 = vrot.slane %v541_v62, 5  ;;  %v553_v7 = vrot.slane %v552_v63, 4  ;;  %v557_v11 = vrot.slane %v555_v2, 5  ;;  %v675_v14 = vshrl.u32 %v1920_v0, 16 }
  0x43   : > { %v567_v12 = vrot.slane %v566_v3, 4  ;;  %v571_v13 = vrot.slane %v569_v4, 5  ;;  %v581_v16 = vrot.slane %v580_v8, 4  ;;  %v585_v17 = vrot.slane %v583_v9, 5  ;;  %v1643_v8 = vld [vmem:[%s2078_s1 + $0x20] ss:$0 sps:$4 sm:$0xff]  }
  0x44   : > { %v544_v15 = vsel %vm1772_vm2, %v539_v1, %v543_v6  ;;  %v678_v18 = vshll.u32 %v1920_v0, 16  ;;  %v558_v21 = vsel %vm1772_vm2, %v553_v7, %v557_v11  ;;  %v677_v23 = vrot.slane %v675_v14, 4  ;;  %1580 = vmatprep.subr.msk.bf16.mxu0 %vm1078_vm3, %v1643_v8  ;;  %1581 = vmatprep.subr.msk.bf16.mxu1 %vm1078_vm3, %v1643_v8 }
  0x45   : > { %v572_v22 = vsel %vm1772_vm2, %v567_v12, %v571_v13  ;;  %v689_v28 = vshrl.u32 %v1459_v5, 16  ;;  %824 = vrot.lane.b32.xlu1 %v1493_v50, %s1670_s24  ;;  %850 = vrot.lane.b32.xlu0 %v1630_v61, %s1671_s25  ;;  %v1500_v30 = vcombine.low %v544_v15, %v558_v21  ;;  %v586_v33 = vsel %vm1772_vm2, %v581_v16, %v585_v17  ;;  %s1534_s24 = sshll.u32 %s2089_s15, 5 }
  0x46   : > { %v680_v34 = vrot.slane %v678_v18, 5  ;;  %v692_v35 = vshll.u32 %v1459_v5, 16  ;;  %v1501_v37 = vcombine.low %v572_v22, %v586_v33  ;;  %v703_v40 = vshrl.u32 %v1926_v10, 16  ;;  %s2039_s27 = scalar_lea.vmem %s2080_s3, %s1534_s24 }
  0x47   : > { %v691_v38 = vrot.slane %v689_v28, 4  ;;  %v706_v44 = vshll.u32 %v1926_v10, 16  ;;  %v717_v45 = vshrl.u32 %v1461_v20, 16  ;;  %v720_v46 = vshll.u32 %v1461_v20, 16 }
  0x48   : > { %v694_v43 = vrot.slane %v692_v35, 5  ;;  %v1504_v49 = vcombine.low %v1920_v0, %v1459_v5  ;;  %v705_v50 = vrot.slane %v703_v40, 4  ;;  %v681_v51 = vor.u32 %v680_v34, %v677_v23  ;;  %v1634_v5 = vld [vmem:[%s1727_s22 + $0x70] ss:$8 sps:$4 sm:$0xff]  }
  0x49   : > { %v684_v53 = vshll.u32 %v1474_v36, 16  ;;  %852 = vrot.lane.b32.xlu1 %v1631_v29, %s1671_s25  ;;  %870 = vrot.lane.b32.xlu0 %v1500_v30, %s1673_s9  ;;  %v708_v57 = vrot.slane %v706_v44, 5  ;;  %v719_v31 = vrot.slane %v717_v45, 4  ;;  %v722_v58 = vrot.slane %v720_v46, 5 }
  0x4a   : > { %v695_v59 = vor.u32 %v694_v43, %v691_v38  ;;  %v682_v60 = vrot.slane %v681_v51, 4  ;;  %v698_v61 = vshll.u32 %v1475_v41, 16  ;;  %v712_v62 = vshll.u32 %v1476_v47, 16 }
  0x4b   : > { %v686_v26 = vrot.slane %v684_v53, 5  ;;  %v709_v1 = vor.u32 %v708_v57, %v705_v50  ;;  %v723_v0 = vor.u32 %v722_v58, %v719_v31  ;;  %v726_v2 = vshll.u32 %v1477_v54, 16 }
  0x4c   : > { %v696_v63 = vrot.slane %v695_v59, 4  ;;  %v700_v3 = vrot.slane %v698_v61, 5  ;;  %v1505_v4 = vcombine.low %v1926_v10, %v1461_v20  ;;  %v714_v7 = vrot.slane %v712_v62, 5  ;;  %v1635_v10 = vld [vmem:[%s1727_s22 + $0x80] ss:$8 sps:$4 sm:$0xff]  }
  0x4d   : > { %872 = vrot.lane.b32.xlu1 %v1501_v37, %s1673_s9  ;;  %898 = vrot.lane.b32.xlu0 %v1504_v49, %s1674_s10  ;;  %v687_v6 = vsel %vm1772_vm2, %v682_v60, %v686_v26  ;;  %v710_v11 = vrot.slane %v709_v1, 4  ;;  %v724_v12 = vrot.slane %v723_v0, 4  ;;  %v728_v13 = vrot.slane %v726_v2, 5 }
  0x4e   : > { %v701_v9 = vsel %vm1772_vm2, %v696_v63, %v700_v3  ;;  %v1480_v14 = vcombine.low %v1843_v25, %v1850_v32  ;;  %v1080_v16 = vsel %vm1078_vm3, %v1643_v8, 0  ;;  %v1481_v17 = vcombine.low %v1862_v39, %v1872_v52 }
  0x4f   : > { %v1512_v15 = vcombine.low %v687_v6, %v701_v9  ;;  %v715_v18 = vsel %vm1772_vm2, %v710_v11, %v714_v7  ;;  %v729_v20 = vsel %vm1772_vm2, %v724_v12, %v728_v13  ;;  %1561 = vmatpush3.bf16.msra.mxu0 %v1080_v16  ;;  %1579 = vmatpush3.bf16.msra.mxu1 %v1080_v16 }
  0x50   : > { %v1513_v21 = vcombine.low %v715_v18, %v729_v20 }
  0x51   : > { %900 = vrot.lane.b32.xlu1 %v1505_v4, %s1674_s10  ;;  %926 = vrot.lane.b32.xlu0 %v1634_v5, %s1675_s11 }
  0x55   : > { %928 = vrot.lane.b32.xlu1 %v1635_v10, %s1675_s11  ;;  %946 = vrot.lane.b32.xlu0 %v1512_v15, %s1676_s12 }
  0x59   : > { %948 = vrot.lane.b32.xlu1 %v1513_v21, %s1676_s12 }
  0x85   : > { %v771_v22 = vpop.permute.xlu0 %770 }
  0x86   : > { %v953_v36 = vsel %vm950_vm4, %v1478_v55, %v771_v22  ;;  %v1677_v22 = vmov 0.0  }
  0x87   : > { %1222 = vst.msk [vmem:[%s2028_s21] sm:$0x1] %vm1221_vm13, %v1677_v22 }
  0x88   : > { %v821_v28 = vpop.permute.xlu1 %820 }
  0x89   : > { %v773_v23 = vpop.permute.xlu0 %772 }
  0x8a   : > { %v956_v38 = vsel %vm950_vm4, %v1479_v27, %v773_v23  ;;  %v1514_v23 = vld [vmem:[%s2079_s2] ss:$0 sm:$0xff] }
  0x8c   : > { %v849_v30 = vpop.permute.xlu1 %848 }
  0x8d   : > { %v819_v29 = vpop.permute.xlu0 %818 }
  0x91   : > { %v847_v33 = vpop.permute.xlu0 %846 }
  0x97   : > { %v791_v34 = vpop.permute.xlu1 %790 }
  0x98   : > { %v965_v37 = vsel %vm963_vm5, %v953_v36, %v791_v34 }
  0x99   : > { %v974_v44 = vsel %vm972_vm6, %v965_v37, %v819_v29 }
  0x9a   : > { %v983_v55 = vsel %vm981_vm7, %v974_v44, %v847_v33 }
  0x9b   : > { %v867_v56 = vpop.permute.xlu0 %866  ;;  %v793_v35 = vpop.permute.xlu1 %792 }
  0x9c   : > { %v967_v41 = vsel %vm963_vm5, %v956_v38, %v793_v35  ;;  %v992_v42 = vsel %vm990_vm8, %v983_v55, %v867_v56 }
  0x9d   : > { %v976_v19 = vsel %vm972_vm6, %v967_v41, %v821_v28 }
  0x9e   : > { %v985_v48 = vsel %vm981_vm7, %v976_v19, %v849_v30 }
  0x9f   : > { %v895_v40 = vpop.permute.xlu0 %894  ;;  %v869_v43 = vpop.permute.xlu1 %868 }
  0xa0   : > { %v1001_v27 = vsel %vm999_vm9, %v992_v42, %v895_v40  ;;  %v994_v51 = vsel %vm990_vm8, %v985_v48, %v869_v43 }
  0xa3   : > { %v923_v24 = vpop.permute.xlu0 %922  ;;  %v897_v45 = vpop.permute.xlu1 %896 }
  0xa4   : > { %v1010_v46 = vsel %vm1008_vm10, %v1001_v27, %v923_v24  ;;  %v1003_v53 = vsel %vm999_vm9, %v994_v51, %v897_v45 }
  0xa7   : > { %v943_v47 = vpop.permute.xlu0 %942  ;;  %v925_v49 = vpop.permute.xlu1 %924 }
  0xa8   : > { %v1019_v50 = vsel %vm1017_vm11, %v1010_v46, %v943_v47  ;;  %v1012_v54 = vsel %vm1008_vm10, %v1003_v53, %v925_v49 }
  0xa9   : > { %1562 = vmatprep.mubr.msk.bf16.mxu0 %vm1069_vm12, %v1019_v50 }
  0xab   : > { %v945_v57 = vpop.permute.xlu0 %944  ;;  %v775_v31 = vpop.permute.xlu1 %774 }
  0xac   : > { %v1021_v58 = vsel %vm1017_vm11, %v1012_v54, %v945_v57  ;;  %v959_v4 = vsel %vm950_vm4, %v1480_v14, %v775_v31 }
  0xad   : > { %1563 = vmatmul.mubr.msk.bf16.vlgmr.msra.gmra.mrb[0].mxu0 %vm1069_vm12, %v1021_v58 }
  0xaf   : > { %v777_v59 = vpop.permute.xlu1 %776  ;;  %v795_v60 = vpop.permute.xlu0 %794 }
  0xb0   : > { %v969_v5 = vsel %vm963_vm5, %v959_v4, %v795_v60  ;;  %v962_v11 = vsel %vm950_vm4, %v1481_v17, %v777_v59 }
  0xb3   : > { %v797_v26 = vpop.permute.xlu1 %796  ;;  %v823_v61 = vpop.permute.xlu0 %822 }
  0xb4   : > { %v978_v6 = vsel %vm972_vm6, %v969_v5, %v823_v61  ;;  %v971_v25 = vsel %vm963_vm5, %v962_v11, %v797_v26 }
  0xb7   : > { %v825_v62 = vpop.permute.xlu1 %824  ;;  %v851_v63 = vpop.permute.xlu0 %850 }
  0xb8   : > { %v987_v9 = vsel %vm981_vm7, %v978_v6, %v851_v63  ;;  %v980_v13 = vsel %vm972_vm6, %v971_v25, %v825_v62 }
  0xbb   : > { %v853_v1 = vpop.permute.xlu1 %852  ;;  %v871_v0 = vpop.permute.xlu0 %870 }
  0xbc   : > { %v996_v12 = vsel %vm990_vm8, %v987_v9, %v871_v0  ;;  %v989_v16 = vsel %vm981_vm7, %v980_v13, %v853_v1 }
  0xbf   : > { %v873_v2 = vpop.permute.xlu1 %872  ;;  %v899_v3 = vpop.permute.xlu0 %898 }
  0xc0   : > { %v1005_v32 = vsel %vm999_vm9, %v996_v12, %v899_v3  ;;  %v998_v52 = vsel %vm990_vm8, %v989_v16, %v873_v2 }
  0xc3   : > { %v901_v7 = vpop.permute.xlu1 %900  ;;  %v927_v8 = vpop.permute.xlu0 %926 }
  0xc4   : > { %v1014_v14 = vsel %vm1008_vm10, %v1005_v32, %v927_v8  ;;  %v1007_v17 = vsel %vm999_vm9, %v998_v52, %v901_v7 }
  0xc7   : > { %v929_v10 = vpop.permute.xlu1 %928  ;;  %v947_v15 = vpop.permute.xlu0 %946 }
  0xc8   : > { %v1023_v39 = vsel %vm1017_vm11, %v1014_v14, %v947_v15  ;;  %v1016_v18 = vsel %vm1008_vm10, %v1007_v17, %v929_v10  ;;  %v1223_v14 = vld [vmem:[%s2028_s21] sm:$0x1] }
  0xc9   : > { %1566 = vmatprep.mubr.msk.bf16.mxu1 %vm1069_vm12, %v1023_v39 }
  0xcb   : > { %v949_v20 = vpop.permute.xlu1 %948 }
  0xcc   : > { %v1025_v21 = vsel %vm1017_vm11, %v1016_v18, %v949_v20 }
  0xcd   : > { %1567 = vmatmul.mubr.msk.bf16.vlgmr.msra.gmra.mrb[0].mxu1 %vm1069_vm12, %v1025_v21 }
 0x180   : > { %v1564_v28 = vpop.f32.mrb[0].mxu0 }
 0x181   : > { %v1125_v29 = vadd.f32 %v1564_v28, %v1514_v23  ;;  %v1116_v30 = vpop.f32.mrb[1].mxu0 }
 0x182   : > { %v1117_v33 = vadd.f32 %v1514_v23, %v1116_v30  ;;  %v1565_v34 = vpop.f32.mrb[2].mxu0 }
 0x183   : > { %v1149_v56 = vmax.f32 %v1125_v29, 0.0  ;;  %v1128_v35 = vadd.f32 %v1565_v34, %v1514_v23  ;;  %v1119_v36 = vpop.f32.mrb[3].mxu0 }
 0x184   : > { %v1147_v37 = vmax.f32 %v1117_v33, 0.0  ;;  %v1120_v38 = vadd.f32 %v1514_v23, %v1119_v36 }
 0x185   : > { %v1537_v40 = vpack.c.bf16 %v1149_v56, %v1149_v56  ;;  %v1150_v41 = vmax.f32 %v1128_v35, 0.0  ;;  %v1199_v48 = vsel %vm950_vm4, %v1149_v56, 0.0 }
 0x186   : > { %v1535_v43 = vpack.c.bf16 %v1147_v37, %v1147_v37  ;;  %v1148_v44 = vmax.f32 %v1120_v38, 0.0  ;;  %v1196_v24 = vsel %vm950_vm4, %v1147_v37, 0.0 }
 0x187   : > { %1190 = vst.msk [vmem:[%s2039_s27 + $0x8] sm:$0xf] %vm1187_vm14, %v1537_v40  ;;  %v1538_v19 = vpack.c.bf16 %v1150_v41, %v1150_v41  ;;  %v1201_v46 = vsel %vm950_vm4, %v1150_v41, 0.0 }
 0x188   : > { %1188 = vst.msk [vmem:[%s2039_s27] sm:$0xf] %vm1187_vm14, %v1535_v43  ;;  %v1536_v55 = vpack.c.bf16 %v1148_v44, %v1148_v44  ;;  %v1197_v45 = vsel %vm950_vm4, %v1148_v44, 0.0 }
 0x189   : > { %1191 = vst.msk [vmem:[%s2039_s27 + $0xc] sm:$0xf] %vm1187_vm14, %v1538_v19  ;;  %v1198_v42 = vadd.f32 %v1197_v45, %v1196_v24 }
 0x18a   : > { %1189 = vst.msk [vmem:[%s2039_s27 + $0x4] sm:$0xf] %vm1187_vm14, %v1536_v55 }
 0x18b   : > { %v1200_v27 = vadd.f32 %v1199_v48, %v1198_v42 }
 0x18d   : > { %v1202_v47 = vadd.f32 %v1201_v46, %v1200_v27 }
 0x1a0   : > { %v1568_v49 = vpop.f32.mrb[0].mxu1 }
 0x1a1   : > { %v1141_v50 = vadd.f32 %v1568_v49, %v1514_v23  ;;  %v1132_v51 = vpop.f32.mrb[1].mxu1 }
 0x1a2   : > { %v1133_v53 = vadd.f32 %v1514_v23, %v1132_v51  ;;  %v1569_v54 = vpop.f32.mrb[2].mxu1 }
 0x1a3   : > { %v1153_v57 = vmax.f32 %v1141_v50, 0.0  ;;  %v1144_v31 = vadd.f32 %v1569_v54, %v1514_v23  ;;  %v1135_v58 = vpop.f32.mrb[3].mxu1 }
 0x1a4   : > { %v1151_v59 = vmax.f32 %v1133_v53, 0.0  ;;  %v1136_v60 = vadd.f32 %v1514_v23, %v1135_v58 }
 0x1a5   : > { %v1541_v26 = vpack.c.bf16 %v1153_v57, %v1153_v57  ;;  %v1154_v61 = vmax.f32 %v1144_v31, 0.0  ;;  %v1207_v6 = vsel %vm950_vm4, %v1153_v57, 0.0 }
 0x1a6   : > { %v1539_v62 = vpack.c.bf16 %v1151_v59, %v1151_v59  ;;  %v1203_v63 = vsel %vm950_vm4, %v1151_v59, 0.0  ;;  %v1152_v1 = vmax.f32 %v1136_v60, 0.0 }
 0x1a7   : > { %1194 = vst.msk [vmem:[%s2039_s27 + $0x18] sm:$0xf] %vm1187_vm14, %v1541_v26  ;;  %v1204_v0 = vadd.f32 %v1203_v63, %v1202_v47  ;;  %v1542_v2 = vpack.c.bf16 %v1154_v61, %v1154_v61  ;;  %v1209_v8 = vsel %vm950_vm4, %v1154_v61, 0.0 }
 0x1a8   : > { %1192 = vst.msk [vmem:[%s2039_s27 + $0x10] sm:$0xf] %vm1187_vm14, %v1539_v62  ;;  %v1540_v3 = vpack.c.bf16 %v1152_v1, %v1152_v1  ;;  %v1205_v4 = vsel %vm950_vm4, %v1152_v1, 0.0 }
 0x1a9   : > { %1195 = vst.msk [vmem:[%s2039_s27 + $0x1c] sm:$0xf] %vm1187_vm14, %v1542_v2  ;;  %v1206_v5 = vadd.f32 %v1205_v4, %v1204_v0 }
 0x1aa   : > { %1193 = vst.msk [vmem:[%s2039_s27 + $0x14] sm:$0xf] %vm1187_vm14, %v1540_v3 }
 0x1ab   : > { %v1208_v7 = vadd.f32 %v1207_v6, %v1206_v5 }
 0x1ad   : > { %v1210_v9 = vadd.f32 %v1209_v8, %v1208_v7 }
 0x1af   : > { %v1211_v11 = vrot.slane %v1210_v9, 4 }
 0x1b1   : > { %v1212_v12 = vadd.f32 %v1211_v11, %v1210_v9 }
 0x1b3   : > { %v1213_v25 = vrot.slane %v1212_v12, 2 }
 0x1b5   : > { %v1214_v32 = vadd.f32 %v1213_v25, %v1212_v12 }
 0x1b7   : > { %v1215_v13 = vrot.slane %v1214_v32, 1 }
 0x1b9   : > { %v1216_v10 = vadd.f32 %v1215_v13, %v1214_v32 }
 0x1bb   : > { %v1224_v15 = vadd.f32 %v1223_v14, %v1216_v10 }
 0x1bd   : > { %1226 = vst.msk [vmem:[%s2028_s21] sm:$0x1] %vm1221_vm13, %v1224_v15 }
 0x1be PF: > { %s15_s17 = sadd.s32 1, %s1667_s17   ;;  %s2084_s15 = smov %s1663_s16 }
 0x1bf   : > { %p12_p5 = scmp.ge.s32.totalorder %s15_s17, 4   ;;  %s2085_s16 = smov %s2087_s18 }
 0x1c1   :  { %14 = sbr.rel (!%p12_p5) target bundleno = 2 (0x2), region = 90 }

// kernel: reg_stage_forward.11
= control target key start
LH: loop header
LB: loop body
LE: loop exit
PB: predicated region body
PF: predicated region fallthrough
CT: control target
= control target key end

     0   :  { %s1124_s30 = smov 0   ;;  %s1126_s10 = smov 0   ;;  %s1203_s0 = inlined_call_operand.vmem [shape: f32[2,1,8], index: 0, kind: input, shape index: {}]   ;;  %s1204_s1 = inlined_call_operand.vmem [shape: f32[8,2], index: 1, kind: input, shape index: {}]   ;;  %s1205_s2 = inlined_call_operand.vmem [shape: f32[1,2], index: 2, kind: input, shape index: {}]   ;;  %s1206_s3 = inlined_call_operand.vmem [shape: f32[2,8], index: 3, kind: input, shape index: {}]   ;;  %s1207_s4 = inlined_call_operand.vmem [shape: f32[1,8], index: 4, kind: input, shape index: {}]   ;;  %s1208_s5 = inlined_call_operand.vmem [shape: bf16[2,64,8], index: 5, kind: input, shape index: {}]   ;;  %s1209_s6 = inlined_call_operand.vmem [shape: bf16[8,8], index: 6, kind: input, shape index: {}]   ;;  %s1210_s7 = inlined_call_operand.vmem [shape: f32[1,8], index: 7, kind: input, shape index: {}]   ;;  %s1211_s8 = inlined_call_operand.vmem [shape: bf16[2,64,8], index: 8, kind: input, shape index: {}]   ;;  %s1212_s9 = inlined_call_operand.vmem [shape: bf16[2,64,8], index: 9, kind: output, shape index: {}]  }
   0x1   :  { %s1128_s11 = smov 0  }
   0x2 LB: > { %s31_s12 = sadd.s32 1, %s1066_s10  ;;  %p924_p0 = scmp.ge.s32.totalorder %s1070_s11, 1  ;;  %s1070_s11 = sphi %s1128_s11, %s19_s11   ;;  %s1066_s10 = sphi %s1126_s10, %s1214_s10   ;;  %s1062_s30 = sphi %s1124_s30, %s1213_s30  }
   0x3   : > { %p33_p1 = scmp.ge.s32.totalorder %s31_s12, 2  ;;  %p333_p2 = scmp.lt.s32.totalorder %s1070_s11, 3 }
   0x5   : > { %s1216_s12 = smov (%p33_p1, %s31_s12), 0  ;;  %p334_p3 = pnand %p924_p0, %p333_p2 }
   0x6   : > { %v429_v0 = vld [vmem:[%s1204_s1] sm:$0xff] (!%p334_p3)  ;;  %p389_p4 = scmp.lt.s32.totalorder (!%p334_p3), %s1062_s30, 1  ;;  %v1072_v1 = vmov (!%p334_p3), 0.0   ;;  %vm1073_vm0 = vmmov (!%p334_p3), 0   ;;  %vm431_vm1 = vcmask (!%p334_p3), 64512   ;;  %vm512_vm2 = vcmask (!%p334_p3), 1041408  }
   0x7   : > { %337 = sbr.rel (%p334_p3) target bundleno = 720 (0x2d0), region = 56  ;;  %994 = vmatprep.subr.mxu0 (!%p334_p3), %v1072_v1  ;;  %996 = vmatprep.mubr.msk.f32.mxu0 (!%p334_p3), %vm1073_vm0, %v1072_v1  ;;  %v506_v4 = vld [vmem:[%s1206_s3] sm:$0x3] (!%p334_p3)  ;;  %vm508_vm3 = vcmask (!%p334_p3), 15360   ;;  %vm664_vm4 = vcmask (!%p334_p3), 1043456   ;;  %vm592_vm5 = vcmask (!%p334_p3), 57344   ;;  %v607_v20 = vlaneseq (!%p334_p3) }
   0x8   : > { %995 = vmatpush3.msra.mxu0 (!%p334_p3), %v429_v0  ;;  %999 = vmatprep.subr.mxu1 (!%p334_p3), %v1072_v1  ;;  %v430_v5 = vld [vmem:[%s1205_s2] sm:$0x1] (!%p334_p3)  ;;  %vm797_vm6 = vcmask (!%p334_p3), 60416  }
   0x9   : > { %1001 = vmatprep.mubr.msk.f32.mxu1 (!%p334_p3), %vm1073_vm0, %v1072_v1  ;;  %1000 = vmatpush3.msk.msra.mxu1 (!%p334_p3), %vm512_vm2, %v506_v4  ;;  %v623_v10 = vld [vmem:[%s1209_s6] sm:$0xf] (!%p334_p3)  ;;  %v608_v21 = vshrl.u32 (!%p334_p3), %v607_v20, 7 }
   0xa   : > { %1016 = vmatprep.subr.msk.bf16.mxu0 (!%p334_p3), %vm664_vm4, %v623_v10  ;;  %1017 = vmatprep.subr.msk.bf16.mxu1 (!%p334_p3), %vm664_vm4, %v623_v10  ;;  %v666_v11 = vsel (!%p334_p3), %vm664_vm4, %v623_v10, 0  ;;  %v507_v12 = vld [vmem:[%s1207_s4] sm:$0x1] (!%p334_p3) }
   0xb   : > { %v609_v24 = vsub.s32 (!%p334_p3), 0, %v608_v21  ;;  %v936_v52 = vld [vmem:[%s1210_s7] ss:$0 sm:$0xff] (!%p334_p3) }
   0xe   : > { %s1218_s30 = smov (!%p389_p4, %s1062_s30), 1 }
   0xf   : > { %s391_s17 = scalar_lea.vmem %s1203_s0, %s1218_s30  ;;  %s1165_s26 = sshll.u32 %s1218_s30, 5 }
  0x10   : > { %v427_v2 = vld [vmem:[%s391_s17] sm:$0x1]  ;;  %s400_s29 = scalar_lea.vmem %s1208_s5, %s1165_s26  ;;  %s410_s14 = scalar_lea.vmem %s1211_s8, %s1165_s26 }
  0x11   : > { %v428_v3 = vmul.f32 0.015625, %v427_v2  ;;  %v594_v26 = vld [vmem:[%s400_s29] sm:$0xf]  ;;  %v595_v27 = vld [vmem:[%s400_s29 + $0x4] sm:$0xf]  ;;  %v982_v48 = vld [vmem:[%s410_s14 + $0x8] sm:$0xff]   ;;  %s420_s19 = scalar_lea.vmem %s1212_s9, %s1165_s26 }
  0x12   : > { %v598_v29 = vld [vmem:[%s400_s29 + $0x10] sm:$0xf]  ;;  %v599_v30 = vld [vmem:[%s400_s29 + $0x14] sm:$0xf]  ;;  %v596_v31 = vld [vmem:[%s400_s29 + $0x8] sm:$0xf]  ;;  %v972_v53 = vunpack.c.l.bf16 %v982_v48  ;;  %v973_v59 = vunpack.c.h.bf16 %v982_v48 }
  0x13   : > { %997 = vmatmul.mubr.msk.f32.vlgmr.msra.gmra.mrb[0].mxu0 %vm431_vm1, %v428_v3  ;;  %v597_v33 = vld [vmem:[%s400_s29 + $0xc] sm:$0xf]  ;;  %v600_v34 = vld [vmem:[%s400_s29 + $0x18] sm:$0xf]  ;;  %v601_v35 = vld [vmem:[%s400_s29 + $0x1c] sm:$0xf] }
  0x14   : > { %1005 = vmatpush3.bf16.msra.mxu0 %v666_v11  ;;  %v984_v49 = vld [vmem:[%s410_s14 + $0x18] sm:$0xff]   ;;  %v967_v50 = vld [vmem:[%s410_s14] sm:$0xff]   ;;  %v983_v51 = vld [vmem:[%s410_s14 + $0x10] sm:$0xff]  }
  0x15   : > { %v980_v54 = vunpack.c.l.bf16 %v984_v49  ;;  %v968_v57 = vunpack.c.l.bf16 %v967_v50  ;;  %v976_v58 = vunpack.c.l.bf16 %v983_v51  ;;  %v981_v0 = vunpack.c.h.bf16 %v984_v49 }
  0x16   : > { %v969_v1 = vunpack.c.h.bf16 %v967_v50 }
  0xe6   : > { %v501_v6 = vpop.f32.mrb[0].mxu0 }
  0xe7   : > { %v502_v7 = vadd.f32 %v501_v6, %v430_v5  ;;  %v998_v8 = vpop.f32.mrb[1].mxu0  ;;  %v977_v6 = vunpack.c.h.bf16 %v983_v51 }
  0xe9   : > { %v505_v9 = vmax.f32 %v502_v7, 0.0 }
  0xeb   : > { %1002 = vmatmul.mubr.msk.f32.vlgmr.msra.gmra.mrb[0].mxu1 %vm508_vm3, %v505_v9 }
  0xec   : > { %1015 = vmatpush3.bf16.msra.mxu1 %v666_v11 }
 0x1be   : > { %v582_v13 = vpop.f32.mrb[0].mxu1 }
 0x1bf   : > { %v583_v14 = vadd.f32 %v582_v13, %v507_v12  ;;  %v1003_v15 = vpop.f32.mrb[1].mxu1 }
 0x1c1   : > { %v934_v16 = vmul.f32 -1.442695, %v583_v14 }
 0x1c3   : > { %1044 = vpow2.f32 %v934_v16 }
 0x1cd   : > { %v1045_v17 = vpop.eup %1044 }
 0x1ce   : > { %v589_v18 = vadd.f32 1.0, %v1045_v17 }
 0x1d0   : > { %1046 = vrcp.f32 %v589_v18 }
 0x1da   : > { %v1047_v19 = vpop.eup %1046 }
 0x1db   : > { %593 = vst.msk [vmem:[#allocation2] sm:$0x1] %vm592_vm5, %v1047_v19 }
 0x1e2   : > { %v602_v22 = vld [vmem:[#allocation2] sm:$0x1] }
 0x1e3   : > { %v603_v23 = vpack.c.bf16 %v602_v22, %v602_v22 }
 0x1e5   : > { %v605_v25 = vpack.i.b16 %v603_v23, %v603_v23 }
 0x1e7   : > { %v610_v28 = vrot.slane %v605_v25, %v609_v24 }
 0x1e9   : > { %v935_v32 = vcombine.low %v610_v28, %v610_v28 }
 0x1eb   : > { %v615_v36 = vmul.bf16 %v935_v32, %v594_v26  ;;  %v616_v37 = vmul.bf16 %v935_v32, %v595_v27  ;;  %v619_v38 = vmul.bf16 %v935_v32, %v598_v29  ;;  %v620_v39 = vmul.bf16 %v935_v32, %v599_v30 }
 0x1ec   : > { %v617_v40 = vmul.bf16 %v935_v32, %v596_v31  ;;  %v618_v41 = vmul.bf16 %v935_v32, %v597_v33  ;;  %v621_v42 = vmul.bf16 %v935_v32, %v600_v34  ;;  %v622_v43 = vmul.bf16 %v935_v32, %v601_v35 }
 0x1ed   : > { %v937_v44 = vcombine.low %v615_v36, %v616_v37  ;;  %v939_v45 = vcombine.low %v619_v38, %v620_v39 }
 0x1ee   : > { %v938_v46 = vcombine.low %v617_v40, %v618_v41  ;;  %v940_v47 = vcombine.low %v621_v42, %v622_v43 }
 0x1ef   : > { %1006 = vmatprep.mubr.msk.bf16.mxu0 %vm431_vm1, %v937_v44  ;;  %1010 = vmatprep.mubr.msk.bf16.mxu1 %vm431_vm1, %v939_v45 }
 0x1f0   : > { %1007 = vmatmul.mubr.msk.bf16.vlgmr.msra.gmra.mrb[4].mxu0 %vm431_vm1, %v938_v46  ;;  %1011 = vmatmul.mubr.msk.bf16.vlgmr.msra.gmra.mrb[4].mxu1 %vm431_vm1, %v940_v47 }
 0x2c3   : > { %v1008_v55 = vpop.f32.mrb[4].mxu0  ;;  %v1012_v56 = vpop.f32.mrb[4].mxu1 }
 0x2c4   : > { %v711_v60 = vadd.f32 %v1008_v55, %v936_v52  ;;  %v727_v61 = vadd.f32 %v1012_v56, %v936_v52  ;;  %v702_v62 = vpop.f32.mrb[5].mxu0  ;;  %v718_v63 = vpop.f32.mrb[5].mxu1 }
 0x2c5   : > { %v703_v2 = vadd.f32 %v936_v52, %v702_v62  ;;  %v719_v3 = vadd.f32 %v936_v52, %v718_v63  ;;  %v1009_v4 = vpop.f32.mrb[6].mxu0  ;;  %v1013_v5 = vpop.f32.mrb[6].mxu1 }
 0x2c6   : > { %v751_v7 = vadd.f32 %v972_v53, %v711_v60  ;;  %v755_v8 = vadd.f32 %v980_v54, %v727_v61  ;;  %v714_v9 = vadd.f32 %v1009_v4, %v936_v52  ;;  %v730_v10 = vadd.f32 %v1013_v5, %v936_v52  ;;  %v705_v11 = vpop.f32.mrb[7].mxu0  ;;  %v721_v12 = vpop.f32.mrb[7].mxu1 }
 0x2c7   : > { %v749_v13 = vadd.f32 %v968_v57, %v703_v2  ;;  %v753_v14 = vadd.f32 %v976_v58, %v719_v3  ;;  %v706_v15 = vadd.f32 %v936_v52, %v705_v11  ;;  %v722_v16 = vadd.f32 %v936_v52, %v721_v12 }
 0x2c8   : > { %v759_v17 = vmax.f32 %v751_v7, 0.0  ;;  %v763_v18 = vmax.f32 %v755_v8, 0.0  ;;  %v752_v19 = vadd.f32 %v973_v59, %v714_v9  ;;  %v756_v20 = vadd.f32 %v981_v0, %v730_v10 }
 0x2c9   : > { %v757_v21 = vmax.f32 %v749_v13, 0.0  ;;  %v761_v22 = vmax.f32 %v753_v14, 0.0  ;;  %v750_v23 = vadd.f32 %v969_v1, %v706_v15  ;;  %v754_v24 = vadd.f32 %v977_v6, %v722_v16 }
 0x2ca   : > { %v960_v25 = vpack.c.bf16 %v759_v17, %v759_v17  ;;  %v964_v26 = vpack.c.bf16 %v763_v18, %v763_v18  ;;  %v760_v27 = vmax.f32 %v752_v19, 0.0  ;;  %v764_v28 = vmax.f32 %v756_v20, 0.0 }
 0x2cb   : > { %v958_v29 = vpack.c.bf16 %v757_v21, %v757_v21  ;;  %v962_v30 = vpack.c.bf16 %v761_v22, %v761_v22  ;;  %v758_v31 = vmax.f32 %v750_v23, 0.0  ;;  %v762_v32 = vmax.f32 %v754_v24, 0.0 }
 0x2cc   : > { %800 = vst.msk [vmem:[%s420_s19 + $0x8] sm:$0xf] %vm797_vm6, %v960_v25  ;;  %804 = vst.msk [vmem:[%s420_s19 + $0x18] sm:$0xf] %vm797_vm6, %v964_v26  ;;  %v961_v33 = vpack.c.bf16 %v760_v27, %v760_v27  ;;  %v965_v34 = vpack.c.bf16 %v764_v28, %v764_v28 }
 0x2cd   : > { %798 = vst.msk [vmem:[%s420_s19] sm:$0xf] %vm797_vm6, %v958_v29  ;;  %802 = vst.msk [vmem:[%s420_s19 + $0x10] sm:$0xf] %vm797_vm6, %v962_v30  ;;  %v959_v35 = vpack.c.bf16 %v758_v31, %v758_v31  ;;  %v963_v36 = vpack.c.bf16 %v762_v32, %v762_v32 }
 0x2ce   : > { %801 = vst.msk [vmem:[%s420_s19 + $0xc] sm:$0xf] %vm797_vm6, %v961_v33  ;;  %805 = vst.msk [vmem:[%s420_s19 + $0x1c] sm:$0xf] %vm797_vm6, %v965_v34 }
 0x2cf   : > { %799 = vst.msk [vmem:[%s420_s19 + $0x4] sm:$0xf] %vm797_vm6, %v959_v35  ;;  %803 = vst.msk [vmem:[%s420_s19 + $0x14] sm:$0xf] %vm797_vm6, %v963_v36 }
 0x2d0 PF: > { %s19_s11 = sadd.s32 1, %s1070_s11   ;;  %s1213_s30 = smov %s1066_s10 }
 0x2d1   : > { %p16_p5 = scmp.ge.s32.totalorder %s19_s11, 4   ;;  %s1214_s10 = smov %s1216_s12 }
 0x2d3   :  { %18 = sbr.rel (!%p16_p5) target bundleno = 2 (0x2), region = 96 }

// kernel: reg_stage_forward.10
= control target key start
LH: loop header
LB: loop body
LE: loop exit
PB: predicated region body
PF: predicated region fallthrough
CT: control target
= control target key end

     0   :  { %s1809_s15 = smov 0   ;;  %s1811_s16 = smov 0   ;;  %s2287_s0 = inlined_call_operand.vmem [shape: bf16[2,1,10,10,8], index: 0, kind: input, shape index: {}]   ;;  %s2288_s1 = inlined_call_operand.vmem [shape: bf16[1,72,8], index: 1, kind: input, shape index: {}]   ;;  %s2289_s2 = inlined_call_operand.vmem [shape: f32[1,8], index: 2, kind: input, shape index: {}]   ;;  %s2290_s3 = inlined_call_operand.vmem [shape: bf16[2,64,8], index: 3, kind: output, shape index: {0}]   ;;  %s2291_s4 = inlined_call_operand.vmem [shape: f32[2,1,8], index: 4, kind: output, shape index: {1}]  }
   0x1   :  { %s1813_s17 = smov 0  }
   0x2 LB: > { %s30_s18 = sadd.s32 1, %s1769_s16  ;;  %p1520_p0 = scmp.ge.s32.totalorder %s1773_s17, 1  ;;  %s1773_s17 = sphi %s1813_s17, %s15_s17   ;;  %s1769_s16 = sphi %s1811_s16, %s2297_s16   ;;  %s1765_s15 = sphi %s1809_s15, %s2296_s15  }
   0x3   : > { %p32_p1 = scmp.ge.s32.totalorder %s30_s18, 2  ;;  %p213_p2 = scmp.lt.s32.totalorder %s1773_s17, 3 }
   0x5   : > { %s2299_s18 = smov (%p32_p1, %s30_s18), 0  ;;  %p214_p3 = pnand %p1520_p0, %p213_p2 }
   0x6   : > { %p263_p4 = scmp.lt.s32.totalorder (!%p214_p3), %s1765_s15, 1  ;;  %vm458_vm0 = vcmask (!%p214_p3), 1042432   ;;  %vm459_vm1 = vcmask (!%p214_p3), 1046532   ;;  %s1775_s23 = smov (!%p214_p3), 24   ;;  %vm319_vm3 = vsmask.f32 (!%p214_p3), 3328 }
   0x7   : > { %217 = sbr.rel (%p214_p3) target bundleno = 462 (0x1ce), region = 32  ;;  %vm1850_vm2 = vmor (!%p214_p3), %vm458_vm0, %vm459_vm1  ;;  %vm320_vm4 = vsmask.f32 (!%p214_p3), 7440  ;;  %s1776_s24 = smov (!%p214_p3), 16   ;;  %vm1193_vm6 = vcmask (!%p214_p3), 1043456   ;;  %vm1065_vm7 = vcmask (!%p214_p3), 64512  }
   0x8   : > { %s1777_s25 = smov (!%p214_p3), 40   ;;  %vm1921_vm5 = vmor (!%p214_p3), %vm319_vm3, %vm320_vm4  ;;  %s1778_s28 = smov (!%p214_p3), 8   ;;  %vm1078_vm8 = vcmask (!%p214_p3), 130048   ;;  %vm1087_vm9 = vcmask (!%p214_p3), 195584   ;;  %vm1096_vm10 = vcmask (!%p214_p3), 261120   ;;  %vm1105_vm11 = vcmask (!%p214_p3), 326656  }
   0x9   : > { %s1779_s7 = smov (!%p214_p3), 32   ;;  %s1780_s10 = smov (!%p214_p3), 48   ;;  %vm1114_vm12 = vcmask (!%p214_p3), 392192   ;;  %vm1123_vm13 = vcmask (!%p214_p3), 457728   ;;  %vm1132_vm14 = vcmask (!%p214_p3), 523264   ;;  %vm1184_vm15 = vcmask (!%p214_p3), 588800  }
   0xa   : > { %s1781_s11 = smov (!%p214_p3), 56   ;;  %s1782_s12 = smov (!%p214_p3), 64   ;;  %vm1336_vm0 = vcmask (!%p214_p3), 57344   ;;  %vm1302_vm1 = vcmask (!%p214_p3), 60416  }
   0xe   : > { %s2301_s15 = smov (!%p263_p4, %s1765_s15), 1 }
   0xf   : > { %s1700_s19 = smul.u32 80, %s2301_s15  ;;  %s2238_s21 = scalar_lea.vmem %s2291_s4, %s2301_s15 }
  0x11   : > { %s1833_s22 = scalar_lea.vmem %s2287_s0, %s1700_s19 }
  0x12   : > { %v1534_v0 = vld [vmem:[%s1833_s22 + $0x18] sm:$0xf]  ;;  %v1535_v1 = vld [vmem:[%s1833_s22 + $0x20] sm:$0xf]  ;;  %v1532_v2 = vld [vmem:[%s1833_s22 + $0x8] sm:$0xf] }
  0x13   : > { %v556_v3 = vshrl.u32 %v1535_v1, 16  ;;  %v559_v4 = vshll.u32 %v1535_v1, 16  ;;  %v1609_v5 = vcombine.low %v1534_v0, %v1535_v1  ;;  %v542_v6 = vshrl.u32 %v1534_v0, 16  ;;  %v1533_v7 = vld [vmem:[%s1833_s22 + $0x10] sm:$0xf] }
  0x14   : > { %v545_v8 = vshll.u32 %v1534_v0, 16  ;;  %v528_v9 = vshrl.u32 %v1533_v7, 16  ;;  %v531_v10 = vshll.u32 %v1533_v7, 16  ;;  %v1608_v11 = vcombine.low %v1532_v2, %v1533_v7  ;;  %v1840_v12 = vld [vmem:[%s1833_s22 + $0x4] sm:$0x1] }
  0x15   : > { %v558_v13 = vrot.slane %v556_v3, 4  ;;  %v561_v14 = vrot.slane %v559_v4, 5  ;;  %951 = vrot.lane.b32.xlu1 %v1609_v5, %s1775_s23  ;;  %v544_v15 = vrot.slane %v542_v6, 4  ;;  %v514_v16 = vshrl.u32 %v1532_v2, 16  ;;  %v1844_v17 = vld [vmem:[%s1833_s22 + $0xc] sm:$0x1] }
  0x16   : > { %v547_v18 = vrot.slane %v545_v8, 5  ;;  %v530_v19 = vrot.slane %v528_v9, 4  ;;  %v533_v20 = vrot.slane %v531_v10, 5  ;;  %949 = vrot.lane.b32.xlu0 %v1608_v11, %s1775_s23  ;;  %v517_v21 = vshll.u32 %v1532_v2, 16  ;;  %v434_v22 = vld [vmem:[%s1833_s22] sm:$0xe] }
  0x17   : > { %v562_v24 = vor.u32 %v561_v14, %v558_v13  ;;  %v516_v25 = vrot.slane %v514_v16, 4  ;;  %v435_v26 = vld [vmem:[%s1833_s22 + $0x8] sm:$0xe]  ;;  %v1524_v27 = vrot.slane %v434_v22, 9  ;;  %v463_v28 = vrot.slane %v1840_v12, 5 }
  0x18   : > { %v548_v29 = vor.u32 %v547_v18, %v544_v15  ;;  %v534_v30 = vor.u32 %v533_v20, %v530_v19  ;;  %v519_v31 = vrot.slane %v517_v21, 5  ;;  %v1525_v32 = vrot.slane %v435_v26, 9  ;;  %v1857_v33 = vld [vmem:[%s1833_s22 + $0xc] sm:$0x1]  ;;  %v1860_v34 = vld [vmem:[%s1833_s22 + $0x14] sm:$0x1] }
  0x19   : > { %v1862_v35 = vrot.slane %v562_v24, 4  ;;  %v464_v36 = vsel %vm1850_vm2, %v1524_v27, %v463_v28  ;;  %v467_v37 = vrot.slane %v1844_v17, 5  ;;  %v1548_v38 = vld [vmem:[%s1833_s22 + $0x8] sm:$0xe]  ;;  %v1549_v39 = vld [vmem:[%s1833_s22 + $0x10] sm:$0xe] }
  0x1a   : > { %v1869_v40 = vrot.slane %v548_v29, 4  ;;  %v1871_v41 = vrot.slane %v534_v30, 4  ;;  %v520_v42 = vor.u32 %v519_v31, %v516_v25  ;;  %v1556_v43 = vrot.slane %v1548_v38, 9  ;;  %v1874_v44 = vld [vmem:[%s1833_s22 + $0x14] sm:$0x1] }
  0x1b   : > { %v468_v45 = vsel %vm1850_vm2, %v1525_v32, %v467_v37  ;;  %v651_v46 = vrot.slane %v1857_v33, 5  ;;  %v1557_v47 = vrot.slane %v1549_v39, 9  ;;  %v655_v48 = vrot.slane %v1860_v34, 5  ;;  %v1881_v49 = vld [vmem:[%s1833_s22 + $0x1c] sm:$0x1] }
  0x1c   : > { %v1883_v50 = vrot.slane %v520_v42, 4  ;;  %v1604_v51 = vcombine.low %v464_v36, %v468_v45  ;;  %v436_v52 = vld [vmem:[%s1833_s22 + $0x10] sm:$0xe]  ;;  %v437_v53 = vld [vmem:[%s1833_s22 + $0x18] sm:$0xe]  ;;  %v471_v54 = vrot.slane %v1874_v44, 5 }
  0x1d   : > { %v652_v55 = vsel %vm1850_vm2, %v1556_v43, %v651_v46  ;;  %v656_v56 = vsel %vm1850_vm2, %v1557_v47, %v655_v48  ;;  %v1526_v57 = vrot.slane %v436_v52, 9  ;;  %v1527_v58 = vrot.slane %v437_v53, 9  ;;  %v1893_v59 = vld [vmem:[%s1833_s22] sm:$0xf]  ;;  %v1896_v60 = vld [vmem:[%s1833_s22 + $0x8] sm:$0xf] }
  0x1e   : > { %921 = vrot.lane.b32.xlu1 %v1604_v51, %s1776_s24  ;;  %v1616_v61 = vcombine.low %v652_v55, %v656_v56  ;;  %v475_v62 = vrot.slane %v1881_v49, 5  ;;  %v323_v63 = vshrl.u32 %v1893_v59, 16  ;;  %v326_v0 = vshll.u32 %v1893_v59, 16  ;;  %v1542_v1 = vld [vmem:[%s1833_s22 + $0x1c] sm:$0x1]  ;;  %v1744_v53 = vld [vmem:[%s2288_s1] sm:$0xff]  }
  0x1f   : > { %v472_v2 = vsel %vm1850_vm2, %v1526_v57, %v471_v54  ;;  %v332_v3 = vshll.u32 %v1840_v12, 16  ;;  %v337_v4 = vshrl.u32 %v1896_v60, 16  ;;  %v340_v5 = vshll.u32 %v1896_v60, 16  ;;  %v1543_v6 = vld [vmem:[%s1833_s22 + $0x24] sm:$0x1]  ;;  %1670 = vmatprep.subr.bf16.mxu0 %v1744_v53  ;;  %1688 = vmatprep.subr.bf16.mxu1 %v1744_v53 }
  0x20   : > { %989 = vrot.lane.b32.xlu0 %v1616_v61, %s1777_s25  ;;  %v476_v7 = vsel %vm1850_vm2, %v1527_v58, %v475_v62  ;;  %v325_v8 = vrot.slane %v323_v63, 4  ;;  %v328_v9 = vrot.slane %v326_v0, 5  ;;  %v346_v10 = vshll.u32 %v1844_v17, 16  ;;  %v1550_v11 = vld [vmem:[%s1833_s22 + $0x18] sm:$0xe]  ;;  %1671 = vmatpush3.bf16.msra.mxu0 %v1744_v53 }
  0x21   : > { %v1605_v13 = vcombine.low %v472_v2, %v476_v7  ;;  %v334_v12 = vrot.slane %v332_v3, 5  ;;  %v339_v14 = vrot.slane %v337_v4, 4  ;;  %v342_v15 = vrot.slane %v340_v5, 5  ;;  %v1551_v16 = vld [vmem:[%s1833_s22 + $0x20] sm:$0xe]  ;;  %1693 = vmatpush3.bf16.msra.mxu1 %v1744_v53 }
  0x22   : > { %v329_v18 = vor.u32 %v328_v9, %v325_v8  ;;  %v348_v19 = vrot.slane %v346_v10, 5  ;;  %v1558_v20 = vrot.slane %v1550_v11, 9  ;;  %v659_v21 = vrot.slane %v1542_v1, 5  ;;  %v1916_v22 = vld [vmem:[%s1833_s22 + $0x10] sm:$0xf] }
  0x23   : > { %923 = vrot.lane.b32.xlu1 %v1605_v13, %s1776_s24  ;;  %v343_v17 = vor.u32 %v342_v15, %v339_v14  ;;  %v1559_v25 = vrot.slane %v1551_v16, 9  ;;  %v663_v26 = vrot.slane %v1543_v6, 5  ;;  %v1926_v27 = vld [vmem:[%s1833_s22 + $0x18] sm:$0xf]  ;;  %v351_v28 = vshrl.u32 %v1916_v22, 16 }
  0x24   : > { %v330_v29 = vrot.slane %v329_v18, 4  ;;  %v660_v30 = vsel %vm1850_vm2, %v1558_v20, %v659_v21  ;;  %v354_v31 = vshll.u32 %v1916_v22, 16  ;;  %v360_v32 = vshll.u32 %v1874_v44, 16  ;;  %v1943_v52 = vld [vmem:[%s1833_s22 + $0x20] sm:$0xf] }
  0x25   : > { %v344_v36 = vrot.slane %v343_v17, 4  ;;  %v664_v37 = vsel %vm1850_vm2, %v1559_v25, %v663_v26  ;;  %v353_v38 = vrot.slane %v351_v28, 4  ;;  %v365_v39 = vshrl.u32 %v1926_v27, 16  ;;  %v1967_v11 = vld [vmem:[%s1833_s22 + $0x10] sm:$0xf] }
  0x26   : > { %v335_v42 = vsel %vm1921_vm5, %v330_v29, %v334_v12  ;;  %v1617_v43 = vcombine.low %v660_v30, %v664_v37  ;;  %v356_v45 = vrot.slane %v354_v31, 5  ;;  %v362_v46 = vrot.slane %v360_v32, 5  ;;  %v1976_v16 = vld [vmem:[%s1833_s22 + $0x18] sm:$0xf]  ;;  %v1988_v25 = vld [vmem:[%s1833_s22 + $0x24] sm:$0x1] }
  0x27   : > { %v349_v47 = vsel %vm1921_vm5, %v344_v36, %v348_v19  ;;  %v367_v48 = vrot.slane %v365_v39, 4  ;;  %v368_v51 = vshll.u32 %v1926_v27, 16  ;;  %v374_v44 = vshll.u32 %v1881_v49, 16  ;;  %v1991_v26 = vld [vmem:[%s1833_s22 + $0x2c] sm:$0x1] }
  0x28   : > { %v1600_v54 = vcombine.low %v335_v42, %v349_v47  ;;  %991 = vrot.lane.b32.xlu1 %v1617_v43, %s1777_s25  ;;  %v357_v55 = vor.u32 %v356_v45, %v353_v38  ;;  %v551_v56 = vshll.u32 %v1542_v1, 16  ;;  %v565_v57 = vshll.u32 %v1543_v6, 16  ;;  %v1567_v6 = vld [vmem:[%s1833_s22 + $0x28] sm:$0xf]  ;;  %v1995_v32 = vld [vmem:[%s1833_s22 + $0x14] sm:$0x1] }
  0x29   : > { %v370_v58 = vrot.slane %v368_v51, 5  ;;  %v376_v61 = vrot.slane %v374_v44, 5  ;;  %v523_v62 = vshll.u32 %v1857_v33, 16  ;;  %v537_v63 = vshll.u32 %v1860_v34, 16  ;;  %v1745_v34 = vld [vmem:[%s2288_s1 + $0x8] sm:$0xff]   ;;  %v1747_v43 = vld [vmem:[%s2288_s1 + $0x18] sm:$0xff]  }
  0x2a   : > { %901 = vrot.lane.b32.xlu0 %v1600_v54, %s1778_s28  ;;  %v358_v49 = vrot.slane %v357_v55, 4  ;;  %v553_v0 = vrot.slane %v551_v56, 5  ;;  %v567_v2 = vrot.slane %v565_v57, 5  ;;  %v730_v3 = vshrl.u32 %v1943_v52, 16  ;;  %1672 = vmatprep.subr.bf16.mxu0 %v1745_v34  ;;  %v2001_v42 = vld [vmem:[%s1833_s22 + $0x1c] sm:$0x1] }
  0x2b   : > { %v371_v1 = vor.u32 %v370_v58, %v367_v48  ;;  %v525_v4 = vrot.slane %v523_v62, 5  ;;  %v539_v5 = vrot.slane %v537_v63, 5  ;;  %v733_v33 = vshll.u32 %v1943_v52, 16  ;;  %1689 = vmatprep.subr.bf16.mxu1 %v1745_v34  ;;  %1673 = vmatpush3.bf16.msra.mxu0 %v1745_v34  ;;  %v2012_v54 = vld [vmem:[%s1833_s22 + $0x20] sm:$0xf] }
  0x2c   : > { %v363_v7 = vsel %vm1921_vm5, %v358_v49, %v362_v46  ;;  %v554_v8 = vsel %vm1921_vm5, %v1869_v40, %v553_v0  ;;  %v568_v9 = vsel %vm1921_vm5, %v1862_v35, %v567_v2  ;;  %v732_v10 = vrot.slane %v730_v3, 4  ;;  %v1746_v35 = vld [vmem:[%s2288_s1 + $0x10] sm:$0xff]   ;;  %1694 = vmatpush3.bf16.msra.mxu1 %v1745_v34  ;;  %v2019_v2 = vld [vmem:[%s1833_s22 + $0x28] sm:$0xf]  ;;  %v1749_v24 = vld [vmem:[%s2288_s1 + $0x20] ss:$0 sps:$4 sm:$0xff]  }
  0x2d   : > { %v372_v13 = vrot.slane %v371_v1, 4  ;;  %v1613_v12 = vcombine.low %v554_v8, %v568_v9  ;;  %v526_v14 = vsel %vm1921_vm5, %v1883_v50, %v525_v4  ;;  %v540_v15 = vsel %vm1921_vm5, %v1871_v41, %v539_v5  ;;  %1674 = vmatprep.subr.bf16.mxu0 %v1746_v35  ;;  %1690 = vmatprep.subr.bf16.mxu1 %v1746_v35  ;;  %v2025_v4 = vld [vmem:[%s1833_s22 + $0x2c] sm:$0x1]  ;;  %v1580_v9 = vld [vmem:[%s1833_s22 + $0x10] sm:$0xe] }
  0x2e   : > { %v1612_v40 = vcombine.low %v526_v14, %v540_v15  ;;  %v735_v18 = vrot.slane %v733_v33, 5  ;;  %v744_v19 = vshrl.u32 %v1567_v6, 16  ;;  %v747_v20 = vshll.u32 %v1567_v6, 16  ;;  %v1581_v14 = vld [vmem:[%s1833_s22 + $0x18] sm:$0xe] }
  0x2f   : > { %v377_v50 = vsel %vm1921_vm5, %v372_v13, %v376_v61  ;;  %971 = vrot.lane.b32.xlu1 %v1613_v12, %s1779_s7  ;;  %v1621_v41 = vcombine.low %v1943_v52, %v1567_v6  ;;  %v702_v21 = vshrl.u32 %v1967_v11, 16  ;;  %v705_v17 = vshll.u32 %v1967_v11, 16  ;;  %1675 = vmatpush3.bf16.msra.mxu0 %v1746_v35  ;;  %v2016_v61 = vld [vmem:[%s1833_s22 + $0x24] sm:$0x1] }
  0x30   : > { %v1601_v28 = vcombine.low %v363_v7, %v377_v50  ;;  %v746_v29 = vrot.slane %v744_v19, 4  ;;  %v749_v30 = vrot.slane %v747_v20, 5  ;;  %v716_v31 = vshrl.u32 %v1976_v16, 16  ;;  %1676 = vmatprep.subr.bf16.mxu0 %v1747_v43  ;;  %1695 = vmatpush3.bf16.msra.mxu1 %v1746_v35 }
  0x31   : > { %v704_v36 = vrot.slane %v702_v21, 4  ;;  %v707_v37 = vrot.slane %v705_v17, 5  ;;  %v719_v38 = vshll.u32 %v1976_v16, 16  ;;  %v1620_v39 = vcombine.low %v1967_v11, %v1976_v16  ;;  %1691 = vmatprep.subr.bf16.mxu1 %v1747_v43  ;;  %v2047_v21 = vld [vmem:[%s1833_s22 + $0x38] sm:$0xf] }
  0x32   : > { %903 = vrot.lane.b32.xlu0 %v1601_v28, %s1778_s28  ;;  %v718_v45 = vrot.slane %v716_v31, 4  ;;  %v736_v46 = vor.u32 %v735_v18, %v732_v10  ;;  %v739_v47 = vshll.u32 %v1988_v25, 16  ;;  %v750_v48 = vor.u32 %v749_v30, %v746_v29  ;;  %v2042_v18 = vld [vmem:[%s1833_s22 + $0x30] sm:$0xf]  ;;  %v317_v17 = vld [vmem:[%s1833_s22 + $0x34] sm:$0x1] }
  0x33   : > { %1019 = vrot.lane.b32.xlu1 %v1621_v41, %s1780_s10  ;;  %v721_v51 = vrot.slane %v719_v38, 5  ;;  %v753_v44 = vshll.u32 %v1991_v26, 16  ;;  %v708_v52 = vor.u32 %v707_v37, %v704_v36  ;;  %v711_v53 = vshll.u32 %v1995_v32, 16  ;;  %1677 = vmatpush3.bf16.msra.mxu0 %v1747_v43 }
  0x34   : > { %v737_v55 = vrot.slane %v736_v46, 4  ;;  %v741_v56 = vrot.slane %v739_v47, 5  ;;  %v751_v57 = vrot.slane %v750_v48, 4  ;;  %v725_v58 = vshll.u32 %v2001_v42, 16  ;;  %1696 = vmatpush3.bf16.msra.mxu1 %v1747_v43  ;;  %v318_v46 = vld [vmem:[%s1833_s22 + $0x3c] sm:$0x1]  ;;  %1698 = vmatprep.subr.msk.bf16.mxu0 %vm1193_vm6, %v1749_v24 }
  0x35   : > { %v755_v62 = vrot.slane %v753_v44, 5  ;;  %v709_v63 = vrot.slane %v708_v52, 4  ;;  %v713_v49 = vrot.slane %v711_v53, 5  ;;  %v722_v0 = vor.u32 %v721_v51, %v718_v45  ;;  %v1582_v51 = vld [vmem:[%s1833_s22 + $0x20] sm:$0xe]  ;;  %1699 = vmatprep.subr.msk.bf16.mxu1 %vm1193_vm6, %v1749_v24 }
  0x36   : > { %969 = vrot.lane.b32.xlu0 %v1612_v40, %s1779_s7  ;;  %v742_v3 = vsel %vm1921_vm5, %v737_v55, %v741_v56  ;;  %v727_v1 = vrot.slane %v725_v58, 5  ;;  %v379_v5 = vshrl.u32 %v2012_v54, 16  ;;  %v382_v6 = vshll.u32 %v2012_v54, 16  ;;  %v1583_v53 = vld [vmem:[%s1833_s22 + $0x28] sm:$0xe] }
  0x37   : > { %v756_v33 = vsel %vm1921_vm5, %v751_v57, %v755_v62  ;;  %v714_v34 = vsel %vm1921_vm5, %v709_v63, %v713_v49  ;;  %v723_v7 = vrot.slane %v722_v0, 4  ;;  %v388_v8 = vshll.u32 %v2016_v61, 16 }
  0x38   : > { %v1625_v10 = vcombine.low %v742_v3, %v756_v33  ;;  %v381_v11 = vrot.slane %v379_v5, 4  ;;  %v384_v13 = vrot.slane %v382_v6, 5  ;;  %v393_v12 = vshrl.u32 %v2019_v2, 16  ;;  %v440_v3 = vld [vmem:[%s1833_s22 + $0x30] sm:$0xe] }
  0x39   : > { %v728_v15 = vsel %vm1921_vm5, %v723_v7, %v727_v1  ;;  %v390_v16 = vrot.slane %v388_v8, 5  ;;  %v396_v35 = vshll.u32 %v2019_v2, 16  ;;  %v402_v40 = vshll.u32 %v2025_v4, 16 }
  0x3a   : > { %1017 = vrot.lane.b32.xlu0 %v1620_v39, %s1780_s10  ;;  %1039 = vrot.lane.b32.xlu1 %v1625_v10, %s1781_s11  ;;  %v1624_v19 = vcombine.low %v714_v34, %v728_v15  ;;  %v385_v20 = vor.u32 %v384_v13, %v381_v11  ;;  %v395_v50 = vrot.slane %v393_v12, 4  ;;  %v1588_v41 = vrot.slane %v1580_v9, 9  ;;  %v441_v34 = vld [vmem:[%s1833_s22 + $0x38] sm:$0xe]  ;;  %v438_v11 = vld [vmem:[%s1833_s22 + $0x20] sm:$0xe] }
  0x3b   : > { %v398_v28 = vrot.slane %v396_v35, 5  ;;  %v404_v29 = vrot.slane %v402_v40, 5  ;;  %v839_v30 = vrot.slane %v1995_v32, 5  ;;  %v1589_v31 = vrot.slane %v1581_v14, 9  ;;  %v439_v15 = vld [vmem:[%s1833_s22 + $0x28] sm:$0xe] }
  0x3c   : > { %v386_v36 = vrot.slane %v385_v20, 4  ;;  %v843_v37 = vrot.slane %v2001_v42, 5  ;;  %v407_v38 = vshrl.u32 %v2042_v18, 16  ;;  %v410_v39 = vshll.u32 %v2042_v18, 16  ;;  %v2086_v20 = vld [vmem:[%s1833_s22 + $0x40] sm:$0xf] }
  0x3d   : > { %v399_v43 = vor.u32 %v398_v28, %v395_v50  ;;  %v840_v45 = vsel %vm1850_vm2, %v1588_v41, %v839_v30  ;;  %v416_v47 = vshll.u32 %v317_v17, 16  ;;  %v421_v48 = vshrl.u32 %v2047_v21, 16 }
  0x3e   : > { %1037 = vrot.lane.b32.xlu0 %v1624_v19, %s1781_s11  ;;  %v391_v32 = vsel %vm1921_vm5, %v386_v36, %v390_v16  ;;  %v844_v42 = vsel %vm1850_vm2, %v1589_v31, %v843_v37  ;;  %v409_v44 = vrot.slane %v407_v38, 4  ;;  %v412_v52 = vrot.slane %v410_v39, 5 }
  0x3f   : > { %v400_v55 = vrot.slane %v399_v43, 4  ;;  %v1628_v56 = vcombine.low %v840_v45, %v844_v42  ;;  %v418_v57 = vrot.slane %v416_v47, 5  ;;  %v423_v58 = vrot.slane %v421_v48, 4  ;;  %v1537_v48 = vld [vmem:[%s1833_s22 + $0x30] sm:$0xf] }
  0x40   : > { %v413_v62 = vor.u32 %v412_v52, %v409_v44  ;;  %v424_v63 = vshll.u32 %v2047_v21, 16  ;;  %v430_v49 = vshll.u32 %v318_v46, 16  ;;  %v1590_v0 = vrot.slane %v1582_v51, 9  ;;  %v1546_v52 = vld [vmem:[%s1833_s22 + $0x3c] sm:$0x1] }
  0x41   : > { %v405_v1 = vsel %vm1921_vm5, %v400_v55, %v404_v29  ;;  %v847_v5 = vrot.slane %v1988_v25, 5  ;;  %v1591_v6 = vrot.slane %v1583_v53, 9  ;;  %v851_v33 = vrot.slane %v1991_v26, 5  ;;  %v2080_v26 = vld [vmem:[%s1833_s22 + $0x38] sm:$0xf] }
  0x42   : > { %v1602_v7 = vcombine.low %v391_v32, %v405_v1  ;;  %1057 = vrot.lane.b32.xlu0 %v1628_v56, %s1782_s12  ;;  %v414_v8 = vrot.slane %v413_v62, 4  ;;  %v426_v9 = vrot.slane %v424_v63, 5  ;;  %v432_v10 = vrot.slane %v430_v49, 5  ;;  %v1545_v1 = vld [vmem:[%s1833_s22 + $0x34] sm:$0x1] }
  0x43   : > { %v848_v13 = vsel %vm1850_vm2, %v1590_v0, %v847_v5  ;;  %v852_v25 = vsel %vm1850_vm2, %v1591_v6, %v851_v33  ;;  %v1530_v12 = vrot.slane %v440_v3, 9  ;;  %v487_v14 = vrot.slane %v317_v17, 5  ;;  %v1544_v3 = vld [vmem:[%s1833_s22 + $0x2c] sm:$0x1] }
  0x44   : > { %905 = vrot.lane.b32.xlu1 %v1602_v7, %s1778_s28  ;;  %v419_v16 = vsel %vm1921_vm5, %v414_v8, %v418_v57  ;;  %v427_v35 = vor.u32 %v426_v9, %v423_v58  ;;  %v1629_v40 = vcombine.low %v848_v13, %v852_v25  ;;  %v1531_v19 = vrot.slane %v441_v34, 9  ;;  %v1547_v58 = vld [vmem:[%s1833_s22 + $0x44] sm:$0x1]  ;;  %v1554_v7 = vld [vmem:[%s1833_s22 + $0x38] sm:$0xe] }
  0x45   : > { %v488_v50 = vsel %vm1850_vm2, %v1530_v12, %v487_v14  ;;  %v491_v41 = vrot.slane %v318_v46, 5  ;;  %v1528_v28 = vrot.slane %v438_v11, 9  ;;  %v479_v17 = vrot.slane %v2016_v61, 5  ;;  %v1536_v61 = vld [vmem:[%s1833_s22 + $0x28] sm:$0xf] }
  0x46   : > { %v428_v29 = vrot.slane %v427_v35, 4  ;;  %1059 = vrot.lane.b32.xlu0 %v1629_v40, %s1782_s12  ;;  %v1529_v30 = vrot.slane %v439_v15, 9  ;;  %v483_v31 = vrot.slane %v2025_v4, 5  ;;  %v598_v36 = vshrl.u32 %v2080_v26, 16  ;;  %v1555_v15 = vld [vmem:[%s1833_s22 + $0x40] sm:$0xe] }
  0x47   : > { %v492_v37 = vsel %vm1850_vm2, %v1531_v19, %v491_v41  ;;  %v480_v38 = vsel %vm1850_vm2, %v1528_v28, %v479_v17  ;;  %v601_v39 = vshll.u32 %v2080_v26, 16  ;;  %v612_v43 = vshrl.u32 %v2086_v20, 16  ;;  %v1552_v19 = vld [vmem:[%s1833_s22 + $0x28] sm:$0xe] }
  0x48   : > { %v433_v45 = vsel %vm1921_vm5, %v428_v29, %v432_v10  ;;  %v1607_v46 = vcombine.low %v488_v50, %v492_v37  ;;  %v484_v4 = vsel %vm1850_vm2, %v1529_v30, %v483_v31  ;;  %v600_v47 = vrot.slane %v598_v36, 4  ;;  %v1553_v36 = vld [vmem:[%s1833_s22 + $0x30] sm:$0xe] }
  0x49   : > { %v1603_v51 = vcombine.low %v419_v16, %v433_v45  ;;  %v1606_v32 = vcombine.low %v480_v38, %v484_v4  ;;  %v603_v42 = vrot.slane %v601_v39, 5  ;;  %v614_v44 = vrot.slane %v612_v43, 4 }
  0x4a   : > { %v615_v53 = vshll.u32 %v2086_v20, 16  ;;  %v1611_v55 = vcombine.low %v2080_v26, %v2086_v20  ;;  %v570_v56 = vshrl.u32 %v1536_v61, 16  ;;  %v573_v57 = vshll.u32 %v1536_v61, 16 }
  0x4b   : > { %907 = vrot.lane.b32.xlu1 %v1603_v51, %s1778_s28  ;;  %925 = vrot.lane.b32.xlu0 %v1606_v32, %s1776_s24  ;;  %v584_v62 = vshrl.u32 %v1537_v48, 16  ;;  %v587_v63 = vshll.u32 %v1537_v48, 16  ;;  %v1610_v49 = vcombine.low %v1536_v61, %v1537_v48  ;;  %v604_v0 = vor.u32 %v603_v42, %v600_v47  ;;  %v2128_v61 = vld [vmem:[%s1833_s22 + $0x40] sm:$0xf]  ;;  %v1571_v48 = vld [vmem:[%s1833_s22 + $0x48] sm:$0xf] }
  0x4c   : > { %v617_v5 = vrot.slane %v615_v53, 5  ;;  %v572_v6 = vrot.slane %v570_v56, 4  ;;  %v575_v33 = vrot.slane %v573_v57, 5  ;;  %v607_v34 = vshll.u32 %v1546_v52, 16 }
  0x4d   : > { %v586_v8 = vrot.slane %v584_v62, 4  ;;  %v589_v9 = vrot.slane %v587_v63, 5  ;;  %v605_v10 = vrot.slane %v604_v0, 4  ;;  %v621_v11 = vshll.u32 %v1547_v58, 16 }
  0x4e   : > { %v609_v13 = vrot.slane %v607_v34, 5  ;;  %v618_v25 = vor.u32 %v617_v5, %v614_v44  ;;  %v576_v12 = vor.u32 %v575_v33, %v572_v6  ;;  %v579_v14 = vshll.u32 %v1544_v3, 16  ;;  %v1579_v34 = vld [vmem:[%s1833_s22 + $0x4c] sm:$0x1] }
  0x4f   : > { %927 = vrot.lane.b32.xlu1 %v1607_v46, %s1776_s24  ;;  %953 = vrot.lane.b32.xlu0 %v1610_v49, %s1775_s23  ;;  %v623_v26 = vrot.slane %v621_v11, 5  ;;  %v590_v16 = vor.u32 %v589_v9, %v586_v8  ;;  %v593_v35 = vshll.u32 %v1545_v1, 16  ;;  %v1562_v40 = vrot.slane %v1554_v7, 9  ;;  %v1576_v11 = vld [vmem:[%s1833_s22 + $0x34] sm:$0x1]  ;;  %s1652_s24 = sshll.u32 %s2301_s15, 5 }
  0x50   : > { %v610_v20 = vsel %vm1921_vm5, %v605_v10, %v609_v13  ;;  %v619_v50 = vrot.slane %v618_v25, 4  ;;  %v577_v41 = vrot.slane %v576_v12, 4  ;;  %v581_v28 = vrot.slane %v579_v14, 5  ;;  %s2249_s27 = scalar_lea.vmem %s2290_s3, %s1652_s24 }
  0x51   : > { %v591_v17 = vrot.slane %v590_v16, 4  ;;  %v595_v29 = vrot.slane %v593_v35, 5  ;;  %v675_v30 = vrot.slane %v1546_v52, 5  ;;  %v1563_v31 = vrot.slane %v1555_v15, 9  ;;  %v1568_v52 = vld [vmem:[%s1833_s22 + $0x30] sm:$0xf] }
  0x52   : > { %v624_v37 = vsel %vm1921_vm5, %v619_v50, %v623_v26  ;;  %v582_v38 = vsel %vm1921_vm5, %v577_v41, %v581_v28  ;;  %v679_v39 = vrot.slane %v1547_v58, 5  ;;  %v1560_v43 = vrot.slane %v1552_v19, 9  ;;  %v1569_v58 = vld [vmem:[%s1833_s22 + $0x38] sm:$0xf]  ;;  %v1577_v15 = vld [vmem:[%s1833_s22 + $0x3c] sm:$0x1] }
  0x53   : > { %955 = vrot.lane.b32.xlu1 %v1611_v55, %s1775_s23  ;;  %v1615_v45 = vcombine.low %v610_v20, %v624_v37  ;;  %v596_v46 = vsel %vm1921_vm5, %v591_v17, %v595_v29  ;;  %v676_v4 = vsel %vm1850_vm2, %v1562_v40, %v675_v30  ;;  %v667_v47 = vrot.slane %v1544_v3, 5  ;;  %v1578_v3 = vld [vmem:[%s1833_s22 + $0x44] sm:$0x1]  ;;  %v1586_v19 = vld [vmem:[%s1833_s22 + $0x40] sm:$0xe] }
  0x54   : > { %v1614_v51 = vcombine.low %v582_v38, %v596_v46  ;;  %v680_v32 = vsel %vm1850_vm2, %v1563_v31, %v679_v39  ;;  %v1561_v42 = vrot.slane %v1553_v36, 9  ;;  %v671_v44 = vrot.slane %v1545_v1, 5  ;;  %v1587_v36 = vld [vmem:[%s1833_s22 + $0x48] sm:$0xe] }
  0x55   : > { %v1619_v53 = vcombine.low %v676_v4, %v680_v32  ;;  %v668_v55 = vsel %vm1850_vm2, %v1560_v43, %v667_v47  ;;  %v786_v56 = vshrl.u32 %v2128_v61, 16  ;;  %v789_v57 = vshll.u32 %v2128_v61, 16 }
  0x56   : > { %973 = vrot.lane.b32.xlu0 %v1614_v51, %s1779_s7  ;;  %v672_v62 = vsel %vm1850_vm2, %v1561_v42, %v671_v44  ;;  %v800_v63 = vshrl.u32 %v1571_v48, 16  ;;  %v803_v49 = vshll.u32 %v1571_v48, 16  ;;  %v1623_v0 = vcombine.low %v2128_v61, %v1571_v48  ;;  %v1584_v61 = vld [vmem:[%s1833_s22 + $0x30] sm:$0xe]  ;;  %v1585_v48 = vld [vmem:[%s1833_s22 + $0x38] sm:$0xe] }
  0x57   : > { %975 = vrot.lane.b32.xlu1 %v1615_v45, %s1779_s7  ;;  %v1618_v1 = vcombine.low %v668_v55, %v672_v62  ;;  %v788_v5 = vrot.slane %v786_v56, 4  ;;  %v791_v6 = vrot.slane %v789_v57, 5  ;;  %v758_v33 = vshrl.u32 %v1568_v52, 16 }
  0x58   : > { %v802_v7 = vrot.slane %v800_v63, 4  ;;  %v805_v8 = vrot.slane %v803_v49, 5  ;;  %v761_v9 = vshll.u32 %v1568_v52, 16  ;;  %v772_v10 = vshrl.u32 %v1569_v58, 16 }
  0x59   : > { %v760_v13 = vrot.slane %v758_v33, 4  ;;  %v775_v25 = vshll.u32 %v1569_v58, 16  ;;  %v1622_v12 = vcombine.low %v1568_v52, %v1569_v58  ;;  %v792_v14 = vor.u32 %v791_v6, %v788_v5 }
  0x5a   : > { %993 = vrot.lane.b32.xlu0 %v1618_v1, %s1777_s25  ;;  %v763_v26 = vrot.slane %v761_v9, 5  ;;  %v774_v16 = vrot.slane %v772_v10, 4  ;;  %v795_v35 = vshll.u32 %v1578_v3, 16  ;;  %v806_v40 = vor.u32 %v805_v8, %v802_v7 }
  0x5b   : > { %995 = vrot.lane.b32.xlu1 %v1619_v53, %s1777_s25  ;;  %v777_v20 = vrot.slane %v775_v25, 5  ;;  %v793_v50 = vrot.slane %v792_v14, 4  ;;  %v809_v41 = vshll.u32 %v1579_v34, 16  ;;  %v767_v28 = vshll.u32 %v1576_v11, 16 }
  0x5c   : > { %v797_v17 = vrot.slane %v795_v35, 5  ;;  %v807_v29 = vrot.slane %v806_v40, 4  ;;  %v764_v30 = vor.u32 %v763_v26, %v760_v13  ;;  %v781_v31 = vshll.u32 %v1577_v15, 16 }
  0x5d   : > { %v811_v37 = vrot.slane %v809_v41, 5  ;;  %v769_v38 = vrot.slane %v767_v28, 5  ;;  %v778_v39 = vor.u32 %v777_v20, %v774_v16  ;;  %v1594_v43 = vrot.slane %v1586_v19, 9 }
  0x5e   : > { %1021 = vrot.lane.b32.xlu0 %v1622_v12, %s1780_s10  ;;  %v798_v45 = vsel %vm1921_vm5, %v793_v50, %v797_v17  ;;  %v765_v46 = vrot.slane %v764_v30, 4  ;;  %v783_v4 = vrot.slane %v781_v31, 5  ;;  %v863_v47 = vrot.slane %v1578_v3, 5 }
  0x5f   : > { %1023 = vrot.lane.b32.xlu1 %v1623_v0, %s1780_s10  ;;  %v812_v51 = vsel %vm1921_vm5, %v807_v29, %v811_v37  ;;  %v779_v32 = vrot.slane %v778_v39, 4  ;;  %v1595_v42 = vrot.slane %v1587_v36, 9  ;;  %v867_v44 = vrot.slane %v1579_v34, 5 }
  0x60   : > { %v1627_v52 = vcombine.low %v798_v45, %v812_v51  ;;  %v770_v53 = vsel %vm1921_vm5, %v765_v46, %v769_v38  ;;  %v864_v55 = vsel %vm1850_vm2, %v1594_v43, %v863_v47  ;;  %v1592_v56 = vrot.slane %v1584_v61, 9 }
  0x61   : > { %v784_v57 = vsel %vm1921_vm5, %v779_v32, %v783_v4  ;;  %v868_v58 = vsel %vm1850_vm2, %v1595_v42, %v867_v44  ;;  %v855_v62 = vrot.slane %v1576_v11, 5  ;;  %v1593_v63 = vrot.slane %v1585_v48, 9 }
  0x62   : > { %v1626_v49 = vcombine.low %v770_v53, %v784_v57  ;;  %v859_v0 = vrot.slane %v1577_v15, 5  ;;  %v1631_v3 = vcombine.low %v864_v55, %v868_v58  ;;  %v1597_v5 = vcombine.low %v1916_v22, %v1926_v27 }
  0x63   : > { %1043 = vrot.lane.b32.xlu1 %v1627_v52, %s1781_s11  ;;  %v856_v1 = vsel %vm1850_vm2, %v1592_v56, %v855_v62  ;;  %v1598_v34 = vcombine.low %v2012_v54, %v2019_v2  ;;  %v1599_v7 = vcombine.low %v2042_v18, %v2047_v21  ;;  %v1195_v22 = vsel %vm1193_vm6, %v1749_v24, 0 }
  0x64   : > { %1041 = vrot.lane.b32.xlu0 %v1626_v49, %s1781_s11  ;;  %v860_v6 = vsel %vm1850_vm2, %v1593_v63, %v859_v0  ;;  %1679 = vmatpush3.bf16.msra.mxu0 %v1195_v22  ;;  %v1596_v25 = vcombine.low %v1893_v59, %v1896_v60 }
  0x65   : > { %v1630_v33 = vcombine.low %v856_v1, %v860_v6  ;;  %1697 = vmatpush3.bf16.msra.mxu1 %v1195_v22 }
  0x67   : > { %1063 = vrot.lane.b32.xlu1 %v1631_v3, %s1782_s12 }
  0x68   : > { %1061 = vrot.lane.b32.xlu0 %v1630_v33, %s1782_s12 }
  0x87   : > { %v952_v27 = vpop.permute.xlu1 %951 }
  0x88   : > { %v950_v23 = vpop.permute.xlu0 %949 }
  0x90   : > { %v922_v8 = vpop.permute.xlu1 %921 }
  0x92   : > { %v990_v9 = vpop.permute.xlu0 %989 }
  0x95   : > { %v924_v10 = vpop.permute.xlu1 %923 }
  0x9a   : > { %v992_v13 = vpop.permute.xlu1 %991 }
  0x9c   : > { %v902_v11 = vpop.permute.xlu0 %901 }
  0x9d   : > { %v1068_v15 = vsel %vm1065_vm7, %v1596_v25, %v902_v11 }
  0x9e   : > { %v1080_v35 = vsel %vm1078_vm8, %v1068_v15, %v922_v8  ;;  %v1632_v8 = vld [vmem:[%s2289_s2] ss:$0 sm:$0xff] }
  0x9f   : > { %v1089_v50 = vsel %vm1087_vm9, %v1080_v35, %v950_v23  ;;  %v1783_v23 = vmov 0.0  }
  0xa0   : > { %1337 = vst.msk [vmem:[%s2238_s21] sm:$0x1] %vm1336_vm0, %v1783_v23 }
  0xa1   : > { %v972_v14 = vpop.permute.xlu1 %971 }
  0xa4   : > { %v904_v12 = vpop.permute.xlu0 %903 }
  0xa5   : > { %v1071_v16 = vsel %vm1065_vm7, %v1597_v5, %v904_v12  ;;  %v1020_v40 = vpop.permute.xlu1 %1019 }
  0xa6   : > { %v1082_v20 = vsel %vm1078_vm8, %v1071_v16, %v924_v10 }
  0xa7   : > { %v1091_v60 = vsel %vm1087_vm9, %v1082_v20, %v952_v27 }
  0xa8   : > { %v970_v26 = vpop.permute.xlu0 %969  ;;  %v1100_v29 = vsel %vm1096_vm10, %v1091_v60, %v972_v14 }
  0xa9   : > { %v1098_v59 = vsel %vm1096_vm10, %v1089_v50, %v970_v26  ;;  %v1109_v38 = vsel %vm1105_vm11, %v1100_v29, %v992_v13 }
  0xaa   : > { %v1107_v17 = vsel %vm1105_vm11, %v1098_v59, %v990_v9  ;;  %v1118_v39 = vsel %vm1114_vm12, %v1109_v38, %v1020_v40 }
  0xac   : > { %v1018_v19 = vpop.permute.xlu0 %1017  ;;  %v1040_v28 = vpop.permute.xlu1 %1039 }
  0xad   : > { %v1116_v30 = vsel %vm1114_vm12, %v1107_v17, %v1018_v19  ;;  %v1127_v61 = vsel %vm1123_vm13, %v1118_v39, %v1040_v28 }
  0xb0   : > { %v1038_v41 = vpop.permute.xlu0 %1037 }
  0xb1   : > { %v1125_v31 = vsel %vm1123_vm13, %v1116_v30, %v1038_v41 }
  0xb4   : > { %v1058_v36 = vpop.permute.xlu0 %1057 }
  0xb5   : > { %v1134_v37 = vsel %vm1132_vm14, %v1125_v31, %v1058_v36 }
  0xb6   : > { %1680 = vmatprep.mubr.msk.bf16.mxu0 %vm1184_vm15, %v1134_v37  ;;  %v906_v43 = vpop.permute.xlu1 %905 }
  0xb7   : > { %v1074_v58 = vsel %vm1065_vm7, %v1598_v34, %v906_v43 }
  0xb8   : > { %v1060_v45 = vpop.permute.xlu0 %1059 }
  0xb9   : > { %v1136_v46 = vsel %vm1132_vm14, %v1127_v61, %v1060_v45 }
  0xba   : > { %1681 = vmatmul.mubr.msk.bf16.vlgmr.msra.gmra.mrb[0].mxu0 %vm1184_vm15, %v1136_v46 }
  0xbd   : > { %v908_v4 = vpop.permute.xlu1 %907  ;;  %v926_v47 = vpop.permute.xlu0 %925 }
  0xbe   : > { %v1077_v57 = vsel %vm1065_vm7, %v1599_v7, %v908_v4  ;;  %v1084_v62 = vsel %vm1078_vm8, %v1074_v58, %v926_v47 }
  0xc1   : > { %v928_v48 = vpop.permute.xlu1 %927  ;;  %v954_v51 = vpop.permute.xlu0 %953 }
  0xc2   : > { %v1086_v49 = vsel %vm1078_vm8, %v1077_v57, %v928_v48  ;;  %v1093_v0 = vsel %vm1087_vm9, %v1084_v62, %v954_v51 }
  0xc5   : > { %v956_v32 = vpop.permute.xlu1 %955 }
  0xc6   : > { %v1095_v1 = vsel %vm1087_vm9, %v1086_v49, %v956_v32 }
  0xc8   : > { %v974_v42 = vpop.permute.xlu0 %973 }
  0xc9   : > { %v976_v44 = vpop.permute.xlu1 %975  ;;  %v1102_v18 = vsel %vm1096_vm10, %v1093_v0, %v974_v42 }
  0xca   : > { %v1104_v21 = vsel %vm1096_vm10, %v1095_v1, %v976_v44 }
  0xcc   : > { %v994_v52 = vpop.permute.xlu0 %993 }
  0xcd   : > { %v996_v53 = vpop.permute.xlu1 %995  ;;  %v1111_v5 = vsel %vm1105_vm11, %v1102_v18, %v994_v52 }
  0xce   : > { %v1113_v54 = vsel %vm1105_vm11, %v1104_v21, %v996_v53 }
  0xd0   : > { %v1022_v55 = vpop.permute.xlu0 %1021 }
  0xd1   : > { %v1024_v56 = vpop.permute.xlu1 %1023  ;;  %v1120_v2 = vsel %vm1114_vm12, %v1111_v5, %v1022_v55  ;;  %v1338_v5 = vld [vmem:[%s2238_s21] sm:$0x1] }
  0xd2   : > { %v1122_v6 = vsel %vm1114_vm12, %v1113_v54, %v1024_v56 }
  0xd5   : > { %v1044_v63 = vpop.permute.xlu1 %1043 }
  0xd6   : > { %v1042_v3 = vpop.permute.xlu0 %1041  ;;  %v1131_v7 = vsel %vm1123_vm13, %v1122_v6, %v1044_v63 }
  0xd7   : > { %v1129_v33 = vsel %vm1123_vm13, %v1120_v2, %v1042_v3 }
  0xd9   : > { %v1064_v24 = vpop.permute.xlu1 %1063 }
  0xda   : > { %v1062_v34 = vpop.permute.xlu0 %1061  ;;  %v1140_v27 = vsel %vm1132_vm14, %v1131_v7, %v1064_v24 }
  0xdb   : > { %v1138_v22 = vsel %vm1132_vm14, %v1129_v33, %v1062_v34 }
  0xdc   : > { %1684 = vmatprep.mubr.msk.bf16.mxu1 %vm1184_vm15, %v1138_v22 }
  0xdd   : > { %1685 = vmatmul.mubr.msk.bf16.vlgmr.msra.gmra.mrb[0].mxu1 %vm1184_vm15, %v1140_v27 }
 0x18d   : > { %v1682_v9 = vpop.f32.mrb[0].mxu0 }
 0x18e   : > { %v1240_v10 = vadd.f32 %v1682_v9, %v1632_v8  ;;  %v1231_v11 = vpop.f32.mrb[1].mxu0 }
 0x18f   : > { %v1232_v13 = vadd.f32 %v1632_v8, %v1231_v11  ;;  %v1683_v25 = vpop.f32.mrb[2].mxu0 }
 0x190   : > { %v1264_v12 = vmax.f32 %v1240_v10, 0.0  ;;  %v1243_v14 = vadd.f32 %v1683_v25, %v1632_v8  ;;  %v1234_v15 = vpop.f32.mrb[3].mxu0 }
 0x191   : > { %v1262_v26 = vmax.f32 %v1232_v13, 0.0  ;;  %v1235_v16 = vadd.f32 %v1632_v8, %v1234_v15 }
 0x192   : > { %v1655_v35 = vpack.c.bf16 %v1264_v12, %v1264_v12  ;;  %v1265_v40 = vmax.f32 %v1243_v14, 0.0  ;;  %v1314_v17 = vsel %vm1065_vm7, %v1264_v12, 0.0 }
 0x193   : > { %v1653_v19 = vpack.c.bf16 %v1262_v26, %v1262_v26  ;;  %v1263_v20 = vmax.f32 %v1235_v16, 0.0  ;;  %v1311_v59 = vsel %vm1065_vm7, %v1262_v26, 0.0 }
 0x194   : > { %1305 = vst.msk [vmem:[%s2249_s27 + $0x8] sm:$0xf] %vm1302_vm1, %v1655_v35  ;;  %v1656_v50 = vpack.c.bf16 %v1265_v40, %v1265_v40  ;;  %v1316_v30 = vsel %vm1065_vm7, %v1265_v40, 0.0 }
 0x195   : > { %1303 = vst.msk [vmem:[%s2249_s27] sm:$0xf] %vm1302_vm1, %v1653_v19  ;;  %v1654_v60 = vpack.c.bf16 %v1263_v20, %v1263_v20  ;;  %v1312_v41 = vsel %vm1065_vm7, %v1263_v20, 0.0 }
 0x196   : > { %1306 = vst.msk [vmem:[%s2249_s27 + $0xc] sm:$0xf] %vm1302_vm1, %v1656_v50  ;;  %v1313_v28 = vadd.f32 %v1312_v41, %v1311_v59 }
 0x197   : > { %1304 = vst.msk [vmem:[%s2249_s27 + $0x4] sm:$0xf] %vm1302_vm1, %v1654_v60 }
 0x198   : > { %v1315_v29 = vadd.f32 %v1314_v17, %v1313_v28 }
 0x19a   : > { %v1317_v31 = vadd.f32 %v1316_v30, %v1315_v29 }
 0x1b0   : > { %v1686_v36 = vpop.f32.mrb[0].mxu1 }
 0x1b1   : > { %v1256_v37 = vadd.f32 %v1686_v36, %v1632_v8  ;;  %v1247_v38 = vpop.f32.mrb[1].mxu1 }
 0x1b2   : > { %v1248_v39 = vadd.f32 %v1632_v8, %v1247_v38  ;;  %v1687_v43 = vpop.f32.mrb[2].mxu1 }
 0x1b3   : > { %v1268_v61 = vmax.f32 %v1256_v37, 0.0  ;;  %v1259_v45 = vadd.f32 %v1687_v43, %v1632_v8  ;;  %v1250_v46 = vpop.f32.mrb[3].mxu1 }
 0x1b4   : > { %v1266_v4 = vmax.f32 %v1248_v39, 0.0  ;;  %v1251_v47 = vadd.f32 %v1632_v8, %v1250_v46 }
 0x1b5   : > { %v1659_v48 = vpack.c.bf16 %v1268_v61, %v1268_v61  ;;  %v1269_v51 = vmax.f32 %v1259_v45, 0.0  ;;  %v1322_v58 = vsel %vm1065_vm7, %v1268_v61, 0.0 }
 0x1b6   : > { %v1657_v32 = vpack.c.bf16 %v1266_v4, %v1266_v4  ;;  %v1318_v42 = vsel %vm1065_vm7, %v1266_v4, 0.0  ;;  %v1267_v44 = vmax.f32 %v1251_v47, 0.0 }
 0x1b7   : > { %1309 = vst.msk [vmem:[%s2249_s27 + $0x18] sm:$0xf] %vm1302_vm1, %v1659_v48  ;;  %v1319_v52 = vadd.f32 %v1318_v42, %v1317_v31  ;;  %v1660_v53 = vpack.c.bf16 %v1269_v51, %v1269_v51  ;;  %v1324_v63 = vsel %vm1065_vm7, %v1269_v51, 0.0 }
 0x1b8   : > { %1307 = vst.msk [vmem:[%s2249_s27 + $0x10] sm:$0xf] %vm1302_vm1, %v1657_v32  ;;  %v1658_v55 = vpack.c.bf16 %v1267_v44, %v1267_v44  ;;  %v1320_v56 = vsel %vm1065_vm7, %v1267_v44, 0.0 }
 0x1b9   : > { %1310 = vst.msk [vmem:[%s2249_s27 + $0x1c] sm:$0xf] %vm1302_vm1, %v1660_v53  ;;  %v1321_v57 = vadd.f32 %v1320_v56, %v1319_v52 }
 0x1ba   : > { %1308 = vst.msk [vmem:[%s2249_s27 + $0x14] sm:$0xf] %vm1302_vm1, %v1658_v55 }
 0x1bb   : > { %v1323_v62 = vadd.f32 %v1322_v58, %v1321_v57 }
 0x1bd   : > { %v1325_v49 = vadd.f32 %v1324_v63, %v1323_v62 }
 0x1bf   : > { %v1326_v0 = vrot.slane %v1325_v49, 4 }
 0x1c1   : > { %v1327_v3 = vadd.f32 %v1326_v0, %v1325_v49 }
 0x1c3   : > { %v1328_v1 = vrot.slane %v1327_v3, 2 }
 0x1c5   : > { %v1329_v18 = vadd.f32 %v1328_v1, %v1327_v3 }
 0x1c7   : > { %v1330_v21 = vrot.slane %v1329_v18, 1 }
 0x1c9   : > { %v1331_v54 = vadd.f32 %v1330_v21, %v1329_v18 }
 0x1cb   : > { %v1339_v2 = vadd.f32 %v1338_v5, %v1331_v54 }
 0x1cd   : > { %1341 = vst.msk [vmem:[%s2238_s21] sm:$0x1] %vm1336_vm0, %v1339_v2 }
 0x1ce PF: > { %s15_s17 = sadd.s32 1, %s1773_s17   ;;  %s2296_s15 = smov %s1769_s16 }
 0x1cf   : > { %p12_p5 = scmp.ge.s32.totalorder %s15_s17, 4   ;;  %s2297_s16 = smov %s2299_s18 }
 0x1d1   :  { %14 = sbr.rel (!%p12_p5) target bundleno = 2 (0x2), region = 87 }

</bundles_post_ra>
